<compile_context>
chip_gen: v6e
topology: v6e:2x2x1
jax: 0.10.0
libtpu: 0.0.40
codegen_flags: <defaults>
</compile_context>

<pallas_src>
import functools

import jax
import jax.numpy as jnp
from jax import lax
from jax.experimental import pallas as pl
from jax.experimental.pallas import tpu as pltpu


def _round_up(x, m):
    return ((x + m - 1) // m) * m


# ----------------------------- Pallas kernel --------------------------------

def _fused_conv_kernel(x_ref, w_ref, b_ref, o_ref, slab_ref, *,
                       taps, row_chunks, owl, cin_gp, sh):
    """One (group, batch-sample) tile of the fused/pruned convolution.

    x_ref   : (1, 1, HP, CIN_GP, WPX)  bf16 padded image (rows lane-aligned)
    w_ref   : (1, COUT_GP, K)          bf16 fused+pruned weight, K = KH*KW*CIN_GP
    b_ref   : (1, COUT_GP, 1)          f32  fused+pruned bias
    o_ref   : (1, 1, COUT_GP, OH*OWL)  f32  lane-dense output
    slab_ref: (K, TR*OWL)              bf16 VMEM scratch (contraction-stacked
                                       im2col slab for one row chunk)
    """
    w = w_ref[0]                      # (COUT_GP, K), VMEM-resident
    bias = b_ref[0]                   # (COUT_GP, 1)
    for r0, tr in row_chunks:         # static unroll over output-row chunks
        # Build the RHS slab: slab[t*CIN_GP:(t+1)*CIN_GP, j*OWL:(j+1)*OWL]
        # holds tap t's input window for output row (r0 + j).  Row selection
        # is outer-dim indexing (lane-aligned rows); only the small column
        # offset `coff` is a lane-window shift.  All stores are aligned.
        for j in range(tr):
            base_row = (r0 + j) * sh                       # row stride in-kernel
            for t, (roff, coff) in enumerate(taps):
                piece = x_ref[0, 0, base_row + roff, :, pl.ds(coff, owl)]
                slab_ref[pl.ds(t * cin_gp, cin_gp), pl.ds(j * owl, owl)] = piece
        # One MXU matmul per chunk with K = KH*KW*CIN_GP (taps in the
        # contraction) and M = tr*OWL lanes; accumulate in f32 on the MXU.
        acc = jnp.dot(w, slab_ref[:, :tr * owl],
                      preferred_element_type=jnp.float32)  # (COUT_GP, tr*OWL)
        o_ref[0, 0, :, pl.ds(r0 * owl, tr * owl)] = acc + bias


# ------------------------------ Forward glue --------------------------------

def fuse_conv_bn_params(conv_w, conv_b, bn_gamma, bn_beta, bn_mean, bn_var, eps):
    scale = bn_gamma / jnp.sqrt(bn_var + eps)
    w_fused = conv_w * scale[:, None, None, None]
    b_fused = (conv_b - bn_mean) * scale + bn_beta
    return w_fused, b_fused


def sparse_fused_conv_bn_forward(x, params, conv_cfg):
    """Eval-mode forward of SparseFusedConv2dBatchNorm2d.

    x: (N, Cin, H, W) float32 (NCHW, like PyTorch).  Returns (N, Cout, OH, OW).
    """
    (conv_w, conv_b, bn_gamma, bn_beta, bn_mean, bn_var,
     weight_mask, bias_mask) = params
    eps = conv_cfg["eps"]
    sh, sw = conv_cfg["stride"]
    ph, pw = conv_cfg["padding"]
    dh, dw = conv_cfg["dilation"]
    groups = conv_cfg["groups"]

    # BN fusion + pruning masks (cheap elementwise glue, stays in XLA).
    w_fused, b_fused = fuse_conv_bn_params(
        conv_w, conv_b, bn_gamma, bn_beta, bn_mean, bn_var, eps)
    w = w_fused * weight_mask                      # (Cout, Cin/g, KH, KW)
    b = b_fused * bias_mask                        # (Cout,)

    n, cin, h, wid = x.shape
    cout, cin_g, kh, kw = w.shape
    cout_g = cout // groups
    hp, wp = h + 2 * ph, wid + 2 * pw
    oh = (hp - dh * (kh - 1) - 1) // sh + 1
    ow = (wp - dw * (kw - 1) - 1) // sw + 1
    ow_full = wp - dw * (kw - 1)                   # stride-1 columns per row

    cin_gp = _round_up(cin_g, 16)                  # bf16 sublane packing
    cout_gp = _round_up(cout_g, 8)
    owl = _round_up(ow_full, 128)                  # lane-dense row width
    wpx = _round_up(dw * (kw - 1) + owl, 128)      # padded image row width
    k_dim = kh * kw * cin_gp                       # matmul contraction
    tr = max(1, min(oh, 1024 // owl))              # output rows per chunk
    row_chunks = tuple((r0, min(tr, oh - r0)) for r0 in range(0, oh, tr))
    taps = tuple((ih * dh, iw * dw) for ih in range(kh) for iw in range(kw))

    # Activations: (N,Cin,H,W) -> (N, groups, HP, CIN_GP, WPX) bf16.
    x5 = x.reshape(n, groups, cin_g, h, wid)
    x5 = jnp.transpose(x5, (0, 1, 3, 2, 4))        # channels onto sublanes
    x5 = jnp.pad(x5, ((0, 0), (0, 0), (ph, ph),
                      (0, cin_gp - cin_g), (pw, wpx - wid - pw)))
    xk = x5.astype(jnp.bfloat16)

    # Weights: (Cout, Cin/g, KH, KW) -> (groups, COUT_GP, KH*KW*CIN_GP) bf16.
    wg = w.reshape(groups, cout_g, cin_g, kh, kw)
    wg = jnp.transpose(wg, (0, 1, 3, 4, 2))        # (g, cout_g, kh, kw, cin_g)
    wg = jnp.pad(wg, ((0, 0), (0, cout_gp - cout_g), (0, 0), (0, 0),
                      (0, cin_gp - cin_g)))
    wk = wg.reshape(groups, cout_gp, k_dim).astype(jnp.bfloat16)

    bk = jnp.pad(b.reshape(groups, cout_g), ((0, 0), (0, cout_gp - cout_g)))
    bk = bk[:, :, None].astype(jnp.float32)        # (groups, COUT_GP, 1)

    # VMEM budget (double-buffered blocks + resident slab) clamped to HW cap.
    blk_x = hp * cin_gp * wpx * 2
    blk_w = cout_gp * _round_up(k_dim, 128) * 2
    blk_b = cout_gp * 128 * 4
    blk_o = cout_gp * oh * owl * 4
    blk_s = k_dim * tr * owl * 2
    need = 2 * (blk_x + blk_w + blk_b + blk_o) + blk_s + (4 << 20)
    try:
        vmem_cap = int(getattr(pltpu.get_tpu_info(), "vmem_capacity_bytes",
                               64 << 20))
    except Exception:
        vmem_cap = 64 << 20                        # conservative (v7x per-TC)
    vmem_limit = int(max(16 << 20,
                         min(max(need, 24 << 20), vmem_cap - (8 << 20),
                             110 << 20)))

    flops = 2 * groups * n * cout_gp * k_dim * oh * owl
    bytes_accessed = (xk.size * 2 + wk.size * 2 + bk.size * 4
                      + groups * n * cout_gp * oh * owl * 4)

    kernel = functools.partial(_fused_conv_kernel, taps=taps,
                               row_chunks=row_chunks, owl=owl,
                               cin_gp=cin_gp, sh=sh)

    out_k = pl.pallas_call(
        kernel,
        out_shape=jax.ShapeDtypeStruct((groups, n, cout_gp, oh * owl),
                                       jnp.float32),
        grid=(groups, n),
        in_specs=[
            pl.BlockSpec((1, 1, hp, cin_gp, wpx), lambda g, i: (i, g, 0, 0, 0)),
            pl.BlockSpec((1, cout_gp, k_dim), lambda g, i: (g, 0, 0)),
            pl.BlockSpec((1, cout_gp, 1), lambda g, i: (g, 0, 0)),
        ],
        out_specs=pl.BlockSpec((1, 1, cout_gp, oh * owl),
                               lambda g, i: (g, i, 0, 0)),
        scratch_shapes=[pltpu.VMEM((k_dim, tr * owl), jnp.bfloat16)],
        compiler_params=pltpu.CompilerParams(
            dimension_semantics=("parallel", "parallel"),
            vmem_limit_bytes=vmem_limit),
        cost_estimate=pl.CostEstimate(
            flops=flops, transcendentals=0, bytes_accessed=bytes_accessed),
    )(xk, wk, bk)

    # Unpack: drop channel/lane padding, subsample column stride, build NCHW.
    out_k = out_k.reshape(groups, n, cout_gp, oh, owl)
    out_k = out_k[:, :, :cout_g, :, :(ow - 1) * sw + 1:sw]
    out = jnp.transpose(out_k, (1, 0, 2, 3, 4)).reshape(n, cout, oh, ow)
    return out


# ------------------------------ Reference ------------------------------------

def _reference(x, params, conv_cfg):
    (conv_w, conv_b, bn_gamma, bn_beta, bn_mean, bn_var,
     weight_mask, bias_mask) = params
    w_fused, b_fused = fuse_conv_bn_params(
        conv_w, conv_b, bn_gamma, bn_beta, bn_mean, bn_var, conv_cfg["eps"])
    w_ref = w_fused * weight_mask
    b_ref = b_fused * bias_mask
    y = lax.conv_general_dilated(
        x, w_ref,
        window_strides=conv_cfg["stride"],
        padding=[(conv_cfg["padding"][0],) * 2, (conv_cfg["padding"][1],) * 2],
        rhs_dilation=conv_cfg["dilation"],
        dimension_numbers=("NCHW", "OIHW", "NCHW"),
        feature_group_count=conv_cfg["groups"],
        precision=lax.Precision.HIGHEST,
    )
    return y + b_ref[None, :, None, None]


# --------------------------------- Main ---------------------------------------

if __name__ == "__main__":
    key = jax.random.PRNGKey(0)
    keys = jax.random.split(key, 10)

    # Test 1: Conv2d(4, 8, 3, stride=1, padding=1) + BN(8), all-ones masks.
    N, CIN, H, W = 2, 4, 16, 16
    COUT, KH, KW = 8, 3, 3
    cfg1 = dict(stride=(1, 1), padding=(1, 1), dilation=(1, 1), groups=1, eps=1e-5)

    x = jax.random.normal(keys[0], (N, CIN, H, W), dtype=jnp.float32)
    conv_w = jax.random.normal(keys[1], (COUT, CIN, KH, KW), dtype=jnp.float32) * 0.1
    conv_b = jax.random.normal(keys[2], (COUT,), dtype=jnp.float32) * 0.1
    bn_gamma = 1.0 + 0.1 * jax.random.normal(keys[3], (COUT,), dtype=jnp.float32)
    bn_beta = 0.1 * jax.random.normal(keys[4], (COUT,), dtype=jnp.float32)
    bn_mean = 0.1 * jax.random.normal(keys[5], (COUT,), dtype=jnp.float32)
    bn_var = 0.5 + jnp.abs(jax.random.normal(keys[6], (COUT,), dtype=jnp.float32))
    params1 = (conv_w, conv_b, bn_gamma, bn_beta, bn_mean, bn_var,
               jnp.ones_like(conv_w), jnp.ones((COUT,), jnp.float32))

    fwd1 = jax.jit(functools.partial(sparse_fused_conv_bn_forward, conv_cfg=cfg1))
    y1 = fwd1(x, params1)
    jax.block_until_ready(y1)
    y1_ref = _reference(x, params1, cfg1)
    assert y1.shape == (N, COUT, H, W), y1.shape
    # bf16 inputs with f32 accumulation -> relaxed tolerance vs f32 reference.
    assert jnp.allclose(y1, y1_ref, rtol=5e-2, atol=5e-2), \
        float(jnp.max(jnp.abs(y1 - y1_ref)))

    # Test 2: grouped + strided conv with non-trivial pruning masks.
    cfg2 = dict(stride=(2, 2), padding=(1, 1), dilation=(1, 1), groups=2, eps=1e-5)
    conv_w2 = jax.random.normal(keys[7], (COUT, CIN // 2, KH, KW), jnp.float32) * 0.1
    wmask2 = (jax.random.uniform(keys[8], conv_w2.shape) > 0.3).astype(jnp.float32)
    bmask2 = (jax.random.uniform(keys[9], (COUT,)) > 0.3).astype(jnp.float32)
    params2 = (conv_w2, conv_b, bn_gamma, bn_beta, bn_mean, bn_var, wmask2, bmask2)

    fwd2 = jax.jit(functools.partial(sparse_fused_conv_bn_forward, conv_cfg=cfg2))
    y2 = fwd2(x, params2)
    jax.block_until_ready(y2)
    y2_ref = _reference(x, params2, cfg2)
    assert y2.shape == (N, COUT, 8, 8), y2.shape
    assert jnp.allclose(y2, y2_ref, rtol=5e-2, atol=5e-2), \
        float(jnp.max(jnp.abs(y2 - y2_ref)))

    print("KERNEL_OK")
</pallas_src>

<mosaic_0001>
module attributes {stable_mosaic.version = 11 : i64} {
  func.func @_fused_conv_kernel(%arg0: i32, %arg1: i32, %arg2: memref<1x1x18x16x256xbf16, #tpu.memory_space<vmem>>, %arg3: memref<1x8x144xbf16, #tpu.memory_space<vmem>>, %arg4: memref<1x8x1xf32, #tpu.memory_space<vmem>>, %arg5: memref<1x1x8x2048xf32, #tpu.memory_space<vmem>>, %arg6: memref<144x1024xbf16, #tpu.memory_space<vmem>>) attributes {dimension_semantics = [#tpu.dimension_semantics<parallel>, #tpu.dimension_semantics<parallel>], iteration_bounds = array<i64: 1, 2>, scalar_prefetch = 0 : i64, scratch_operands = 1 : i64, tpu.core_type = #tpu.core_type<tc>, window_params = [{transform_indices = @transform_0, window_bounds = array<i64: 1, 1, 18, 16, 256>}, {transform_indices = @transform_1, window_bounds = array<i64: 1, 8, 144>}, {transform_indices = @transform_2, window_bounds = array<i64: 1, 8, 1>}, {transform_indices = @transform_3, window_bounds = array<i64: 1, 1, 8, 2048>}]} {
    %c0 = arith.constant 0 : index
    %c0_0 = arith.constant 0 : index
    %c0_1 = arith.constant 0 : index
    %0 = vector.load %arg3[%c0, %c0_0, %c0_1] : memref<1x8x144xbf16, #tpu.memory_space<vmem>>, vector<1x8x144xbf16>
    %1 = vector.shape_cast %0 : vector<1x8x144xbf16> to vector<8x144xbf16>
    %c0_2 = arith.constant 0 : index
    %c0_3 = arith.constant 0 : index
    %c0_4 = arith.constant 0 : index
    %2 = vector.load %arg4[%c0_2, %c0_3, %c0_4] : memref<1x8x1xf32, #tpu.memory_space<vmem>>, vector<1x8x1xf32>
    %3 = vector.shape_cast %2 : vector<1x8x1xf32> to vector<8x1xf32>
    %c0_5 = arith.constant 0 : index
    %c0_6 = arith.constant 0 : index
    %c0_7 = arith.constant 0 : index
    %c0_8 = arith.constant 0 : index
    %c0_9 = arith.constant 0 : index
    %4 = vector.load %arg2[%c0_5, %c0_6, %c0_7, %c0_8, %c0_9] : memref<1x1x18x16x256xbf16, #tpu.memory_space<vmem>>, vector<1x1x1x16x128xbf16>
    %5 = vector.shape_cast %4 : vector<1x1x1x16x128xbf16> to vector<16x128xbf16>
    %c0_10 = arith.constant 0 : index
    %c0_11 = arith.constant 0 : index
    %6 = vector.load %arg6[%c0_10, %c0_11] : memref<144x1024xbf16, #tpu.memory_space<vmem>>, vector<16x128xbf16>
    tpu.vector_store %arg6[%c0_10, %c0_11], %5 {strides = array<i32>} : memref<144x1024xbf16, #tpu.memory_space<vmem>>, vector<16x128xbf16>,
    %c0_12 = arith.constant 0 : index
    %c0_13 = arith.constant 0 : index
    %c0_14 = arith.constant 0 : index
    %c0_15 = arith.constant 0 : index
    %c1 = arith.constant 1 : index
    %7 = vector.load %arg2[%c0_12, %c0_13, %c0_14, %c0_15, %c1] : memref<1x1x18x16x256xbf16, #tpu.memory_space<vmem>>, vector<1x1x1x16x128xbf16>
    %8 = vector.shape_cast %7 : vector<1x1x1x16x128xbf16> to vector<16x128xbf16>
    %c16 = arith.constant 16 : index
    %c0_16 = arith.constant 0 : index
    %9 = vector.load %arg6[%c16, %c0_16] : memref<144x1024xbf16, #tpu.memory_space<vmem>>, vector<16x128xbf16>
    tpu.vector_store %arg6[%c16, %c0_16], %8 {strides = array<i32>} : memref<144x1024xbf16, #tpu.memory_space<vmem>>, vector<16x128xbf16>,
    %c0_17 = arith.constant 0 : index
    %c0_18 = arith.constant 0 : index
    %c0_19 = arith.constant 0 : index
    %c0_20 = arith.constant 0 : index
    %c2 = arith.constant 2 : index
    %10 = vector.load %arg2[%c0_17, %c0_18, %c0_19, %c0_20, %c2] : memref<1x1x18x16x256xbf16, #tpu.memory_space<vmem>>, vector<1x1x1x16x128xbf16>
    %11 = vector.shape_cast %10 : vector<1x1x1x16x128xbf16> to vector<16x128xbf16>
    %c32 = arith.constant 32 : index
    %c0_21 = arith.constant 0 : index
    %12 = vector.load %arg6[%c32, %c0_21] : memref<144x1024xbf16, #tpu.memory_space<vmem>>, vector<16x128xbf16>
    tpu.vector_store %arg6[%c32, %c0_21], %11 {strides = array<i32>} : memref<144x1024xbf16, #tpu.memory_space<vmem>>, vector<16x128xbf16>,
    %c0_22 = arith.constant 0 : index
    %c0_23 = arith.constant 0 : index
    %c1_24 = arith.constant 1 : index
    %c0_25 = arith.constant 0 : index
    %c0_26 = arith.constant 0 : index
    %13 = vector.load %arg2[%c0_22, %c0_23, %c1_24, %c0_25, %c0_26] : memref<1x1x18x16x256xbf16, #tpu.memory_space<vmem>>, vector<1x1x1x16x128xbf16>
    %14 = vector.shape_cast %13 : vector<1x1x1x16x128xbf16> to vector<16x128xbf16>
    %c48 = arith.constant 48 : index
    %c0_27 = arith.constant 0 : index
    %15 = vector.load %arg6[%c48, %c0_27] : memref<144x1024xbf16, #tpu.memory_space<vmem>>, vector<16x128xbf16>
    tpu.vector_store %arg6[%c48, %c0_27], %14 {strides = array<i32>} : memref<144x1024xbf16, #tpu.memory_space<vmem>>, vector<16x128xbf16>,
    %c0_28 = arith.constant 0 : index
    %c0_29 = arith.constant 0 : index
    %c1_30 = arith.constant 1 : index
    %c0_31 = arith.constant 0 : index
    %c1_32 = arith.constant 1 : index
    %16 = vector.load %arg2[%c0_28, %c0_29, %c1_30, %c0_31, %c1_32] : memref<1x1x18x16x256xbf16, #tpu.memory_space<vmem>>, vector<1x1x1x16x128xbf16>
    %17 = vector.shape_cast %16 : vector<1x1x1x16x128xbf16> to vector<16x128xbf16>
    %c64 = arith.constant 64 : index
    %c0_33 = arith.constant 0 : index
    %18 = vector.load %arg6[%c64, %c0_33] : memref<144x1024xbf16, #tpu.memory_space<vmem>>, vector<16x128xbf16>
    tpu.vector_store %arg6[%c64, %c0_33], %17 {strides = array<i32>} : memref<144x1024xbf16, #tpu.memory_space<vmem>>, vector<16x128xbf16>,
    %c0_34 = arith.constant 0 : index
    %c0_35 = arith.constant 0 : index
    %c1_36 = arith.constant 1 : index
    %c0_37 = arith.constant 0 : index
    %c2_38 = arith.constant 2 : index
    %19 = vector.load %arg2[%c0_34, %c0_35, %c1_36, %c0_37, %c2_38] : memref<1x1x18x16x256xbf16, #tpu.memory_space<vmem>>, vector<1x1x1x16x128xbf16>
    %20 = vector.shape_cast %19 : vector<1x1x1x16x128xbf16> to vector<16x128xbf16>
    %c80 = arith.constant 80 : index
    %c0_39 = arith.constant 0 : index
    %21 = vector.load %arg6[%c80, %c0_39] : memref<144x1024xbf16, #tpu.memory_space<vmem>>, vector<16x128xbf16>
    tpu.vector_store %arg6[%c80, %c0_39], %20 {strides = array<i32>} : memref<144x1024xbf16, #tpu.memory_space<vmem>>, vector<16x128xbf16>,
    %c0_40 = arith.constant 0 : index
    %c0_41 = arith.constant 0 : index
    %c2_42 = arith.constant 2 : index
    %c0_43 = arith.constant 0 : index
    %c0_44 = arith.constant 0 : index
    %22 = vector.load %arg2[%c0_40, %c0_41, %c2_42, %c0_43, %c0_44] : memref<1x1x18x16x256xbf16, #tpu.memory_space<vmem>>, vector<1x1x1x16x128xbf16>
    %23 = vector.shape_cast %22 : vector<1x1x1x16x128xbf16> to vector<16x128xbf16>
    %c96 = arith.constant 96 : index
    %c0_45 = arith.constant 0 : index
    %24 = vector.load %arg6[%c96, %c0_45] : memref<144x1024xbf16, #tpu.memory_space<vmem>>, vector<16x128xbf16>
    tpu.vector_store %arg6[%c96, %c0_45], %23 {strides = array<i32>} : memref<144x1024xbf16, #tpu.memory_space<vmem>>, vector<16x128xbf16>,
    %c0_46 = arith.constant 0 : index
    %c0_47 = arith.constant 0 : index
    %c2_48 = arith.constant 2 : index
    %c0_49 = arith.constant 0 : index
    %c1_50 = arith.constant 1 : index
    %25 = vector.load %arg2[%c0_46, %c0_47, %c2_48, %c0_49, %c1_50] : memref<1x1x18x16x256xbf16, #tpu.memory_space<vmem>>, vector<1x1x1x16x128xbf16>
    %26 = vector.shape_cast %25 : vector<1x1x1x16x128xbf16> to vector<16x128xbf16>
    %c112 = arith.constant 112 : index
    %c0_51 = arith.constant 0 : index
    %27 = vector.load %arg6[%c112, %c0_51] : memref<144x1024xbf16, #tpu.memory_space<vmem>>, vector<16x128xbf16>
    tpu.vector_store %arg6[%c112, %c0_51], %26 {strides = array<i32>} : memref<144x1024xbf16, #tpu.memory_space<vmem>>, vector<16x128xbf16>,
    %c0_52 = arith.constant 0 : index
    %c0_53 = arith.constant 0 : index
    %c2_54 = arith.constant 2 : index
    %c0_55 = arith.constant 0 : index
    %c2_56 = arith.constant 2 : index
    %28 = vector.load %arg2[%c0_52, %c0_53, %c2_54, %c0_55, %c2_56] : memref<1x1x18x16x256xbf16, #tpu.memory_space<vmem>>, vector<1x1x1x16x128xbf16>
    %29 = vector.shape_cast %28 : vector<1x1x1x16x128xbf16> to vector<16x128xbf16>
    %c128 = arith.constant 128 : index
    %c0_57 = arith.constant 0 : index
    %30 = vector.load %arg6[%c128, %c0_57] : memref<144x1024xbf16, #tpu.memory_space<vmem>>, vector<16x128xbf16>
    tpu.vector_store %arg6[%c128, %c0_57], %29 {strides = array<i32>} : memref<144x1024xbf16, #tpu.memory_space<vmem>>, vector<16x128xbf16>,
    %c0_58 = arith.constant 0 : index
    %c0_59 = arith.constant 0 : index
    %c1_60 = arith.constant 1 : index
    %c0_61 = arith.constant 0 : index
    %c0_62 = arith.constant 0 : index
    %31 = vector.load %arg2[%c0_58, %c0_59, %c1_60, %c0_61, %c0_62] : memref<1x1x18x16x256xbf16, #tpu.memory_space<vmem>>, vector<1x1x1x16x128xbf16>
    %32 = vector.shape_cast %31 : vector<1x1x1x16x128xbf16> to vector<16x128xbf16>
    %c0_63 = arith.constant 0 : index
    %c128_64 = arith.constant 128 : index
    %33 = vector.load %arg6[%c0_63, %c128_64] : memref<144x1024xbf16, #tpu.memory_space<vmem>>, vector<16x128xbf16>
    tpu.vector_store %arg6[%c0_63, %c128_64], %32 {strides = array<i32>} : memref<144x1024xbf16, #tpu.memory_space<vmem>>, vector<16x128xbf16>,
    %c0_65 = arith.constant 0 : index
    %c0_66 = arith.constant 0 : index
    %c1_67 = arith.constant 1 : index
    %c0_68 = arith.constant 0 : index
    %c1_69 = arith.constant 1 : index
    %34 = vector.load %arg2[%c0_65, %c0_66, %c1_67, %c0_68, %c1_69] : memref<1x1x18x16x256xbf16, #tpu.memory_space<vmem>>, vector<1x1x1x16x128xbf16>
    %35 = vector.shape_cast %34 : vector<1x1x1x16x128xbf16> to vector<16x128xbf16>
    %c16_70 = arith.constant 16 : index
    %c128_71 = arith.constant 128 : index
    %36 = vector.load %arg6[%c16_70, %c128_71] : memref<144x1024xbf16, #tpu.memory_space<vmem>>, vector<16x128xbf16>
    tpu.vector_store %arg6[%c16_70, %c128_71], %35 {strides = array<i32>} : memref<144x1024xbf16, #tpu.memory_space<vmem>>, vector<16x128xbf16>,
    %c0_72 = arith.constant 0 : index
    %c0_73 = arith.constant 0 : index
    %c1_74 = arith.constant 1 : index
    %c0_75 = arith.constant 0 : index
    %c2_76 = arith.constant 2 : index
    %37 = vector.load %arg2[%c0_72, %c0_73, %c1_74, %c0_75, %c2_76] : memref<1x1x18x16x256xbf16, #tpu.memory_space<vmem>>, vector<1x1x1x16x128xbf16>
    %38 = vector.shape_cast %37 : vector<1x1x1x16x128xbf16> to vector<16x128xbf16>
    %c32_77 = arith.constant 32 : index
    %c128_78 = arith.constant 128 : index
    %39 = vector.load %arg6[%c32_77, %c128_78] : memref<144x1024xbf16, #tpu.memory_space<vmem>>, vector<16x128xbf16>
    tpu.vector_store %arg6[%c32_77, %c128_78], %38 {strides = array<i32>} : memref<144x1024xbf16, #tpu.memory_space<vmem>>, vector<16x128xbf16>,
    %c0_79 = arith.constant 0 : index
    %c0_80 = arith.constant 0 : index
    %c2_81 = arith.constant 2 : index
    %c0_82 = arith.constant 0 : index
    %c0_83 = arith.constant 0 : index
    %40 = vector.load %arg2[%c0_79, %c0_80, %c2_81, %c0_82, %c0_83] : memref<1x1x18x16x256xbf16, #tpu.memory_space<vmem>>, vector<1x1x1x16x128xbf16>
    %41 = vector.shape_cast %40 : vector<1x1x1x16x128xbf16> to vector<16x128xbf16>
    %c48_84 = arith.constant 48 : index
    %c128_85 = arith.constant 128 : index
    %42 = vector.load %arg6[%c48_84, %c128_85] : memref<144x1024xbf16, #tpu.memory_space<vmem>>, vector<16x128xbf16>
    tpu.vector_store %arg6[%c48_84, %c128_85], %41 {strides = array<i32>} : memref<144x1024xbf16, #tpu.memory_space<vmem>>, vector<16x128xbf16>,
    %c0_86 = arith.constant 0 : index
    %c0_87 = arith.constant 0 : index
    %c2_88 = arith.constant 2 : index
    %c0_89 = arith.constant 0 : index
    %c1_90 = arith.constant 1 : index
    %43 = vector.load %arg2[%c0_86, %c0_87, %c2_88, %c0_89, %c1_90] : memref<1x1x18x16x256xbf16, #tpu.memory_space<vmem>>, vector<1x1x1x16x128xbf16>
    %44 = vector.shape_cast %43 : vector<1x1x1x16x128xbf16> to vector<16x128xbf16>
    %c64_91 = arith.constant 64 : index
    %c128_92 = arith.constant 128 : index
    %45 = vector.load %arg6[%c64_91, %c128_92] : memref<144x1024xbf16, #tpu.memory_space<vmem>>, vector<16x128xbf16>
    tpu.vector_store %arg6[%c64_91, %c128_92], %44 {strides = array<i32>} : memref<144x1024xbf16, #tpu.memory_space<vmem>>, vector<16x128xbf16>,
    %c0_93 = arith.constant 0 : index
    %c0_94 = arith.constant 0 : index
    %c2_95 = arith.constant 2 : index
    %c0_96 = arith.constant 0 : index
    %c2_97 = arith.constant 2 : index
    %46 = vector.load %arg2[%c0_93, %c0_94, %c2_95, %c0_96, %c2_97] : memref<1x1x18x16x256xbf16, #tpu.memory_space<vmem>>, vector<1x1x1x16x128xbf16>
    %47 = vector.shape_cast %46 : vector<1x1x1x16x128xbf16> to vector<16x128xbf16>
    %c80_98 = arith.constant 80 : index
    %c128_99 = arith.constant 128 : index
    %48 = vector.load %arg6[%c80_98, %c128_99] : memref<144x1024xbf16, #tpu.memory_space<vmem>>, vector<16x128xbf16>
    tpu.vector_store %arg6[%c80_98, %c128_99], %47 {strides = array<i32>} : memref<144x1024xbf16, #tpu.memory_space<vmem>>, vector<16x128xbf16>,
    %c0_100 = arith.constant 0 : index
    %c0_101 = arith.constant 0 : index
    %c3 = arith.constant 3 : index
    %c0_102 = arith.constant 0 : index
    %c0_103 = arith.constant 0 : index
    %49 = vector.load %arg2[%c0_100, %c0_101, %c3, %c0_102, %c0_103] : memref<1x1x18x16x256xbf16, #tpu.memory_space<vmem>>, vector<1x1x1x16x128xbf16>
    %50 = vector.shape_cast %49 : vector<1x1x1x16x128xbf16> to vector<16x128xbf16>
    %c96_104 = arith.constant 96 : index
    %c128_105 = arith.constant 128 : index
    %51 = vector.load %arg6[%c96_104, %c128_105] : memref<144x1024xbf16, #tpu.memory_space<vmem>>, vector<16x128xbf16>
    tpu.vector_store %arg6[%c96_104, %c128_105], %50 {strides = array<i32>} : memref<144x1024xbf16, #tpu.memory_space<vmem>>, vector<16x128xbf16>,
    %c0_106 = arith.constant 0 : index
    %c0_107 = arith.constant 0 : index
    %c3_108 = arith.constant 3 : index
    %c0_109 = arith.constant 0 : index
    %c1_110 = arith.constant 1 : index
    %52 = vector.load %arg2[%c0_106, %c0_107, %c3_108, %c0_109, %c1_110] : memref<1x1x18x16x256xbf16, #tpu.memory_space<vmem>>, vector<1x1x1x16x128xbf16>
    %53 = vector.shape_cast %52 : vector<1x1x1x16x128xbf16> to vector<16x128xbf16>
    %c112_111 = arith.constant 112 : index
    %c128_112 = arith.constant 128 : index
    %54 = vector.load %arg6[%c112_111, %c128_112] : memref<144x1024xbf16, #tpu.memory_space<vmem>>, vector<16x128xbf16>
    tpu.vector_store %arg6[%c112_111, %c128_112], %53 {strides = array<i32>} : memref<144x1024xbf16, #tpu.memory_space<vmem>>, vector<16x128xbf16>,
    %c0_113 = arith.constant 0 : index
    %c0_114 = arith.constant 0 : index
    %c3_115 = arith.constant 3 : index
    %c0_116 = arith.constant 0 : index
    %c2_117 = arith.constant 2 : index
    %55 = vector.load %arg2[%c0_113, %c0_114, %c3_115, %c0_116, %c2_117] : memref<1x1x18x16x256xbf16, #tpu.memory_space<vmem>>, vector<1x1x1x16x128xbf16>
    %56 = vector.shape_cast %55 : vector<1x1x1x16x128xbf16> to vector<16x128xbf16>
    %c128_118 = arith.constant 128 : index
    %c128_119 = arith.constant 128 : index
    %57 = vector.load %arg6[%c128_118, %c128_119] : memref<144x1024xbf16, #tpu.memory_space<vmem>>, vector<16x128xbf16>
    tpu.vector_store %arg6[%c128_118, %c128_119], %56 {strides = array<i32>} : memref<144x1024xbf16, #tpu.memory_space<vmem>>, vector<16x128xbf16>,
    %c0_120 = arith.constant 0 : index
    %c0_121 = arith.constant 0 : index
    %c2_122 = arith.constant 2 : index
    %c0_123 = arith.constant 0 : index
    %c0_124 = arith.constant 0 : index
    %58 = vector.load %arg2[%c0_120, %c0_121, %c2_122, %c0_123, %c0_124] : memref<1x1x18x16x256xbf16, #tpu.memory_space<vmem>>, vector<1x1x1x16x128xbf16>
    %59 = vector.shape_cast %58 : vector<1x1x1x16x128xbf16> to vector<16x128xbf16>
    %c0_125 = arith.constant 0 : index
    %c256 = arith.constant 256 : index
    %60 = vector.load %arg6[%c0_125, %c256] : memref<144x1024xbf16, #tpu.memory_space<vmem>>, vector<16x128xbf16>
    tpu.vector_store %arg6[%c0_125, %c256], %59 {strides = array<i32>} : memref<144x1024xbf16, #tpu.memory_space<vmem>>, vector<16x128xbf16>,
    %c0_126 = arith.constant 0 : index
    %c0_127 = arith.constant 0 : index
    %c2_128 = arith.constant 2 : index
    %c0_129 = arith.constant 0 : index
    %c1_130 = arith.constant 1 : index
    %61 = vector.load %arg2[%c0_126, %c0_127, %c2_128, %c0_129, %c1_130] : memref<1x1x18x16x256xbf16, #tpu.memory_space<vmem>>, vector<1x1x1x16x128xbf16>
    %62 = vector.shape_cast %61 : vector<1x1x1x16x128xbf16> to vector<16x128xbf16>
    %c16_131 = arith.constant 16 : index
    %c256_132 = arith.constant 256 : index
    %63 = vector.load %arg6[%c16_131, %c256_132] : memref<144x1024xbf16, #tpu.memory_space<vmem>>, vector<16x128xbf16>
    tpu.vector_store %arg6[%c16_131, %c256_132], %62 {strides = array<i32>} : memref<144x1024xbf16, #tpu.memory_space<vmem>>, vector<16x128xbf16>,
    %c0_133 = arith.constant 0 : index
    %c0_134 = arith.constant 0 : index
    %c2_135 = arith.constant 2 : index
    %c0_136 = arith.constant 0 : index
    %c2_137 = arith.constant 2 : index
    %64 = vector.load %arg2[%c0_133, %c0_134, %c2_135, %c0_136, %c2_137] : memref<1x1x18x16x256xbf16, #tpu.memory_space<vmem>>, vector<1x1x1x16x128xbf16>
    %65 = vector.shape_cast %64 : vector<1x1x1x16x128xbf16> to vector<16x128xbf16>
    %c32_138 = arith.constant 32 : index
    %c256_139 = arith.constant 256 : index
    %66 = vector.load %arg6[%c32_138, %c256_139] : memref<144x1024xbf16, #tpu.memory_space<vmem>>, vector<16x128xbf16>
    tpu.vector_store %arg6[%c32_138, %c256_139], %65 {strides = array<i32>} : memref<144x1024xbf16, #tpu.memory_space<vmem>>, vector<16x128xbf16>,
    %c0_140 = arith.constant 0 : index
    %c0_141 = arith.constant 0 : index
    %c3_142 = arith.constant 3 : index
    %c0_143 = arith.constant 0 : index
    %c0_144 = arith.constant 0 : index
    %67 = vector.load %arg2[%c0_140, %c0_141, %c3_142, %c0_143, %c0_144] : memref<1x1x18x16x256xbf16, #tpu.memory_space<vmem>>, vector<1x1x1x16x128xbf16>
    %68 = vector.shape_cast %67 : vector<1x1x1x16x128xbf16> to vector<16x128xbf16>
    %c48_145 = arith.constant 48 : index
    %c256_146 = arith.constant 256 : index
    %69 = vector.load %arg6[%c48_145, %c256_146] : memref<144x1024xbf16, #tpu.memory_space<vmem>>, vector<16x128xbf16>
    tpu.vector_store %arg6[%c48_145, %c256_146], %68 {strides = array<i32>} : memref<144x1024xbf16, #tpu.memory_space<vmem>>, vector<16x128xbf16>,
    %c0_147 = arith.constant 0 : index
    %c0_148 = arith.constant 0 : index
    %c3_149 = arith.constant 3 : index
    %c0_150 = arith.constant 0 : index
    %c1_151 = arith.constant 1 : index
    %70 = vector.load %arg2[%c0_147, %c0_148, %c3_149, %c0_150, %c1_151] : memref<1x1x18x16x256xbf16, #tpu.memory_space<vmem>>, vector<1x1x1x16x128xbf16>
    %71 = vector.shape_cast %70 : vector<1x1x1x16x128xbf16> to vector<16x128xbf16>
    %c64_152 = arith.constant 64 : index
    %c256_153 = arith.constant 256 : index
    %72 = vector.load %arg6[%c64_152, %c256_153] : memref<144x1024xbf16, #tpu.memory_space<vmem>>, vector<16x128xbf16>
    tpu.vector_store %arg6[%c64_152, %c256_153], %71 {strides = array<i32>} : memref<144x1024xbf16, #tpu.memory_space<vmem>>, vector<16x128xbf16>,
    %c0_154 = arith.constant 0 : index
    %c0_155 = arith.constant 0 : index
    %c3_156 = arith.constant 3 : index
    %c0_157 = arith.constant 0 : index
    %c2_158 = arith.constant 2 : index
    %73 = vector.load %arg2[%c0_154, %c0_155, %c3_156, %c0_157, %c2_158] : memref<1x1x18x16x256xbf16, #tpu.memory_space<vmem>>, vector<1x1x1x16x128xbf16>
    %74 = vector.shape_cast %73 : vector<1x1x1x16x128xbf16> to vector<16x128xbf16>
    %c80_159 = arith.constant 80 : index
    %c256_160 = arith.constant 256 : index
    %75 = vector.load %arg6[%c80_159, %c256_160] : memref<144x1024xbf16, #tpu.memory_space<vmem>>, vector<16x128xbf16>
    tpu.vector_store %arg6[%c80_159, %c256_160], %74 {strides = array<i32>} : memref<144x1024xbf16, #tpu.memory_space<vmem>>, vector<16x128xbf16>,
    %c0_161 = arith.constant 0 : index
    %c0_162 = arith.constant 0 : index
    %c4 = arith.constant 4 : index
    %c0_163 = arith.constant 0 : index
    %c0_164 = arith.constant 0 : index
    %76 = vector.load %arg2[%c0_161, %c0_162, %c4, %c0_163, %c0_164] : memref<1x1x18x16x256xbf16, #tpu.memory_space<vmem>>, vector<1x1x1x16x128xbf16>
    %77 = vector.shape_cast %76 : vector<1x1x1x16x128xbf16> to vector<16x128xbf16>
    %c96_165 = arith.constant 96 : index
    %c256_166 = arith.constant 256 : index
    %78 = vector.load %arg6[%c96_165, %c256_166] : memref<144x1024xbf16, #tpu.memory_space<vmem>>, vector<16x128xbf16>
    tpu.vector_store %arg6[%c96_165, %c256_166], %77 {strides = array<i32>} : memref<144x1024xbf16, #tpu.memory_space<vmem>>, vector<16x128xbf16>,
    %c0_167 = arith.constant 0 : index
    %c0_168 = arith.constant 0 : index
    %c4_169 = arith.constant 4 : index
    %c0_170 = arith.constant 0 : index
    %c1_171 = arith.constant 1 : index
    %79 = vector.load %arg2[%c0_167, %c0_168, %c4_169, %c0_170, %c1_171] : memref<1x1x18x16x256xbf16, #tpu.memory_space<vmem>>, vector<1x1x1x16x128xbf16>
    %80 = vector.shape_cast %79 : vector<1x1x1x16x128xbf16> to vector<16x128xbf16>
    %c112_172 = arith.constant 112 : index
    %c256_173 = arith.constant 256 : index
    %81 = vector.load %arg6[%c112_172, %c256_173] : memref<144x1024xbf16, #tpu.memory_space<vmem>>, vector<16x128xbf16>
    tpu.vector_store %arg6[%c112_172, %c256_173], %80 {strides = array<i32>} : memref<144x1024xbf16, #tpu.memory_space<vmem>>, vector<16x128xbf16>,
    %c0_174 = arith.constant 0 : index
    %c0_175 = arith.constant 0 : index
    %c4_176 = arith.constant 4 : index
    %c0_177 = arith.constant 0 : index
    %c2_178 = arith.constant 2 : index
    %82 = vector.load %arg2[%c0_174, %c0_175, %c4_176, %c0_177, %c2_178] : memref<1x1x18x16x256xbf16, #tpu.memory_space<vmem>>, vector<1x1x1x16x128xbf16>
    %83 = vector.shape_cast %82 : vector<1x1x1x16x128xbf16> to vector<16x128xbf16>
    %c128_179 = arith.constant 128 : index
    %c256_180 = arith.constant 256 : index
    %84 = vector.load %arg6[%c128_179, %c256_180] : memref<144x1024xbf16, #tpu.memory_space<vmem>>, vector<16x128xbf16>
    tpu.vector_store %arg6[%c128_179, %c256_180], %83 {strides = array<i32>} : memref<144x1024xbf16, #tpu.memory_space<vmem>>, vector<16x128xbf16>,
    %c0_181 = arith.constant 0 : index
    %c0_182 = arith.constant 0 : index
    %c3_183 = arith.constant 3 : index
    %c0_184 = arith.constant 0 : index
    %c0_185 = arith.constant 0 : index
    %85 = vector.load %arg2[%c0_181, %c0_182, %c3_183, %c0_184, %c0_185] : memref<1x1x18x16x256xbf16, #tpu.memory_space<vmem>>, vector<1x1x1x16x128xbf16>
    %86 = vector.shape_cast %85 : vector<1x1x1x16x128xbf16> to vector<16x128xbf16>
    %c0_186 = arith.constant 0 : index
    %c384 = arith.constant 384 : index
    %87 = vector.load %arg6[%c0_186, %c384] : memref<144x1024xbf16, #tpu.memory_space<vmem>>, vector<16x128xbf16>
    tpu.vector_store %arg6[%c0_186, %c384], %86 {strides = array<i32>} : memref<144x1024xbf16, #tpu.memory_space<vmem>>, vector<16x128xbf16>,
    %c0_187 = arith.constant 0 : index
    %c0_188 = arith.constant 0 : index
    %c3_189 = arith.constant 3 : index
    %c0_190 = arith.constant 0 : index
    %c1_191 = arith.constant 1 : index
    %88 = vector.load %arg2[%c0_187, %c0_188, %c3_189, %c0_190, %c1_191] : memref<1x1x18x16x256xbf16, #tpu.memory_space<vmem>>, vector<1x1x1x16x128xbf16>
    %89 = vector.shape_cast %88 : vector<1x1x1x16x128xbf16> to vector<16x128xbf16>
    %c16_192 = arith.constant 16 : index
    %c384_193 = arith.constant 384 : index
    %90 = vector.load %arg6[%c16_192, %c384_193] : memref<144x1024xbf16, #tpu.memory_space<vmem>>, vector<16x128xbf16>
    tpu.vector_store %arg6[%c16_192, %c384_193], %89 {strides = array<i32>} : memref<144x1024xbf16, #tpu.memory_space<vmem>>, vector<16x128xbf16>,
    %c0_194 = arith.constant 0 : index
    %c0_195 = arith.constant 0 : index
    %c3_196 = arith.constant 3 : index
    %c0_197 = arith.constant 0 : index
    %c2_198 = arith.constant 2 : index
    %91 = vector.load %arg2[%c0_194, %c0_195, %c3_196, %c0_197, %c2_198] : memref<1x1x18x16x256xbf16, #tpu.memory_space<vmem>>, vector<1x1x1x16x128xbf16>
    %92 = vector.shape_cast %91 : vector<1x1x1x16x128xbf16> to vector<16x128xbf16>
    %c32_199 = arith.constant 32 : index
    %c384_200 = arith.constant 384 : index
    %93 = vector.load %arg6[%c32_199, %c384_200] : memref<144x1024xbf16, #tpu.memory_space<vmem>>, vector<16x128xbf16>
    tpu.vector_store %arg6[%c32_199, %c384_200], %92 {strides = array<i32>} : memref<144x1024xbf16, #tpu.memory_space<vmem>>, vector<16x128xbf16>,
    %c0_201 = arith.constant 0 : index
    %c0_202 = arith.constant 0 : index
    %c4_203 = arith.constant 4 : index
    %c0_204 = arith.constant 0 : index
    %c0_205 = arith.constant 0 : index
    %94 = vector.load %arg2[%c0_201, %c0_202, %c4_203, %c0_204, %c0_205] : memref<1x1x18x16x256xbf16, #tpu.memory_space<vmem>>, vector<1x1x1x16x128xbf16>
    %95 = vector.shape_cast %94 : vector<1x1x1x16x128xbf16> to vector<16x128xbf16>
    %c48_206 = arith.constant 48 : index
    %c384_207 = arith.constant 384 : index
    %96 = vector.load %arg6[%c48_206, %c384_207] : memref<144x1024xbf16, #tpu.memory_space<vmem>>, vector<16x128xbf16>
    tpu.vector_store %arg6[%c48_206, %c384_207], %95 {strides = array<i32>} : memref<144x1024xbf16, #tpu.memory_space<vmem>>, vector<16x128xbf16>,
    %c0_208 = arith.constant 0 : index
    %c0_209 = arith.constant 0 : index
    %c4_210 = arith.constant 4 : index
    %c0_211 = arith.constant 0 : index
    %c1_212 = arith.constant 1 : index
    %97 = vector.load %arg2[%c0_208, %c0_209, %c4_210, %c0_211, %c1_212] : memref<1x1x18x16x256xbf16, #tpu.memory_space<vmem>>, vector<1x1x1x16x128xbf16>
    %98 = vector.shape_cast %97 : vector<1x1x1x16x128xbf16> to vector<16x128xbf16>
    %c64_213 = arith.constant 64 : index
    %c384_214 = arith.constant 384 : index
    %99 = vector.load %arg6[%c64_213, %c384_214] : memref<144x1024xbf16, #tpu.memory_space<vmem>>, vector<16x128xbf16>
    tpu.vector_store %arg6[%c64_213, %c384_214], %98 {strides = array<i32>} : memref<144x1024xbf16, #tpu.memory_space<vmem>>, vector<16x128xbf16>,
    %c0_215 = arith.constant 0 : index
    %c0_216 = arith.constant 0 : index
    %c4_217 = arith.constant 4 : index
    %c0_218 = arith.constant 0 : index
    %c2_219 = arith.constant 2 : index
    %100 = vector.load %arg2[%c0_215, %c0_216, %c4_217, %c0_218, %c2_219] : memref<1x1x18x16x256xbf16, #tpu.memory_space<vmem>>, vector<1x1x1x16x128xbf16>
    %101 = vector.shape_cast %100 : vector<1x1x1x16x128xbf16> to vector<16x128xbf16>
    %c80_220 = arith.constant 80 : index
    %c384_221 = arith.constant 384 : index
    %102 = vector.load %arg6[%c80_220, %c384_221] : memref<144x1024xbf16, #tpu.memory_space<vmem>>, vector<16x128xbf16>
    tpu.vector_store %arg6[%c80_220, %c384_221], %101 {strides = array<i32>} : memref<144x1024xbf16, #tpu.memory_space<vmem>>, vector<16x128xbf16>,
    %c0_222 = arith.constant 0 : index
    %c0_223 = arith.constant 0 : index
    %c5 = arith.constant 5 : index
    %c0_224 = arith.constant 0 : index
    %c0_225 = arith.constant 0 : index
    %103 = vector.load %arg2[%c0_222, %c0_223, %c5, %c0_224, %c0_225] : memref<1x1x18x16x256xbf16, #tpu.memory_space<vmem>>, vector<1x1x1x16x128xbf16>
    %104 = vector.shape_cast %103 : vector<1x1x1x16x128xbf16> to vector<16x128xbf16>
    %c96_226 = arith.constant 96 : index
    %c384_227 = arith.constant 384 : index
    %105 = vector.load %arg6[%c96_226, %c384_227] : memref<144x1024xbf16, #tpu.memory_space<vmem>>, vector<16x128xbf16>
    tpu.vector_store %arg6[%c96_226, %c384_227], %104 {strides = array<i32>} : memref<144x1024xbf16, #tpu.memory_space<vmem>>, vector<16x128xbf16>,
    %c0_228 = arith.constant 0 : index
    %c0_229 = arith.constant 0 : index
    %c5_230 = arith.constant 5 : index
    %c0_231 = arith.constant 0 : index
    %c1_232 = arith.constant 1 : index
    %106 = vector.load %arg2[%c0_228, %c0_229, %c5_230, %c0_231, %c1_232] : memref<1x1x18x16x256xbf16, #tpu.memory_space<vmem>>, vector<1x1x1x16x128xbf16>
    %107 = vector.shape_cast %106 : vector<1x1x1x16x128xbf16> to vector<16x128xbf16>
    %c112_233 = arith.constant 112 : index
    %c384_234 = arith.constant 384 : index
    %108 = vector.load %arg6[%c112_233, %c384_234] : memref<144x1024xbf16, #tpu.memory_space<vmem>>, vector<16x128xbf16>
    tpu.vector_store %arg6[%c112_233, %c384_234], %107 {strides = array<i32>} : memref<144x1024xbf16, #tpu.memory_space<vmem>>, vector<16x128xbf16>,
    %c0_235 = arith.constant 0 : index
    %c0_236 = arith.constant 0 : index
    %c5_237 = arith.constant 5 : index
    %c0_238 = arith.constant 0 : index
    %c2_239 = arith.constant 2 : index
    %109 = vector.load %arg2[%c0_235, %c0_236, %c5_237, %c0_238, %c2_239] : memref<1x1x18x16x256xbf16, #tpu.memory_space<vmem>>, vector<1x1x1x16x128xbf16>
    %110 = vector.shape_cast %109 : vector<1x1x1x16x128xbf16> to vector<16x128xbf16>
    %c128_240 = arith.constant 128 : index
    %c384_241 = arith.constant 384 : index
    %111 = vector.load %arg6[%c128_240, %c384_241] : memref<144x1024xbf16, #tpu.memory_space<vmem>>, vector<16x128xbf16>
    tpu.vector_store %arg6[%c128_240, %c384_241], %110 {strides = array<i32>} : memref<144x1024xbf16, #tpu.memory_space<vmem>>, vector<16x128xbf16>,
    %c0_242 = arith.constant 0 : index
    %c0_243 = arith.constant 0 : index
    %c4_244 = arith.constant 4 : index
    %c0_245 = arith.constant 0 : index
    %c0_246 = arith.constant 0 : index
    %112 = vector.load %arg2[%c0_242, %c0_243, %c4_244, %c0_245, %c0_246] : memref<1x1x18x16x256xbf16, #tpu.memory_space<vmem>>, vector<1x1x1x16x128xbf16>
    %113 = vector.shape_cast %112 : vector<1x1x1x16x128xbf16> to vector<16x128xbf16>
    %c0_247 = arith.constant 0 : index
    %c512 = arith.constant 512 : index
    %114 = vector.load %arg6[%c0_247, %c512] : memref<144x1024xbf16, #tpu.memory_space<vmem>>, vector<16x128xbf16>
    tpu.vector_store %arg6[%c0_247, %c512], %113 {strides = array<i32>} : memref<144x1024xbf16, #tpu.memory_space<vmem>>, vector<16x128xbf16>,
    %c0_248 = arith.constant 0 : index
    %c0_249 = arith.constant 0 : index
    %c4_250 = arith.constant 4 : index
    %c0_251 = arith.constant 0 : index
    %c1_252 = arith.constant 1 : index
    %115 = vector.load %arg2[%c0_248, %c0_249, %c4_250, %c0_251, %c1_252] : memref<1x1x18x16x256xbf16, #tpu.memory_space<vmem>>, vector<1x1x1x16x128xbf16>
    %116 = vector.shape_cast %115 : vector<1x1x1x16x128xbf16> to vector<16x128xbf16>
    %c16_253 = arith.constant 16 : index
    %c512_254 = arith.constant 512 : index
    %117 = vector.load %arg6[%c16_253, %c512_254] : memref<144x1024xbf16, #tpu.memory_space<vmem>>, vector<16x128xbf16>
    tpu.vector_store %arg6[%c16_253, %c512_254], %116 {strides = array<i32>} : memref<144x1024xbf16, #tpu.memory_space<vmem>>, vector<16x128xbf16>,
    %c0_255 = arith.constant 0 : index
    %c0_256 = arith.constant 0 : index
    %c4_257 = arith.constant 4 : index
    %c0_258 = arith.constant 0 : index
    %c2_259 = arith.constant 2 : index
    %118 = vector.load %arg2[%c0_255, %c0_256, %c4_257, %c0_258, %c2_259] : memref<1x1x18x16x256xbf16, #tpu.memory_space<vmem>>, vector<1x1x1x16x128xbf16>
    %119 = vector.shape_cast %118 : vector<1x1x1x16x128xbf16> to vector<16x128xbf16>
    %c32_260 = arith.constant 32 : index
    %c512_261 = arith.constant 512 : index
    %120 = vector.load %arg6[%c32_260, %c512_261] : memref<144x1024xbf16, #tpu.memory_space<vmem>>, vector<16x128xbf16>
    tpu.vector_store %arg6[%c32_260, %c512_261], %119 {strides = array<i32>} : memref<144x1024xbf16, #tpu.memory_space<vmem>>, vector<16x128xbf16>,
    %c0_262 = arith.constant 0 : index
    %c0_263 = arith.constant 0 : index
    %c5_264 = arith.constant 5 : index
    %c0_265 = arith.constant 0 : index
    %c0_266 = arith.constant 0 : index
    %121 = vector.load %arg2[%c0_262, %c0_263, %c5_264, %c0_265, %c0_266] : memref<1x1x18x16x256xbf16, #tpu.memory_space<vmem>>, vector<1x1x1x16x128xbf16>
    %122 = vector.shape_cast %121 : vector<1x1x1x16x128xbf16> to vector<16x128xbf16>
    %c48_267 = arith.constant 48 : index
    %c512_268 = arith.constant 512 : index
    %123 = vector.load %arg6[%c48_267, %c512_268] : memref<144x1024xbf16, #tpu.memory_space<vmem>>, vector<16x128xbf16>
    tpu.vector_store %arg6[%c48_267, %c512_268], %122 {strides = array<i32>} : memref<144x1024xbf16, #tpu.memory_space<vmem>>, vector<16x128xbf16>,
    %c0_269 = arith.constant 0 : index
    %c0_270 = arith.constant 0 : index
    %c5_271 = arith.constant 5 : index
    %c0_272 = arith.constant 0 : index
    %c1_273 = arith.constant 1 : index
    %124 = vector.load %arg2[%c0_269, %c0_270, %c5_271, %c0_272, %c1_273] : memref<1x1x18x16x256xbf16, #tpu.memory_space<vmem>>, vector<1x1x1x16x128xbf16>
    %125 = vector.shape_cast %124 : vector<1x1x1x16x128xbf16> to vector<16x128xbf16>
    %c64_274 = arith.constant 64 : index
    %c512_275 = arith.constant 512 : index
    %126 = vector.load %arg6[%c64_274, %c512_275] : memref<144x1024xbf16, #tpu.memory_space<vmem>>, vector<16x128xbf16>
    tpu.vector_store %arg6[%c64_274, %c512_275], %125 {strides = array<i32>} : memref<144x1024xbf16, #tpu.memory_space<vmem>>, vector<16x128xbf16>,
    %c0_276 = arith.constant 0 : index
    %c0_277 = arith.constant 0 : index
    %c5_278 = arith.constant 5 : index
    %c0_279 = arith.constant 0 : index
    %c2_280 = arith.constant 2 : index
    %127 = vector.load %arg2[%c0_276, %c0_277, %c5_278, %c0_279, %c2_280] : memref<1x1x18x16x256xbf16, #tpu.memory_space<vmem>>, vector<1x1x1x16x128xbf16>
    %128 = vector.shape_cast %127 : vector<1x1x1x16x128xbf16> to vector<16x128xbf16>
    %c80_281 = arith.constant 80 : index
    %c512_282 = arith.constant 512 : index
    %129 = vector.load %arg6[%c80_281, %c512_282] : memref<144x1024xbf16, #tpu.memory_space<vmem>>, vector<16x128xbf16>
    tpu.vector_store %arg6[%c80_281, %c512_282], %128 {strides = array<i32>} : memref<144x1024xbf16, #tpu.memory_space<vmem>>, vector<16x128xbf16>,
    %c0_283 = arith.constant 0 : index
    %c0_284 = arith.constant 0 : index
    %c6 = arith.constant 6 : index
    %c0_285 = arith.constant 0 : index
    %c0_286 = arith.constant 0 : index
    %130 = vector.load %arg2[%c0_283, %c0_284, %c6, %c0_285, %c0_286] : memref<1x1x18x16x256xbf16, #tpu.memory_space<vmem>>, vector<1x1x1x16x128xbf16>
    %131 = vector.shape_cast %130 : vector<1x1x1x16x128xbf16> to vector<16x128xbf16>
    %c96_287 = arith.constant 96 : index
    %c512_288 = arith.constant 512 : index
    %132 = vector.load %arg6[%c96_287, %c512_288] : memref<144x1024xbf16, #tpu.memory_space<vmem>>, vector<16x128xbf16>
    tpu.vector_store %arg6[%c96_287, %c512_288], %131 {strides = array<i32>} : memref<144x1024xbf16, #tpu.memory_space<vmem>>, vector<16x128xbf16>,
    %c0_289 = arith.constant 0 : index
    %c0_290 = arith.constant 0 : index
    %c6_291 = arith.constant 6 : index
    %c0_292 = arith.constant 0 : index
    %c1_293 = arith.constant 1 : index
    %133 = vector.load %arg2[%c0_289, %c0_290, %c6_291, %c0_292, %c1_293] : memref<1x1x18x16x256xbf16, #tpu.memory_space<vmem>>, vector<1x1x1x16x128xbf16>
    %134 = vector.shape_cast %133 : vector<1x1x1x16x128xbf16> to vector<16x128xbf16>
    %c112_294 = arith.constant 112 : index
    %c512_295 = arith.constant 512 : index
    %135 = vector.load %arg6[%c112_294, %c512_295] : memref<144x1024xbf16, #tpu.memory_space<vmem>>, vector<16x128xbf16>
    tpu.vector_store %arg6[%c112_294, %c512_295], %134 {strides = array<i32>} : memref<144x1024xbf16, #tpu.memory_space<vmem>>, vector<16x128xbf16>,
    %c0_296 = arith.constant 0 : index
    %c0_297 = arith.constant 0 : index
    %c6_298 = arith.constant 6 : index
    %c0_299 = arith.constant 0 : index
    %c2_300 = arith.constant 2 : index
    %136 = vector.load %arg2[%c0_296, %c0_297, %c6_298, %c0_299, %c2_300] : memref<1x1x18x16x256xbf16, #tpu.memory_space<vmem>>, vector<1x1x1x16x128xbf16>
    %137 = vector.shape_cast %136 : vector<1x1x1x16x128xbf16> to vector<16x128xbf16>
    %c128_301 = arith.constant 128 : index
    %c512_302 = arith.constant 512 : index
    %138 = vector.load %arg6[%c128_301, %c512_302] : memref<144x1024xbf16, #tpu.memory_space<vmem>>, vector<16x128xbf16>
    tpu.vector_store %arg6[%c128_301, %c512_302], %137 {strides = array<i32>} : memref<144x1024xbf16, #tpu.memory_space<vmem>>, vector<16x128xbf16>,
    %c0_303 = arith.constant 0 : index
    %c0_304 = arith.constant 0 : index
    %c5_305 = arith.constant 5 : index
    %c0_306 = arith.constant 0 : index
    %c0_307 = arith.constant 0 : index
    %139 = vector.load %arg2[%c0_303, %c0_304, %c5_305, %c0_306, %c0_307] : memref<1x1x18x16x256xbf16, #tpu.memory_space<vmem>>, vector<1x1x1x16x128xbf16>
    %140 = vector.shape_cast %139 : vector<1x1x1x16x128xbf16> to vector<16x128xbf16>
    %c0_308 = arith.constant 0 : index
    %c640 = arith.constant 640 : index
    %141 = vector.load %arg6[%c0_308, %c640] : memref<144x1024xbf16, #tpu.memory_space<vmem>>, vector<16x128xbf16>
    tpu.vector_store %arg6[%c0_308, %c640], %140 {strides = array<i32>} : memref<144x1024xbf16, #tpu.memory_space<vmem>>, vector<16x128xbf16>,
    %c0_309 = arith.constant 0 : index
    %c0_310 = arith.constant 0 : index
    %c5_311 = arith.constant 5 : index
    %c0_312 = arith.constant 0 : index
    %c1_313 = arith.constant 1 : index
    %142 = vector.load %arg2[%c0_309, %c0_310, %c5_311, %c0_312, %c1_313] : memref<1x1x18x16x256xbf16, #tpu.memory_space<vmem>>, vector<1x1x1x16x128xbf16>
    %143 = vector.shape_cast %142 : vector<1x1x1x16x128xbf16> to vector<16x128xbf16>
    %c16_314 = arith.constant 16 : index
    %c640_315 = arith.constant 640 : index
    %144 = vector.load %arg6[%c16_314, %c640_315] : memref<144x1024xbf16, #tpu.memory_space<vmem>>, vector<16x128xbf16>
    tpu.vector_store %arg6[%c16_314, %c640_315], %143 {strides = array<i32>} : memref<144x1024xbf16, #tpu.memory_space<vmem>>, vector<16x128xbf16>,
    %c0_316 = arith.constant 0 : index
    %c0_317 = arith.constant 0 : index
    %c5_318 = arith.constant 5 : index
    %c0_319 = arith.constant 0 : index
    %c2_320 = arith.constant 2 : index
    %145 = vector.load %arg2[%c0_316, %c0_317, %c5_318, %c0_319, %c2_320] : memref<1x1x18x16x256xbf16, #tpu.memory_space<vmem>>, vector<1x1x1x16x128xbf16>
    %146 = vector.shape_cast %145 : vector<1x1x1x16x128xbf16> to vector<16x128xbf16>
    %c32_321 = arith.constant 32 : index
    %c640_322 = arith.constant 640 : index
    %147 = vector.load %arg6[%c32_321, %c640_322] : memref<144x1024xbf16, #tpu.memory_space<vmem>>, vector<16x128xbf16>
    tpu.vector_store %arg6[%c32_321, %c640_322], %146 {strides = array<i32>} : memref<144x1024xbf16, #tpu.memory_space<vmem>>, vector<16x128xbf16>,
    %c0_323 = arith.constant 0 : index
    %c0_324 = arith.constant 0 : index
    %c6_325 = arith.constant 6 : index
    %c0_326 = arith.constant 0 : index
    %c0_327 = arith.constant 0 : index
    %148 = vector.load %arg2[%c0_323, %c0_324, %c6_325, %c0_326, %c0_327] : memref<1x1x18x16x256xbf16, #tpu.memory_space<vmem>>, vector<1x1x1x16x128xbf16>
    %149 = vector.shape_cast %148 : vector<1x1x1x16x128xbf16> to vector<16x128xbf16>
    %c48_328 = arith.constant 48 : index
    %c640_329 = arith.constant 640 : index
    %150 = vector.load %arg6[%c48_328, %c640_329] : memref<144x1024xbf16, #tpu.memory_space<vmem>>, vector<16x128xbf16>
    tpu.vector_store %arg6[%c48_328, %c640_329], %149 {strides = array<i32>} : memref<144x1024xbf16, #tpu.memory_space<vmem>>, vector<16x128xbf16>,
    %c0_330 = arith.constant 0 : index
    %c0_331 = arith.constant 0 : index
    %c6_332 = arith.constant 6 : index
    %c0_333 = arith.constant 0 : index
    %c1_334 = arith.constant 1 : index
    %151 = vector.load %arg2[%c0_330, %c0_331, %c6_332, %c0_333, %c1_334] : memref<1x1x18x16x256xbf16, #tpu.memory_space<vmem>>, vector<1x1x1x16x128xbf16>
    %152 = vector.shape_cast %151 : vector<1x1x1x16x128xbf16> to vector<16x128xbf16>
    %c64_335 = arith.constant 64 : index
    %c640_336 = arith.constant 640 : index
    %153 = vector.load %arg6[%c64_335, %c640_336] : memref<144x1024xbf16, #tpu.memory_space<vmem>>, vector<16x128xbf16>
    tpu.vector_store %arg6[%c64_335, %c640_336], %152 {strides = array<i32>} : memref<144x1024xbf16, #tpu.memory_space<vmem>>, vector<16x128xbf16>,
    %c0_337 = arith.constant 0 : index
    %c0_338 = arith.constant 0 : index
    %c6_339 = arith.constant 6 : index
    %c0_340 = arith.constant 0 : index
    %c2_341 = arith.constant 2 : index
    %154 = vector.load %arg2[%c0_337, %c0_338, %c6_339, %c0_340, %c2_341] : memref<1x1x18x16x256xbf16, #tpu.memory_space<vmem>>, vector<1x1x1x16x128xbf16>
    %155 = vector.shape_cast %154 : vector<1x1x1x16x128xbf16> to vector<16x128xbf16>
    %c80_342 = arith.constant 80 : index
    %c640_343 = arith.constant 640 : index
    %156 = vector.load %arg6[%c80_342, %c640_343] : memref<144x1024xbf16, #tpu.memory_space<vmem>>, vector<16x128xbf16>
    tpu.vector_store %arg6[%c80_342, %c640_343], %155 {strides = array<i32>} : memref<144x1024xbf16, #tpu.memory_space<vmem>>, vector<16x128xbf16>,
    %c0_344 = arith.constant 0 : index
    %c0_345 = arith.constant 0 : index
    %c7 = arith.constant 7 : index
    %c0_346 = arith.constant 0 : index
    %c0_347 = arith.constant 0 : index
    %157 = vector.load %arg2[%c0_344, %c0_345, %c7, %c0_346, %c0_347] : memref<1x1x18x16x256xbf16, #tpu.memory_space<vmem>>, vector<1x1x1x16x128xbf16>
    %158 = vector.shape_cast %157 : vector<1x1x1x16x128xbf16> to vector<16x128xbf16>
    %c96_348 = arith.constant 96 : index
    %c640_349 = arith.constant 640 : index
    %159 = vector.load %arg6[%c96_348, %c640_349] : memref<144x1024xbf16, #tpu.memory_space<vmem>>, vector<16x128xbf16>
    tpu.vector_store %arg6[%c96_348, %c640_349], %158 {strides = array<i32>} : memref<144x1024xbf16, #tpu.memory_space<vmem>>, vector<16x128xbf16>,
    %c0_350 = arith.constant 0 : index
    %c0_351 = arith.constant 0 : index
    %c7_352 = arith.constant 7 : index
    %c0_353 = arith.constant 0 : index
    %c1_354 = arith.constant 1 : index
    %160 = vector.load %arg2[%c0_350, %c0_351, %c7_352, %c0_353, %c1_354] : memref<1x1x18x16x256xbf16, #tpu.memory_space<vmem>>, vector<1x1x1x16x128xbf16>
    %161 = vector.shape_cast %160 : vector<1x1x1x16x128xbf16> to vector<16x128xbf16>
    %c112_355 = arith.constant 112 : index
    %c640_356 = arith.constant 640 : index
    %162 = vector.load %arg6[%c112_355, %c640_356] : memref<144x1024xbf16, #tpu.memory_space<vmem>>, vector<16x128xbf16>
    tpu.vector_store %arg6[%c112_355, %c640_356], %161 {strides = array<i32>} : memref<144x1024xbf16, #tpu.memory_space<vmem>>, vector<16x128xbf16>,
    %c0_357 = arith.constant 0 : index
    %c0_358 = arith.constant 0 : index
    %c7_359 = arith.constant 7 : index
    %c0_360 = arith.constant 0 : index
    %c2_361 = arith.constant 2 : index
    %163 = vector.load %arg2[%c0_357, %c0_358, %c7_359, %c0_360, %c2_361] : memref<1x1x18x16x256xbf16, #tpu.memory_space<vmem>>, vector<1x1x1x16x128xbf16>
    %164 = vector.shape_cast %163 : vector<1x1x1x16x128xbf16> to vector<16x128xbf16>
    %c128_362 = arith.constant 128 : index
    %c640_363 = arith.constant 640 : index
    %165 = vector.load %arg6[%c128_362, %c640_363] : memref<144x1024xbf16, #tpu.memory_space<vmem>>, vector<16x128xbf16>
    tpu.vector_store %arg6[%c128_362, %c640_363], %164 {strides = array<i32>} : memref<144x1024xbf16, #tpu.memory_space<vmem>>, vector<16x128xbf16>,
    %c0_364 = arith.constant 0 : index
    %c0_365 = arith.constant 0 : index
    %c6_366 = arith.constant 6 : index
    %c0_367 = arith.constant 0 : index
    %c0_368 = arith.constant 0 : index
    %166 = vector.load %arg2[%c0_364, %c0_365, %c6_366, %c0_367, %c0_368] : memref<1x1x18x16x256xbf16, #tpu.memory_space<vmem>>, vector<1x1x1x16x128xbf16>
    %167 = vector.shape_cast %166 : vector<1x1x1x16x128xbf16> to vector<16x128xbf16>
    %c0_369 = arith.constant 0 : index
    %c768 = arith.constant 768 : index
    %168 = vector.load %arg6[%c0_369, %c768] : memref<144x1024xbf16, #tpu.memory_space<vmem>>, vector<16x128xbf16>
    tpu.vector_store %arg6[%c0_369, %c768], %167 {strides = array<i32>} : memref<144x1024xbf16, #tpu.memory_space<vmem>>, vector<16x128xbf16>,
    %c0_370 = arith.constant 0 : index
    %c0_371 = arith.constant 0 : index
    %c6_372 = arith.constant 6 : index
    %c0_373 = arith.constant 0 : index
    %c1_374 = arith.constant 1 : index
    %169 = vector.load %arg2[%c0_370, %c0_371, %c6_372, %c0_373, %c1_374] : memref<1x1x18x16x256xbf16, #tpu.memory_space<vmem>>, vector<1x1x1x16x128xbf16>
    %170 = vector.shape_cast %169 : vector<1x1x1x16x128xbf16> to vector<16x128xbf16>
    %c16_375 = arith.constant 16 : index
    %c768_376 = arith.constant 768 : index
    %171 = vector.load %arg6[%c16_375, %c768_376] : memref<144x1024xbf16, #tpu.memory_space<vmem>>, vector<16x128xbf16>
    tpu.vector_store %arg6[%c16_375, %c768_376], %170 {strides = array<i32>} : memref<144x1024xbf16, #tpu.memory_space<vmem>>, vector<16x128xbf16>,
    %c0_377 = arith.constant 0 : index
    %c0_378 = arith.constant 0 : index
    %c6_379 = arith.constant 6 : index
    %c0_380 = arith.constant 0 : index
    %c2_381 = arith.constant 2 : index
    %172 = vector.load %arg2[%c0_377, %c0_378, %c6_379, %c0_380, %c2_381] : memref<1x1x18x16x256xbf16, #tpu.memory_space<vmem>>, vector<1x1x1x16x128xbf16>
    %173 = vector.shape_cast %172 : vector<1x1x1x16x128xbf16> to vector<16x128xbf16>
    %c32_382 = arith.constant 32 : index
    %c768_383 = arith.constant 768 : index
    %174 = vector.load %arg6[%c32_382, %c768_383] : memref<144x1024xbf16, #tpu.memory_space<vmem>>, vector<16x128xbf16>
    tpu.vector_store %arg6[%c32_382, %c768_383], %173 {strides = array<i32>} : memref<144x1024xbf16, #tpu.memory_space<vmem>>, vector<16x128xbf16>,
    %c0_384 = arith.constant 0 : index
    %c0_385 = arith.constant 0 : index
    %c7_386 = arith.constant 7 : index
    %c0_387 = arith.constant 0 : index
    %c0_388 = arith.constant 0 : index
    %175 = vector.load %arg2[%c0_384, %c0_385, %c7_386, %c0_387, %c0_388] : memref<1x1x18x16x256xbf16, #tpu.memory_space<vmem>>, vector<1x1x1x16x128xbf16>
    %176 = vector.shape_cast %175 : vector<1x1x1x16x128xbf16> to vector<16x128xbf16>
    %c48_389 = arith.constant 48 : index
    %c768_390 = arith.constant 768 : index
    %177 = vector.load %arg6[%c48_389, %c768_390] : memref<144x1024xbf16, #tpu.memory_space<vmem>>, vector<16x128xbf16>
    tpu.vector_store %arg6[%c48_389, %c768_390], %176 {strides = array<i32>} : memref<144x1024xbf16, #tpu.memory_space<vmem>>, vector<16x128xbf16>,
    %c0_391 = arith.constant 0 : index
    %c0_392 = arith.constant 0 : index
    %c7_393 = arith.constant 7 : index
    %c0_394 = arith.constant 0 : index
    %c1_395 = arith.constant 1 : index
    %178 = vector.load %arg2[%c0_391, %c0_392, %c7_393, %c0_394, %c1_395] : memref<1x1x18x16x256xbf16, #tpu.memory_space<vmem>>, vector<1x1x1x16x128xbf16>
    %179 = vector.shape_cast %178 : vector<1x1x1x16x128xbf16> to vector<16x128xbf16>
    %c64_396 = arith.constant 64 : index
    %c768_397 = arith.constant 768 : index
    %180 = vector.load %arg6[%c64_396, %c768_397] : memref<144x1024xbf16, #tpu.memory_space<vmem>>, vector<16x128xbf16>
    tpu.vector_store %arg6[%c64_396, %c768_397], %179 {strides = array<i32>} : memref<144x1024xbf16, #tpu.memory_space<vmem>>, vector<16x128xbf16>,
    %c0_398 = arith.constant 0 : index
    %c0_399 = arith.constant 0 : index
    %c7_400 = arith.constant 7 : index
    %c0_401 = arith.constant 0 : index
    %c2_402 = arith.constant 2 : index
    %181 = vector.load %arg2[%c0_398, %c0_399, %c7_400, %c0_401, %c2_402] : memref<1x1x18x16x256xbf16, #tpu.memory_space<vmem>>, vector<1x1x1x16x128xbf16>
    %182 = vector.shape_cast %181 : vector<1x1x1x16x128xbf16> to vector<16x128xbf16>
    %c80_403 = arith.constant 80 : index
    %c768_404 = arith.constant 768 : index
    %183 = vector.load %arg6[%c80_403, %c768_404] : memref<144x1024xbf16, #tpu.memory_space<vmem>>, vector<16x128xbf16>
    tpu.vector_store %arg6[%c80_403, %c768_404], %182 {strides = array<i32>} : memref<144x1024xbf16, #tpu.memory_space<vmem>>, vector<16x128xbf16>,
    %c0_405 = arith.constant 0 : index
    %c0_406 = arith.constant 0 : index
    %c8 = arith.constant 8 : index
    %c0_407 = arith.constant 0 : index
    %c0_408 = arith.constant 0 : index
    %184 = vector.load %arg2[%c0_405, %c0_406, %c8, %c0_407, %c0_408] : memref<1x1x18x16x256xbf16, #tpu.memory_space<vmem>>, vector<1x1x1x16x128xbf16>
    %185 = vector.shape_cast %184 : vector<1x1x1x16x128xbf16> to vector<16x128xbf16>
    %c96_409 = arith.constant 96 : index
    %c768_410 = arith.constant 768 : index
    %186 = vector.load %arg6[%c96_409, %c768_410] : memref<144x1024xbf16, #tpu.memory_space<vmem>>, vector<16x128xbf16>
    tpu.vector_store %arg6[%c96_409, %c768_410], %185 {strides = array<i32>} : memref<144x1024xbf16, #tpu.memory_space<vmem>>, vector<16x128xbf16>,
    %c0_411 = arith.constant 0 : index
    %c0_412 = arith.constant 0 : index
    %c8_413 = arith.constant 8 : index
    %c0_414 = arith.constant 0 : index
    %c1_415 = arith.constant 1 : index
    %187 = vector.load %arg2[%c0_411, %c0_412, %c8_413, %c0_414, %c1_415] : memref<1x1x18x16x256xbf16, #tpu.memory_space<vmem>>, vector<1x1x1x16x128xbf16>
    %188 = vector.shape_cast %187 : vector<1x1x1x16x128xbf16> to vector<16x128xbf16>
    %c112_416 = arith.constant 112 : index
    %c768_417 = arith.constant 768 : index
    %189 = vector.load %arg6[%c112_416, %c768_417] : memref<144x1024xbf16, #tpu.memory_space<vmem>>, vector<16x128xbf16>
    tpu.vector_store %arg6[%c112_416, %c768_417], %188 {strides = array<i32>} : memref<144x1024xbf16, #tpu.memory_space<vmem>>, vector<16x128xbf16>,
    %c0_418 = arith.constant 0 : index
    %c0_419 = arith.constant 0 : index
    %c8_420 = arith.constant 8 : index
    %c0_421 = arith.constant 0 : index
    %c2_422 = arith.constant 2 : index
    %190 = vector.load %arg2[%c0_418, %c0_419, %c8_420, %c0_421, %c2_422] : memref<1x1x18x16x256xbf16, #tpu.memory_space<vmem>>, vector<1x1x1x16x128xbf16>
    %191 = vector.shape_cast %190 : vector<1x1x1x16x128xbf16> to vector<16x128xbf16>
    %c128_423 = arith.constant 128 : index
    %c768_424 = arith.constant 768 : index
    %192 = vector.load %arg6[%c128_423, %c768_424] : memref<144x1024xbf16, #tpu.memory_space<vmem>>, vector<16x128xbf16>
    tpu.vector_store %arg6[%c128_423, %c768_424], %191 {strides = array<i32>} : memref<144x1024xbf16, #tpu.memory_space<vmem>>, vector<16x128xbf16>,
    %c0_425 = arith.constant 0 : index
    %c0_426 = arith.constant 0 : index
    %c7_427 = arith.constant 7 : index
    %c0_428 = arith.constant 0 : index
    %c0_429 = arith.constant 0 : index
    %193 = vector.load %arg2[%c0_425, %c0_426, %c7_427, %c0_428, %c0_429] : memref<1x1x18x16x256xbf16, #tpu.memory_space<vmem>>, vector<1x1x1x16x128xbf16>
    %194 = vector.shape_cast %193 : vector<1x1x1x16x128xbf16> to vector<16x128xbf16>
    %c0_430 = arith.constant 0 : index
    %c896 = arith.constant 896 : index
    %195 = vector.load %arg6[%c0_430, %c896] : memref<144x1024xbf16, #tpu.memory_space<vmem>>, vector<16x128xbf16>
    tpu.vector_store %arg6[%c0_430, %c896], %194 {strides = array<i32>} : memref<144x1024xbf16, #tpu.memory_space<vmem>>, vector<16x128xbf16>,
    %c0_431 = arith.constant 0 : index
    %c0_432 = arith.constant 0 : index
    %c7_433 = arith.constant 7 : index
    %c0_434 = arith.constant 0 : index
    %c1_435 = arith.constant 1 : index
    %196 = vector.load %arg2[%c0_431, %c0_432, %c7_433, %c0_434, %c1_435] : memref<1x1x18x16x256xbf16, #tpu.memory_space<vmem>>, vector<1x1x1x16x128xbf16>
    %197 = vector.shape_cast %196 : vector<1x1x1x16x128xbf16> to vector<16x128xbf16>
    %c16_436 = arith.constant 16 : index
    %c896_437 = arith.constant 896 : index
    %198 = vector.load %arg6[%c16_436, %c896_437] : memref<144x1024xbf16, #tpu.memory_space<vmem>>, vector<16x128xbf16>
    tpu.vector_store %arg6[%c16_436, %c896_437], %197 {strides = array<i32>} : memref<144x1024xbf16, #tpu.memory_space<vmem>>, vector<16x128xbf16>,
    %c0_438 = arith.constant 0 : index
    %c0_439 = arith.constant 0 : index
    %c7_440 = arith.constant 7 : index
    %c0_441 = arith.constant 0 : index
    %c2_442 = arith.constant 2 : index
    %199 = vector.load %arg2[%c0_438, %c0_439, %c7_440, %c0_441, %c2_442] : memref<1x1x18x16x256xbf16, #tpu.memory_space<vmem>>, vector<1x1x1x16x128xbf16>
    %200 = vector.shape_cast %199 : vector<1x1x1x16x128xbf16> to vector<16x128xbf16>
    %c32_443 = arith.constant 32 : index
    %c896_444 = arith.constant 896 : index
    %201 = vector.load %arg6[%c32_443, %c896_444] : memref<144x1024xbf16, #tpu.memory_space<vmem>>, vector<16x128xbf16>
    tpu.vector_store %arg6[%c32_443, %c896_444], %200 {strides = array<i32>} : memref<144x1024xbf16, #tpu.memory_space<vmem>>, vector<16x128xbf16>,
    %c0_445 = arith.constant 0 : index
    %c0_446 = arith.constant 0 : index
    %c8_447 = arith.constant 8 : index
    %c0_448 = arith.constant 0 : index
    %c0_449 = arith.constant 0 : index
    %202 = vector.load %arg2[%c0_445, %c0_446, %c8_447, %c0_448, %c0_449] : memref<1x1x18x16x256xbf16, #tpu.memory_space<vmem>>, vector<1x1x1x16x128xbf16>
    %203 = vector.shape_cast %202 : vector<1x1x1x16x128xbf16> to vector<16x128xbf16>
    %c48_450 = arith.constant 48 : index
    %c896_451 = arith.constant 896 : index
    %204 = vector.load %arg6[%c48_450, %c896_451] : memref<144x1024xbf16, #tpu.memory_space<vmem>>, vector<16x128xbf16>
    tpu.vector_store %arg6[%c48_450, %c896_451], %203 {strides = array<i32>} : memref<144x1024xbf16, #tpu.memory_space<vmem>>, vector<16x128xbf16>,
    %c0_452 = arith.constant 0 : index
    %c0_453 = arith.constant 0 : index
    %c8_454 = arith.constant 8 : index
    %c0_455 = arith.constant 0 : index
    %c1_456 = arith.constant 1 : index
    %205 = vector.load %arg2[%c0_452, %c0_453, %c8_454, %c0_455, %c1_456] : memref<1x1x18x16x256xbf16, #tpu.memory_space<vmem>>, vector<1x1x1x16x128xbf16>
    %206 = vector.shape_cast %205 : vector<1x1x1x16x128xbf16> to vector<16x128xbf16>
    %c64_457 = arith.constant 64 : index
    %c896_458 = arith.constant 896 : index
    %207 = vector.load %arg6[%c64_457, %c896_458] : memref<144x1024xbf16, #tpu.memory_space<vmem>>, vector<16x128xbf16>
    tpu.vector_store %arg6[%c64_457, %c896_458], %206 {strides = array<i32>} : memref<144x1024xbf16, #tpu.memory_space<vmem>>, vector<16x128xbf16>,
    %c0_459 = arith.constant 0 : index
    %c0_460 = arith.constant 0 : index
    %c8_461 = arith.constant 8 : index
    %c0_462 = arith.constant 0 : index
    %c2_463 = arith.constant 2 : index
    %208 = vector.load %arg2[%c0_459, %c0_460, %c8_461, %c0_462, %c2_463] : memref<1x1x18x16x256xbf16, #tpu.memory_space<vmem>>, vector<1x1x1x16x128xbf16>
    %209 = vector.shape_cast %208 : vector<1x1x1x16x128xbf16> to vector<16x128xbf16>
    %c80_464 = arith.constant 80 : index
    %c896_465 = arith.constant 896 : index
    %210 = vector.load %arg6[%c80_464, %c896_465] : memref<144x1024xbf16, #tpu.memory_space<vmem>>, vector<16x128xbf16>
    tpu.vector_store %arg6[%c80_464, %c896_465], %209 {strides = array<i32>} : memref<144x1024xbf16, #tpu.memory_space<vmem>>, vector<16x128xbf16>,
    %c0_466 = arith.constant 0 : index
    %c0_467 = arith.constant 0 : index
    %c9 = arith.constant 9 : index
    %c0_468 = arith.constant 0 : index
    %c0_469 = arith.constant 0 : index
    %211 = vector.load %arg2[%c0_466, %c0_467, %c9, %c0_468, %c0_469] : memref<1x1x18x16x256xbf16, #tpu.memory_space<vmem>>, vector<1x1x1x16x128xbf16>
    %212 = vector.shape_cast %211 : vector<1x1x1x16x128xbf16> to vector<16x128xbf16>
    %c96_470 = arith.constant 96 : index
    %c896_471 = arith.constant 896 : index
    %213 = vector.load %arg6[%c96_470, %c896_471] : memref<144x1024xbf16, #tpu.memory_space<vmem>>, vector<16x128xbf16>
    tpu.vector_store %arg6[%c96_470, %c896_471], %212 {strides = array<i32>} : memref<144x1024xbf16, #tpu.memory_space<vmem>>, vector<16x128xbf16>,
    %c0_472 = arith.constant 0 : index
    %c0_473 = arith.constant 0 : index
    %c9_474 = arith.constant 9 : index
    %c0_475 = arith.constant 0 : index
    %c1_476 = arith.constant 1 : index
    %214 = vector.load %arg2[%c0_472, %c0_473, %c9_474, %c0_475, %c1_476] : memref<1x1x18x16x256xbf16, #tpu.memory_space<vmem>>, vector<1x1x1x16x128xbf16>
    %215 = vector.shape_cast %214 : vector<1x1x1x16x128xbf16> to vector<16x128xbf16>
    %c112_477 = arith.constant 112 : index
    %c896_478 = arith.constant 896 : index
    %216 = vector.load %arg6[%c112_477, %c896_478] : memref<144x1024xbf16, #tpu.memory_space<vmem>>, vector<16x128xbf16>
    tpu.vector_store %arg6[%c112_477, %c896_478], %215 {strides = array<i32>} : memref<144x1024xbf16, #tpu.memory_space<vmem>>, vector<16x128xbf16>,
    %c0_479 = arith.constant 0 : index
    %c0_480 = arith.constant 0 : index
    %c9_481 = arith.constant 9 : index
    %c0_482 = arith.constant 0 : index
    %c2_483 = arith.constant 2 : index
    %217 = vector.load %arg2[%c0_479, %c0_480, %c9_481, %c0_482, %c2_483] : memref<1x1x18x16x256xbf16, #tpu.memory_space<vmem>>, vector<1x1x1x16x128xbf16>
    %218 = vector.shape_cast %217 : vector<1x1x1x16x128xbf16> to vector<16x128xbf16>
    %c128_484 = arith.constant 128 : index
    %c896_485 = arith.constant 896 : index
    %219 = vector.load %arg6[%c128_484, %c896_485] : memref<144x1024xbf16, #tpu.memory_space<vmem>>, vector<16x128xbf16>
    tpu.vector_store %arg6[%c128_484, %c896_485], %218 {strides = array<i32>} : memref<144x1024xbf16, #tpu.memory_space<vmem>>, vector<16x128xbf16>,
    %c0_486 = arith.constant 0 : index
    %c0_487 = arith.constant 0 : index
    %220 = vector.load %arg6[%c0_486, %c0_487] : memref<144x1024xbf16, #tpu.memory_space<vmem>>, vector<144x1024xbf16>
    %cst = arith.constant dense<0.000000e+00> : vector<8x1024xf32>
    %221 = tpu.matmul %1, %220, %cst {dimension_numbers = #tpu.dot_dimension_numbers<[1], [0], [0], [1], [0, 0, 1, 1], [], []>} : vector<8x144xbf16>, vector<144x1024xbf16>, vector<8x1024xf32> -> vector<8x1024xf32>
    %222 = vector.broadcast %3 : vector<8x1xf32> to vector<8x1024xf32>
    %223 = arith.addf %221, %222 : vector<8x1024xf32>
    %c0_488 = arith.constant 0 : index
    %c0_489 = arith.constant 0 : index
    %c0_490 = arith.constant 0 : index
    %c0_491 = arith.constant 0 : index
    %224 = vector.load %arg5[%c0_488, %c0_489, %c0_490, %c0_491] : memref<1x1x8x2048xf32, #tpu.memory_space<vmem>>, vector<1x1x8x1024xf32>
    %225 = vector.shape_cast %224 : vector<1x1x8x1024xf32> to vector<8x1024xf32>
    %226 = vector.shape_cast %223 : vector<8x1024xf32> to vector<1x1x8x1024xf32>
    tpu.vector_store %arg5[%c0_488, %c0_489, %c0_490, %c0_491], %226 {strides = array<i32>} : memref<1x1x8x2048xf32, #tpu.memory_space<vmem>>, vector<1x1x8x1024xf32>,
    %c0_492 = arith.constant 0 : index
    %c0_493 = arith.constant 0 : index
    %c8_494 = arith.constant 8 : index
    %c0_495 = arith.constant 0 : index
    %c0_496 = arith.constant 0 : index
    %227 = vector.load %arg2[%c0_492, %c0_493, %c8_494, %c0_495, %c0_496] : memref<1x1x18x16x256xbf16, #tpu.memory_space<vmem>>, vector<1x1x1x16x128xbf16>
    %228 = vector.shape_cast %227 : vector<1x1x1x16x128xbf16> to vector<16x128xbf16>
    %c0_497 = arith.constant 0 : index
    %c0_498 = arith.constant 0 : index
    %229 = vector.load %arg6[%c0_497, %c0_498] : memref<144x1024xbf16, #tpu.memory_space<vmem>>, vector<16x128xbf16>
    tpu.vector_store %arg6[%c0_497, %c0_498], %228 {strides = array<i32>} : memref<144x1024xbf16, #tpu.memory_space<vmem>>, vector<16x128xbf16>,
    %c0_499 = arith.constant 0 : index
    %c0_500 = arith.constant 0 : index
    %c8_501 = arith.constant 8 : index
    %c0_502 = arith.constant 0 : index
    %c1_503 = arith.constant 1 : index
    %230 = vector.load %arg2[%c0_499, %c0_500, %c8_501, %c0_502, %c1_503] : memref<1x1x18x16x256xbf16, #tpu.memory_space<vmem>>, vector<1x1x1x16x128xbf16>
    %231 = vector.shape_cast %230 : vector<1x1x1x16x128xbf16> to vector<16x128xbf16>
    %c16_504 = arith.constant 16 : index
    %c0_505 = arith.constant 0 : index
    %232 = vector.load %arg6[%c16_504, %c0_505] : memref<144x1024xbf16, #tpu.memory_space<vmem>>, vector<16x128xbf16>
    tpu.vector_store %arg6[%c16_504, %c0_505], %231 {strides = array<i32>} : memref<144x1024xbf16, #tpu.memory_space<vmem>>, vector<16x128xbf16>,
    %c0_506 = arith.constant 0 : index
    %c0_507 = arith.constant 0 : index
    %c8_508 = arith.constant 8 : index
    %c0_509 = arith.constant 0 : index
    %c2_510 = arith.constant 2 : index
    %233 = vector.load %arg2[%c0_506, %c0_507, %c8_508, %c0_509, %c2_510] : memref<1x1x18x16x256xbf16, #tpu.memory_space<vmem>>, vector<1x1x1x16x128xbf16>
    %234 = vector.shape_cast %233 : vector<1x1x1x16x128xbf16> to vector<16x128xbf16>
    %c32_511 = arith.constant 32 : index
    %c0_512 = arith.constant 0 : index
    %235 = vector.load %arg6[%c32_511, %c0_512] : memref<144x1024xbf16, #tpu.memory_space<vmem>>, vector<16x128xbf16>
    tpu.vector_store %arg6[%c32_511, %c0_512], %234 {strides = array<i32>} : memref<144x1024xbf16, #tpu.memory_space<vmem>>, vector<16x128xbf16>,
    %c0_513 = arith.constant 0 : index
    %c0_514 = arith.constant 0 : index
    %c9_515 = arith.constant 9 : index
    %c0_516 = arith.constant 0 : index
    %c0_517 = arith.constant 0 : index
    %236 = vector.load %arg2[%c0_513, %c0_514, %c9_515, %c0_516, %c0_517] : memref<1x1x18x16x256xbf16, #tpu.memory_space<vmem>>, vector<1x1x1x16x128xbf16>
    %237 = vector.shape_cast %236 : vector<1x1x1x16x128xbf16> to vector<16x128xbf16>
    %c48_518 = arith.constant 48 : index
    %c0_519 = arith.constant 0 : index
    %238 = vector.load %arg6[%c48_518, %c0_519] : memref<144x1024xbf16, #tpu.memory_space<vmem>>, vector<16x128xbf16>
    tpu.vector_store %arg6[%c48_518, %c0_519], %237 {strides = array<i32>} : memref<144x1024xbf16, #tpu.memory_space<vmem>>, vector<16x128xbf16>,
    %c0_520 = arith.constant 0 : index
    %c0_521 = arith.constant 0 : index
    %c9_522 = arith.constant 9 : index
    %c0_523 = arith.constant 0 : index
    %c1_524 = arith.constant 1 : index
    %239 = vector.load %arg2[%c0_520, %c0_521, %c9_522, %c0_523, %c1_524] : memref<1x1x18x16x256xbf16, #tpu.memory_space<vmem>>, vector<1x1x1x16x128xbf16>
    %240 = vector.shape_cast %239 : vector<1x1x1x16x128xbf16> to vector<16x128xbf16>
    %c64_525 = arith.constant 64 : index
    %c0_526 = arith.constant 0 : index
    %241 = vector.load %arg6[%c64_525, %c0_526] : memref<144x1024xbf16, #tpu.memory_space<vmem>>, vector<16x128xbf16>
    tpu.vector_store %arg6[%c64_525, %c0_526], %240 {strides = array<i32>} : memref<144x1024xbf16, #tpu.memory_space<vmem>>, vector<16x128xbf16>,
    %c0_527 = arith.constant 0 : index
    %c0_528 = arith.constant 0 : index
    %c9_529 = arith.constant 9 : index
    %c0_530 = arith.constant 0 : index
    %c2_531 = arith.constant 2 : index
    %242 = vector.load %arg2[%c0_527, %c0_528, %c9_529, %c0_530, %c2_531] : memref<1x1x18x16x256xbf16, #tpu.memory_space<vmem>>, vector<1x1x1x16x128xbf16>
    %243 = vector.shape_cast %242 : vector<1x1x1x16x128xbf16> to vector<16x128xbf16>
    %c80_532 = arith.constant 80 : index
    %c0_533 = arith.constant 0 : index
    %244 = vector.load %arg6[%c80_532, %c0_533] : memref<144x1024xbf16, #tpu.memory_space<vmem>>, vector<16x128xbf16>
    tpu.vector_store %arg6[%c80_532, %c0_533], %243 {strides = array<i32>} : memref<144x1024xbf16, #tpu.memory_space<vmem>>, vector<16x128xbf16>,
    %c0_534 = arith.constant 0 : index
    %c0_535 = arith.constant 0 : index
    %c10 = arith.constant 10 : index
    %c0_536 = arith.constant 0 : index
    %c0_537 = arith.constant 0 : index
    %245 = vector.load %arg2[%c0_534, %c0_535, %c10, %c0_536, %c0_537] : memref<1x1x18x16x256xbf16, #tpu.memory_space<vmem>>, vector<1x1x1x16x128xbf16>
    %246 = vector.shape_cast %245 : vector<1x1x1x16x128xbf16> to vector<16x128xbf16>
    %c96_538 = arith.constant 96 : index
    %c0_539 = arith.constant 0 : index
    %247 = vector.load %arg6[%c96_538, %c0_539] : memref<144x1024xbf16, #tpu.memory_space<vmem>>, vector<16x128xbf16>
    tpu.vector_store %arg6[%c96_538, %c0_539], %246 {strides = array<i32>} : memref<144x1024xbf16, #tpu.memory_space<vmem>>, vector<16x128xbf16>,
    %c0_540 = arith.constant 0 : index
    %c0_541 = arith.constant 0 : index
    %c10_542 = arith.constant 10 : index
    %c0_543 = arith.constant 0 : index
    %c1_544 = arith.constant 1 : index
    %248 = vector.load %arg2[%c0_540, %c0_541, %c10_542, %c0_543, %c1_544] : memref<1x1x18x16x256xbf16, #tpu.memory_space<vmem>>, vector<1x1x1x16x128xbf16>
    %249 = vector.shape_cast %248 : vector<1x1x1x16x128xbf16> to vector<16x128xbf16>
    %c112_545 = arith.constant 112 : index
    %c0_546 = arith.constant 0 : index
    %250 = vector.load %arg6[%c112_545, %c0_546] : memref<144x1024xbf16, #tpu.memory_space<vmem>>, vector<16x128xbf16>
    tpu.vector_store %arg6[%c112_545, %c0_546], %249 {strides = array<i32>} : memref<144x1024xbf16, #tpu.memory_space<vmem>>, vector<16x128xbf16>,
    %c0_547 = arith.constant 0 : index
    %c0_548 = arith.constant 0 : index
    %c10_549 = arith.constant 10 : index
    %c0_550 = arith.constant 0 : index
    %c2_551 = arith.constant 2 : index
    %251 = vector.load %arg2[%c0_547, %c0_548, %c10_549, %c0_550, %c2_551] : memref<1x1x18x16x256xbf16, #tpu.memory_space<vmem>>, vector<1x1x1x16x128xbf16>
    %252 = vector.shape_cast %251 : vector<1x1x1x16x128xbf16> to vector<16x128xbf16>
    %c128_552 = arith.constant 128 : index
    %c0_553 = arith.constant 0 : index
    %253 = vector.load %arg6[%c128_552, %c0_553] : memref<144x1024xbf16, #tpu.memory_space<vmem>>, vector<16x128xbf16>
    tpu.vector_store %arg6[%c128_552, %c0_553], %252 {strides = array<i32>} : memref<144x1024xbf16, #tpu.memory_space<vmem>>, vector<16x128xbf16>,
    %c0_554 = arith.constant 0 : index
    %c0_555 = arith.constant 0 : index
    %c9_556 = arith.constant 9 : index
    %c0_557 = arith.constant 0 : index
    %c0_558 = arith.constant 0 : index
    %254 = vector.load %arg2[%c0_554, %c0_555, %c9_556, %c0_557, %c0_558] : memref<1x1x18x16x256xbf16, #tpu.memory_space<vmem>>, vector<1x1x1x16x128xbf16>
    %255 = vector.shape_cast %254 : vector<1x1x1x16x128xbf16> to vector<16x128xbf16>
    %c0_559 = arith.constant 0 : index
    %c128_560 = arith.constant 128 : index
    %256 = vector.load %arg6[%c0_559, %c128_560] : memref<144x1024xbf16, #tpu.memory_space<vmem>>, vector<16x128xbf16>
    tpu.vector_store %arg6[%c0_559, %c128_560], %255 {strides = array<i32>} : memref<144x1024xbf16, #tpu.memory_space<vmem>>, vector<16x128xbf16>,
    %c0_561 = arith.constant 0 : index
    %c0_562 = arith.constant 0 : index
    %c9_563 = arith.constant 9 : index
    %c0_564 = arith.constant 0 : index
    %c1_565 = arith.constant 1 : index
    %257 = vector.load %arg2[%c0_561, %c0_562, %c9_563, %c0_564, %c1_565] : memref<1x1x18x16x256xbf16, #tpu.memory_space<vmem>>, vector<1x1x1x16x128xbf16>
    %258 = vector.shape_cast %257 : vector<1x1x1x16x128xbf16> to vector<16x128xbf16>
    %c16_566 = arith.constant 16 : index
    %c128_567 = arith.constant 128 : index
    %259 = vector.load %arg6[%c16_566, %c128_567] : memref<144x1024xbf16, #tpu.memory_space<vmem>>, vector<16x128xbf16>
    tpu.vector_store %arg6[%c16_566, %c128_567], %258 {strides = array<i32>} : memref<144x1024xbf16, #tpu.memory_space<vmem>>, vector<16x128xbf16>,
    %c0_568 = arith.constant 0 : index
    %c0_569 = arith.constant 0 : index
    %c9_570 = arith.constant 9 : index
    %c0_571 = arith.constant 0 : index
    %c2_572 = arith.constant 2 : index
    %260 = vector.load %arg2[%c0_568, %c0_569, %c9_570, %c0_571, %c2_572] : memref<1x1x18x16x256xbf16, #tpu.memory_space<vmem>>, vector<1x1x1x16x128xbf16>
    %261 = vector.shape_cast %260 : vector<1x1x1x16x128xbf16> to vector<16x128xbf16>
    %c32_573 = arith.constant 32 : index
    %c128_574 = arith.constant 128 : index
    %262 = vector.load %arg6[%c32_573, %c128_574] : memref<144x1024xbf16, #tpu.memory_space<vmem>>, vector<16x128xbf16>
    tpu.vector_store %arg6[%c32_573, %c128_574], %261 {strides = array<i32>} : memref<144x1024xbf16, #tpu.memory_space<vmem>>, vector<16x128xbf16>,
    %c0_575 = arith.constant 0 : index
    %c0_576 = arith.constant 0 : index
    %c10_577 = arith.constant 10 : index
    %c0_578 = arith.constant 0 : index
    %c0_579 = arith.constant 0 : index
    %263 = vector.load %arg2[%c0_575, %c0_576, %c10_577, %c0_578, %c0_579] : memref<1x1x18x16x256xbf16, #tpu.memory_space<vmem>>, vector<1x1x1x16x128xbf16>
    %264 = vector.shape_cast %263 : vector<1x1x1x16x128xbf16> to vector<16x128xbf16>
    %c48_580 = arith.constant 48 : index
    %c128_581 = arith.constant 128 : index
    %265 = vector.load %arg6[%c48_580, %c128_581] : memref<144x1024xbf16, #tpu.memory_space<vmem>>, vector<16x128xbf16>
    tpu.vector_store %arg6[%c48_580, %c128_581], %264 {strides = array<i32>} : memref<144x1024xbf16, #tpu.memory_space<vmem>>, vector<16x128xbf16>,
    %c0_582 = arith.constant 0 : index
    %c0_583 = arith.constant 0 : index
    %c10_584 = arith.constant 10 : index
    %c0_585 = arith.constant 0 : index
    %c1_586 = arith.constant 1 : index
    %266 = vector.load %arg2[%c0_582, %c0_583, %c10_584, %c0_585, %c1_586] : memref<1x1x18x16x256xbf16, #tpu.memory_space<vmem>>, vector<1x1x1x16x128xbf16>
    %267 = vector.shape_cast %266 : vector<1x1x1x16x128xbf16> to vector<16x128xbf16>
    %c64_587 = arith.constant 64 : index
    %c128_588 = arith.constant 128 : index
    %268 = vector.load %arg6[%c64_587, %c128_588] : memref<144x1024xbf16, #tpu.memory_space<vmem>>, vector<16x128xbf16>
    tpu.vector_store %arg6[%c64_587, %c128_588], %267 {strides = array<i32>} : memref<144x1024xbf16, #tpu.memory_space<vmem>>, vector<16x128xbf16>,
    %c0_589 = arith.constant 0 : index
    %c0_590 = arith.constant 0 : index
    %c10_591 = arith.constant 10 : index
    %c0_592 = arith.constant 0 : index
    %c2_593 = arith.constant 2 : index
    %269 = vector.load %arg2[%c0_589, %c0_590, %c10_591, %c0_592, %c2_593] : memref<1x1x18x16x256xbf16, #tpu.memory_space<vmem>>, vector<1x1x1x16x128xbf16>
    %270 = vector.shape_cast %269 : vector<1x1x1x16x128xbf16> to vector<16x128xbf16>
    %c80_594 = arith.constant 80 : index
    %c128_595 = arith.constant 128 : index
    %271 = vector.load %arg6[%c80_594, %c128_595] : memref<144x1024xbf16, #tpu.memory_space<vmem>>, vector<16x128xbf16>
    tpu.vector_store %arg6[%c80_594, %c128_595], %270 {strides = array<i32>} : memref<144x1024xbf16, #tpu.memory_space<vmem>>, vector<16x128xbf16>,
    %c0_596 = arith.constant 0 : index
    %c0_597 = arith.constant 0 : index
    %c11 = arith.constant 11 : index
    %c0_598 = arith.constant 0 : index
    %c0_599 = arith.constant 0 : index
    %272 = vector.load %arg2[%c0_596, %c0_597, %c11, %c0_598, %c0_599] : memref<1x1x18x16x256xbf16, #tpu.memory_space<vmem>>, vector<1x1x1x16x128xbf16>
    %273 = vector.shape_cast %272 : vector<1x1x1x16x128xbf16> to vector<16x128xbf16>
    %c96_600 = arith.constant 96 : index
    %c128_601 = arith.constant 128 : index
    %274 = vector.load %arg6[%c96_600, %c128_601] : memref<144x1024xbf16, #tpu.memory_space<vmem>>, vector<16x128xbf16>
    tpu.vector_store %arg6[%c96_600, %c128_601], %273 {strides = array<i32>} : memref<144x1024xbf16, #tpu.memory_space<vmem>>, vector<16x128xbf16>,
    %c0_602 = arith.constant 0 : index
    %c0_603 = arith.constant 0 : index
    %c11_604 = arith.constant 11 : index
    %c0_605 = arith.constant 0 : index
    %c1_606 = arith.constant 1 : index
    %275 = vector.load %arg2[%c0_602, %c0_603, %c11_604, %c0_605, %c1_606] : memref<1x1x18x16x256xbf16, #tpu.memory_space<vmem>>, vector<1x1x1x16x128xbf16>
    %276 = vector.shape_cast %275 : vector<1x1x1x16x128xbf16> to vector<16x128xbf16>
    %c112_607 = arith.constant 112 : index
    %c128_608 = arith.constant 128 : index
    %277 = vector.load %arg6[%c112_607, %c128_608] : memref<144x1024xbf16, #tpu.memory_space<vmem>>, vector<16x128xbf16>
    tpu.vector_store %arg6[%c112_607, %c128_608], %276 {strides = array<i32>} : memref<144x1024xbf16, #tpu.memory_space<vmem>>, vector<16x128xbf16>,
    %c0_609 = arith.constant 0 : index
    %c0_610 = arith.constant 0 : index
    %c11_611 = arith.constant 11 : index
    %c0_612 = arith.constant 0 : index
    %c2_613 = arith.constant 2 : index
    %278 = vector.load %arg2[%c0_609, %c0_610, %c11_611, %c0_612, %c2_613] : memref<1x1x18x16x256xbf16, #tpu.memory_space<vmem>>, vector<1x1x1x16x128xbf16>
    %279 = vector.shape_cast %278 : vector<1x1x1x16x128xbf16> to vector<16x128xbf16>
    %c128_614 = arith.constant 128 : index
    %c128_615 = arith.constant 128 : index
    %280 = vector.load %arg6[%c128_614, %c128_615] : memref<144x1024xbf16, #tpu.memory_space<vmem>>, vector<16x128xbf16>
    tpu.vector_store %arg6[%c128_614, %c128_615], %279 {strides = array<i32>} : memref<144x1024xbf16, #tpu.memory_space<vmem>>, vector<16x128xbf16>,
    %c0_616 = arith.constant 0 : index
    %c0_617 = arith.constant 0 : index
    %c10_618 = arith.constant 10 : index
    %c0_619 = arith.constant 0 : index
    %c0_620 = arith.constant 0 : index
    %281 = vector.load %arg2[%c0_616, %c0_617, %c10_618, %c0_619, %c0_620] : memref<1x1x18x16x256xbf16, #tpu.memory_space<vmem>>, vector<1x1x1x16x128xbf16>
    %282 = vector.shape_cast %281 : vector<1x1x1x16x128xbf16> to vector<16x128xbf16>
    %c0_621 = arith.constant 0 : index
    %c256_622 = arith.constant 256 : index
    %283 = vector.load %arg6[%c0_621, %c256_622] : memref<144x1024xbf16, #tpu.memory_space<vmem>>, vector<16x128xbf16>
    tpu.vector_store %arg6[%c0_621, %c256_622], %282 {strides = array<i32>} : memref<144x1024xbf16, #tpu.memory_space<vmem>>, vector<16x128xbf16>,
    %c0_623 = arith.constant 0 : index
    %c0_624 = arith.constant 0 : index
    %c10_625 = arith.constant 10 : index
    %c0_626 = arith.constant 0 : index
    %c1_627 = arith.constant 1 : index
    %284 = vector.load %arg2[%c0_623, %c0_624, %c10_625, %c0_626, %c1_627] : memref<1x1x18x16x256xbf16, #tpu.memory_space<vmem>>, vector<1x1x1x16x128xbf16>
    %285 = vector.shape_cast %284 : vector<1x1x1x16x128xbf16> to vector<16x128xbf16>
    %c16_628 = arith.constant 16 : index
    %c256_629 = arith.constant 256 : index
    %286 = vector.load %arg6[%c16_628, %c256_629] : memref<144x1024xbf16, #tpu.memory_space<vmem>>, vector<16x128xbf16>
    tpu.vector_store %arg6[%c16_628, %c256_629], %285 {strides = array<i32>} : memref<144x1024xbf16, #tpu.memory_space<vmem>>, vector<16x128xbf16>,
    %c0_630 = arith.constant 0 : index
    %c0_631 = arith.constant 0 : index
    %c10_632 = arith.constant 10 : index
    %c0_633 = arith.constant 0 : index
    %c2_634 = arith.constant 2 : index
    %287 = vector.load %arg2[%c0_630, %c0_631, %c10_632, %c0_633, %c2_634] : memref<1x1x18x16x256xbf16, #tpu.memory_space<vmem>>, vector<1x1x1x16x128xbf16>
    %288 = vector.shape_cast %287 : vector<1x1x1x16x128xbf16> to vector<16x128xbf16>
    %c32_635 = arith.constant 32 : index
    %c256_636 = arith.constant 256 : index
    %289 = vector.load %arg6[%c32_635, %c256_636] : memref<144x1024xbf16, #tpu.memory_space<vmem>>, vector<16x128xbf16>
    tpu.vector_store %arg6[%c32_635, %c256_636], %288 {strides = array<i32>} : memref<144x1024xbf16, #tpu.memory_space<vmem>>, vector<16x128xbf16>,
    %c0_637 = arith.constant 0 : index
    %c0_638 = arith.constant 0 : index
    %c11_639 = arith.constant 11 : index
    %c0_640 = arith.constant 0 : index
    %c0_641 = arith.constant 0 : index
    %290 = vector.load %arg2[%c0_637, %c0_638, %c11_639, %c0_640, %c0_641] : memref<1x1x18x16x256xbf16, #tpu.memory_space<vmem>>, vector<1x1x1x16x128xbf16>
    %291 = vector.shape_cast %290 : vector<1x1x1x16x128xbf16> to vector<16x128xbf16>
    %c48_642 = arith.constant 48 : index
    %c256_643 = arith.constant 256 : index
    %292 = vector.load %arg6[%c48_642, %c256_643] : memref<144x1024xbf16, #tpu.memory_space<vmem>>, vector<16x128xbf16>
    tpu.vector_store %arg6[%c48_642, %c256_643], %291 {strides = array<i32>} : memref<144x1024xbf16, #tpu.memory_space<vmem>>, vector<16x128xbf16>,
    %c0_644 = arith.constant 0 : index
    %c0_645 = arith.constant 0 : index
    %c11_646 = arith.constant 11 : index
    %c0_647 = arith.constant 0 : index
    %c1_648 = arith.constant 1 : index
    %293 = vector.load %arg2[%c0_644, %c0_645, %c11_646, %c0_647, %c1_648] : memref<1x1x18x16x256xbf16, #tpu.memory_space<vmem>>, vector<1x1x1x16x128xbf16>
    %294 = vector.shape_cast %293 : vector<1x1x1x16x128xbf16> to vector<16x128xbf16>
    %c64_649 = arith.constant 64 : index
    %c256_650 = arith.constant 256 : index
    %295 = vector.load %arg6[%c64_649, %c256_650] : memref<144x1024xbf16, #tpu.memory_space<vmem>>, vector<16x128xbf16>
    tpu.vector_store %arg6[%c64_649, %c256_650], %294 {strides = array<i32>} : memref<144x1024xbf16, #tpu.memory_space<vmem>>, vector<16x128xbf16>,
    %c0_651 = arith.constant 0 : index
    %c0_652 = arith.constant 0 : index
    %c11_653 = arith.constant 11 : index
    %c0_654 = arith.constant 0 : index
    %c2_655 = arith.constant 2 : index
    %296 = vector.load %arg2[%c0_651, %c0_652, %c11_653, %c0_654, %c2_655] : memref<1x1x18x16x256xbf16, #tpu.memory_space<vmem>>, vector<1x1x1x16x128xbf16>
    %297 = vector.shape_cast %296 : vector<1x1x1x16x128xbf16> to vector<16x128xbf16>
    %c80_656 = arith.constant 80 : index
    %c256_657 = arith.constant 256 : index
    %298 = vector.load %arg6[%c80_656, %c256_657] : memref<144x1024xbf16, #tpu.memory_space<vmem>>, vector<16x128xbf16>
    tpu.vector_store %arg6[%c80_656, %c256_657], %297 {strides = array<i32>} : memref<144x1024xbf16, #tpu.memory_space<vmem>>, vector<16x128xbf16>,
    %c0_658 = arith.constant 0 : index
    %c0_659 = arith.constant 0 : index
    %c12 = arith.constant 12 : index
    %c0_660 = arith.constant 0 : index
    %c0_661 = arith.constant 0 : index
    %299 = vector.load %arg2[%c0_658, %c0_659, %c12, %c0_660, %c0_661] : memref<1x1x18x16x256xbf16, #tpu.memory_space<vmem>>, vector<1x1x1x16x128xbf16>
    %300 = vector.shape_cast %299 : vector<1x1x1x16x128xbf16> to vector<16x128xbf16>
    %c96_662 = arith.constant 96 : index
    %c256_663 = arith.constant 256 : index
    %301 = vector.load %arg6[%c96_662, %c256_663] : memref<144x1024xbf16, #tpu.memory_space<vmem>>, vector<16x128xbf16>
    tpu.vector_store %arg6[%c96_662, %c256_663], %300 {strides = array<i32>} : memref<144x1024xbf16, #tpu.memory_space<vmem>>, vector<16x128xbf16>,
    %c0_664 = arith.constant 0 : index
    %c0_665 = arith.constant 0 : index
    %c12_666 = arith.constant 12 : index
    %c0_667 = arith.constant 0 : index
    %c1_668 = arith.constant 1 : index
    %302 = vector.load %arg2[%c0_664, %c0_665, %c12_666, %c0_667, %c1_668] : memref<1x1x18x16x256xbf16, #tpu.memory_space<vmem>>, vector<1x1x1x16x128xbf16>
    %303 = vector.shape_cast %302 : vector<1x1x1x16x128xbf16> to vector<16x128xbf16>
    %c112_669 = arith.constant 112 : index
    %c256_670 = arith.constant 256 : index
    %304 = vector.load %arg6[%c112_669, %c256_670] : memref<144x1024xbf16, #tpu.memory_space<vmem>>, vector<16x128xbf16>
    tpu.vector_store %arg6[%c112_669, %c256_670], %303 {strides = array<i32>} : memref<144x1024xbf16, #tpu.memory_space<vmem>>, vector<16x128xbf16>,
    %c0_671 = arith.constant 0 : index
    %c0_672 = arith.constant 0 : index
    %c12_673 = arith.constant 12 : index
    %c0_674 = arith.constant 0 : index
    %c2_675 = arith.constant 2 : index
    %305 = vector.load %arg2[%c0_671, %c0_672, %c12_673, %c0_674, %c2_675] : memref<1x1x18x16x256xbf16, #tpu.memory_space<vmem>>, vector<1x1x1x16x128xbf16>
    %306 = vector.shape_cast %305 : vector<1x1x1x16x128xbf16> to vector<16x128xbf16>
    %c128_676 = arith.constant 128 : index
    %c256_677 = arith.constant 256 : index
    %307 = vector.load %arg6[%c128_676, %c256_677] : memref<144x1024xbf16, #tpu.memory_space<vmem>>, vector<16x128xbf16>
    tpu.vector_store %arg6[%c128_676, %c256_677], %306 {strides = array<i32>} : memref<144x1024xbf16, #tpu.memory_space<vmem>>, vector<16x128xbf16>,
    %c0_678 = arith.constant 0 : index
    %c0_679 = arith.constant 0 : index
    %c11_680 = arith.constant 11 : index
    %c0_681 = arith.constant 0 : index
    %c0_682 = arith.constant 0 : index
    %308 = vector.load %arg2[%c0_678, %c0_679, %c11_680, %c0_681, %c0_682] : memref<1x1x18x16x256xbf16, #tpu.memory_space<vmem>>, vector<1x1x1x16x128xbf16>
    %309 = vector.shape_cast %308 : vector<1x1x1x16x128xbf16> to vector<16x128xbf16>
    %c0_683 = arith.constant 0 : index
    %c384_684 = arith.constant 384 : index
    %310 = vector.load %arg6[%c0_683, %c384_684] : memref<144x1024xbf16, #tpu.memory_space<vmem>>, vector<16x128xbf16>
    tpu.vector_store %arg6[%c0_683, %c384_684], %309 {strides = array<i32>} : memref<144x1024xbf16, #tpu.memory_space<vmem>>, vector<16x128xbf16>,
    %c0_685 = arith.constant 0 : index
    %c0_686 = arith.constant 0 : index
    %c11_687 = arith.constant 11 : index
    %c0_688 = arith.constant 0 : index
    %c1_689 = arith.constant 1 : index
    %311 = vector.load %arg2[%c0_685, %c0_686, %c11_687, %c0_688, %c1_689] : memref<1x1x18x16x256xbf16, #tpu.memory_space<vmem>>, vector<1x1x1x16x128xbf16>
    %312 = vector.shape_cast %311 : vector<1x1x1x16x128xbf16> to vector<16x128xbf16>
    %c16_690 = arith.constant 16 : index
    %c384_691 = arith.constant 384 : index
    %313 = vector.load %arg6[%c16_690, %c384_691] : memref<144x1024xbf16, #tpu.memory_space<vmem>>, vector<16x128xbf16>
    tpu.vector_store %arg6[%c16_690, %c384_691], %312 {strides = array<i32>} : memref<144x1024xbf16, #tpu.memory_space<vmem>>, vector<16x128xbf16>,
    %c0_692 = arith.constant 0 : index
    %c0_693 = arith.constant 0 : index
    %c11_694 = arith.constant 11 : index
    %c0_695 = arith.constant 0 : index
    %c2_696 = arith.constant 2 : index
    %314 = vector.load %arg2[%c0_692, %c0_693, %c11_694, %c0_695, %c2_696] : memref<1x1x18x16x256xbf16, #tpu.memory_space<vmem>>, vector<1x1x1x16x128xbf16>
    %315 = vector.shape_cast %314 : vector<1x1x1x16x128xbf16> to vector<16x128xbf16>
    %c32_697 = arith.constant 32 : index
    %c384_698 = arith.constant 384 : index
    %316 = vector.load %arg6[%c32_697, %c384_698] : memref<144x1024xbf16, #tpu.memory_space<vmem>>, vector<16x128xbf16>
    tpu.vector_store %arg6[%c32_697, %c384_698], %315 {strides = array<i32>} : memref<144x1024xbf16, #tpu.memory_space<vmem>>, vector<16x128xbf16>,
    %c0_699 = arith.constant 0 : index
    %c0_700 = arith.constant 0 : index
    %c12_701 = arith.constant 12 : index
    %c0_702 = arith.constant 0 : index
    %c0_703 = arith.constant 0 : index
    %317 = vector.load %arg2[%c0_699, %c0_700, %c12_701, %c0_702, %c0_703] : memref<1x1x18x16x256xbf16, #tpu.memory_space<vmem>>, vector<1x1x1x16x128xbf16>
    %318 = vector.shape_cast %317 : vector<1x1x1x16x128xbf16> to vector<16x128xbf16>
    %c48_704 = arith.constant 48 : index
    %c384_705 = arith.constant 384 : index
    %319 = vector.load %arg6[%c48_704, %c384_705] : memref<144x1024xbf16, #tpu.memory_space<vmem>>, vector<16x128xbf16>
    tpu.vector_store %arg6[%c48_704, %c384_705], %318 {strides = array<i32>} : memref<144x1024xbf16, #tpu.memory_space<vmem>>, vector<16x128xbf16>,
    %c0_706 = arith.constant 0 : index
    %c0_707 = arith.constant 0 : index
    %c12_708 = arith.constant 12 : index
    %c0_709 = arith.constant 0 : index
    %c1_710 = arith.constant 1 : index
    %320 = vector.load %arg2[%c0_706, %c0_707, %c12_708, %c0_709, %c1_710] : memref<1x1x18x16x256xbf16, #tpu.memory_space<vmem>>, vector<1x1x1x16x128xbf16>
    %321 = vector.shape_cast %320 : vector<1x1x1x16x128xbf16> to vector<16x128xbf16>
    %c64_711 = arith.constant 64 : index
    %c384_712 = arith.constant 384 : index
    %322 = vector.load %arg6[%c64_711, %c384_712] : memref<144x1024xbf16, #tpu.memory_space<vmem>>, vector<16x128xbf16>
    tpu.vector_store %arg6[%c64_711, %c384_712], %321 {strides = array<i32>} : memref<144x1024xbf16, #tpu.memory_space<vmem>>, vector<16x128xbf16>,
    %c0_713 = arith.constant 0 : index
    %c0_714 = arith.constant 0 : index
    %c12_715 = arith.constant 12 : index
    %c0_716 = arith.constant 0 : index
    %c2_717 = arith.constant 2 : index
    %323 = vector.load %arg2[%c0_713, %c0_714, %c12_715, %c0_716, %c2_717] : memref<1x1x18x16x256xbf16, #tpu.memory_space<vmem>>, vector<1x1x1x16x128xbf16>
    %324 = vector.shape_cast %323 : vector<1x1x1x16x128xbf16> to vector<16x128xbf16>
    %c80_718 = arith.constant 80 : index
    %c384_719 = arith.constant 384 : index
    %325 = vector.load %arg6[%c80_718, %c384_719] : memref<144x1024xbf16, #tpu.memory_space<vmem>>, vector<16x128xbf16>
    tpu.vector_store %arg6[%c80_718, %c384_719], %324 {strides = array<i32>} : memref<144x1024xbf16, #tpu.memory_space<vmem>>, vector<16x128xbf16>,
    %c0_720 = arith.constant 0 : index
    %c0_721 = arith.constant 0 : index
    %c13 = arith.constant 13 : index
    %c0_722 = arith.constant 0 : index
    %c0_723 = arith.constant 0 : index
    %326 = vector.load %arg2[%c0_720, %c0_721, %c13, %c0_722, %c0_723] : memref<1x1x18x16x256xbf16, #tpu.memory_space<vmem>>, vector<1x1x1x16x128xbf16>
    %327 = vector.shape_cast %326 : vector<1x1x1x16x128xbf16> to vector<16x128xbf16>
    %c96_724 = arith.constant 96 : index
    %c384_725 = arith.constant 384 : index
    %328 = vector.load %arg6[%c96_724, %c384_725] : memref<144x1024xbf16, #tpu.memory_space<vmem>>, vector<16x128xbf16>
    tpu.vector_store %arg6[%c96_724, %c384_725], %327 {strides = array<i32>} : memref<144x1024xbf16, #tpu.memory_space<vmem>>, vector<16x128xbf16>,
    %c0_726 = arith.constant 0 : index
    %c0_727 = arith.constant 0 : index
    %c13_728 = arith.constant 13 : index
    %c0_729 = arith.constant 0 : index
    %c1_730 = arith.constant 1 : index
    %329 = vector.load %arg2[%c0_726, %c0_727, %c13_728, %c0_729, %c1_730] : memref<1x1x18x16x256xbf16, #tpu.memory_space<vmem>>, vector<1x1x1x16x128xbf16>
    %330 = vector.shape_cast %329 : vector<1x1x1x16x128xbf16> to vector<16x128xbf16>
    %c112_731 = arith.constant 112 : index
    %c384_732 = arith.constant 384 : index
    %331 = vector.load %arg6[%c112_731, %c384_732] : memref<144x1024xbf16, #tpu.memory_space<vmem>>, vector<16x128xbf16>
    tpu.vector_store %arg6[%c112_731, %c384_732], %330 {strides = array<i32>} : memref<144x1024xbf16, #tpu.memory_space<vmem>>, vector<16x128xbf16>,
    %c0_733 = arith.constant 0 : index
    %c0_734 = arith.constant 0 : index
    %c13_735 = arith.constant 13 : index
    %c0_736 = arith.constant 0 : index
    %c2_737 = arith.constant 2 : index
    %332 = vector.load %arg2[%c0_733, %c0_734, %c13_735, %c0_736, %c2_737] : memref<1x1x18x16x256xbf16, #tpu.memory_space<vmem>>, vector<1x1x1x16x128xbf16>
    %333 = vector.shape_cast %332 : vector<1x1x1x16x128xbf16> to vector<16x128xbf16>
    %c128_738 = arith.constant 128 : index
    %c384_739 = arith.constant 384 : index
    %334 = vector.load %arg6[%c128_738, %c384_739] : memref<144x1024xbf16, #tpu.memory_space<vmem>>, vector<16x128xbf16>
    tpu.vector_store %arg6[%c128_738, %c384_739], %333 {strides = array<i32>} : memref<144x1024xbf16, #tpu.memory_space<vmem>>, vector<16x128xbf16>,
    %c0_740 = arith.constant 0 : index
    %c0_741 = arith.constant 0 : index
    %c12_742 = arith.constant 12 : index
    %c0_743 = arith.constant 0 : index
    %c0_744 = arith.constant 0 : index
    %335 = vector.load %arg2[%c0_740, %c0_741, %c12_742, %c0_743, %c0_744] : memref<1x1x18x16x256xbf16, #tpu.memory_space<vmem>>, vector<1x1x1x16x128xbf16>
    %336 = vector.shape_cast %335 : vector<1x1x1x16x128xbf16> to vector<16x128xbf16>
    %c0_745 = arith.constant 0 : index
    %c512_746 = arith.constant 512 : index
    %337 = vector.load %arg6[%c0_745, %c512_746] : memref<144x1024xbf16, #tpu.memory_space<vmem>>, vector<16x128xbf16>
    tpu.vector_store %arg6[%c0_745, %c512_746], %336 {strides = array<i32>} : memref<144x1024xbf16, #tpu.memory_space<vmem>>, vector<16x128xbf16>,
    %c0_747 = arith.constant 0 : index
    %c0_748 = arith.constant 0 : index
    %c12_749 = arith.constant 12 : index
    %c0_750 = arith.constant 0 : index
    %c1_751 = arith.constant 1 : index
    %338 = vector.load %arg2[%c0_747, %c0_748, %c12_749, %c0_750, %c1_751] : memref<1x1x18x16x256xbf16, #tpu.memory_space<vmem>>, vector<1x1x1x16x128xbf16>
    %339 = vector.shape_cast %338 : vector<1x1x1x16x128xbf16> to vector<16x128xbf16>
    %c16_752 = arith.constant 16 : index
    %c512_753 = arith.constant 512 : index
    %340 = vector.load %arg6[%c16_752, %c512_753] : memref<144x1024xbf16, #tpu.memory_space<vmem>>, vector<16x128xbf16>
    tpu.vector_store %arg6[%c16_752, %c512_753], %339 {strides = array<i32>} : memref<144x1024xbf16, #tpu.memory_space<vmem>>, vector<16x128xbf16>,
    %c0_754 = arith.constant 0 : index
    %c0_755 = arith.constant 0 : index
    %c12_756 = arith.constant 12 : index
    %c0_757 = arith.constant 0 : index
    %c2_758 = arith.constant 2 : index
    %341 = vector.load %arg2[%c0_754, %c0_755, %c12_756, %c0_757, %c2_758] : memref<1x1x18x16x256xbf16, #tpu.memory_space<vmem>>, vector<1x1x1x16x128xbf16>
    %342 = vector.shape_cast %341 : vector<1x1x1x16x128xbf16> to vector<16x128xbf16>
    %c32_759 = arith.constant 32 : index
    %c512_760 = arith.constant 512 : index
    %343 = vector.load %arg6[%c32_759, %c512_760] : memref<144x1024xbf16, #tpu.memory_space<vmem>>, vector<16x128xbf16>
    tpu.vector_store %arg6[%c32_759, %c512_760], %342 {strides = array<i32>} : memref<144x1024xbf16, #tpu.memory_space<vmem>>, vector<16x128xbf16>,
    %c0_761 = arith.constant 0 : index
    %c0_762 = arith.constant 0 : index
    %c13_763 = arith.constant 13 : index
    %c0_764 = arith.constant 0 : index
    %c0_765 = arith.constant 0 : index
    %344 = vector.load %arg2[%c0_761, %c0_762, %c13_763, %c0_764, %c0_765] : memref<1x1x18x16x256xbf16, #tpu.memory_space<vmem>>, vector<1x1x1x16x128xbf16>
    %345 = vector.shape_cast %344 : vector<1x1x1x16x128xbf16> to vector<16x128xbf16>
    %c48_766 = arith.constant 48 : index
    %c512_767 = arith.constant 512 : index
    %346 = vector.load %arg6[%c48_766, %c512_767] : memref<144x1024xbf16, #tpu.memory_space<vmem>>, vector<16x128xbf16>
    tpu.vector_store %arg6[%c48_766, %c512_767], %345 {strides = array<i32>} : memref<144x1024xbf16, #tpu.memory_space<vmem>>, vector<16x128xbf16>,
    %c0_768 = arith.constant 0 : index
    %c0_769 = arith.constant 0 : index
    %c13_770 = arith.constant 13 : index
    %c0_771 = arith.constant 0 : index
    %c1_772 = arith.constant 1 : index
    %347 = vector.load %arg2[%c0_768, %c0_769, %c13_770, %c0_771, %c1_772] : memref<1x1x18x16x256xbf16, #tpu.memory_space<vmem>>, vector<1x1x1x16x128xbf16>
    %348 = vector.shape_cast %347 : vector<1x1x1x16x128xbf16> to vector<16x128xbf16>
    %c64_773 = arith.constant 64 : index
    %c512_774 = arith.constant 512 : index
    %349 = vector.load %arg6[%c64_773, %c512_774] : memref<144x1024xbf16, #tpu.memory_space<vmem>>, vector<16x128xbf16>
    tpu.vector_store %arg6[%c64_773, %c512_774], %348 {strides = array<i32>} : memref<144x1024xbf16, #tpu.memory_space<vmem>>, vector<16x128xbf16>,
    %c0_775 = arith.constant 0 : index
    %c0_776 = arith.constant 0 : index
    %c13_777 = arith.constant 13 : index
    %c0_778 = arith.constant 0 : index
    %c2_779 = arith.constant 2 : index
    %350 = vector.load %arg2[%c0_775, %c0_776, %c13_777, %c0_778, %c2_779] : memref<1x1x18x16x256xbf16, #tpu.memory_space<vmem>>, vector<1x1x1x16x128xbf16>
    %351 = vector.shape_cast %350 : vector<1x1x1x16x128xbf16> to vector<16x128xbf16>
    %c80_780 = arith.constant 80 : index
    %c512_781 = arith.constant 512 : index
    %352 = vector.load %arg6[%c80_780, %c512_781] : memref<144x1024xbf16, #tpu.memory_space<vmem>>, vector<16x128xbf16>
    tpu.vector_store %arg6[%c80_780, %c512_781], %351 {strides = array<i32>} : memref<144x1024xbf16, #tpu.memory_space<vmem>>, vector<16x128xbf16>,
    %c0_782 = arith.constant 0 : index
    %c0_783 = arith.constant 0 : index
    %c14 = arith.constant 14 : index
    %c0_784 = arith.constant 0 : index
    %c0_785 = arith.constant 0 : index
    %353 = vector.load %arg2[%c0_782, %c0_783, %c14, %c0_784, %c0_785] : memref<1x1x18x16x256xbf16, #tpu.memory_space<vmem>>, vector<1x1x1x16x128xbf16>
    %354 = vector.shape_cast %353 : vector<1x1x1x16x128xbf16> to vector<16x128xbf16>
    %c96_786 = arith.constant 96 : index
    %c512_787 = arith.constant 512 : index
    %355 = vector.load %arg6[%c96_786, %c512_787] : memref<144x1024xbf16, #tpu.memory_space<vmem>>, vector<16x128xbf16>
    tpu.vector_store %arg6[%c96_786, %c512_787], %354 {strides = array<i32>} : memref<144x1024xbf16, #tpu.memory_space<vmem>>, vector<16x128xbf16>,
    %c0_788 = arith.constant 0 : index
    %c0_789 = arith.constant 0 : index
    %c14_790 = arith.constant 14 : index
    %c0_791 = arith.constant 0 : index
    %c1_792 = arith.constant 1 : index
    %356 = vector.load %arg2[%c0_788, %c0_789, %c14_790, %c0_791, %c1_792] : memref<1x1x18x16x256xbf16, #tpu.memory_space<vmem>>, vector<1x1x1x16x128xbf16>
    %357 = vector.shape_cast %356 : vector<1x1x1x16x128xbf16> to vector<16x128xbf16>
    %c112_793 = arith.constant 112 : index
    %c512_794 = arith.constant 512 : index
    %358 = vector.load %arg6[%c112_793, %c512_794] : memref<144x1024xbf16, #tpu.memory_space<vmem>>, vector<16x128xbf16>
    tpu.vector_store %arg6[%c112_793, %c512_794], %357 {strides = array<i32>} : memref<144x1024xbf16, #tpu.memory_space<vmem>>, vector<16x128xbf16>,
    %c0_795 = arith.constant 0 : index
    %c0_796 = arith.constant 0 : index
    %c14_797 = arith.constant 14 : index
    %c0_798 = arith.constant 0 : index
    %c2_799 = arith.constant 2 : index
    %359 = vector.load %arg2[%c0_795, %c0_796, %c14_797, %c0_798, %c2_799] : memref<1x1x18x16x256xbf16, #tpu.memory_space<vmem>>, vector<1x1x1x16x128xbf16>
    %360 = vector.shape_cast %359 : vector<1x1x1x16x128xbf16> to vector<16x128xbf16>
    %c128_800 = arith.constant 128 : index
    %c512_801 = arith.constant 512 : index
    %361 = vector.load %arg6[%c128_800, %c512_801] : memref<144x1024xbf16, #tpu.memory_space<vmem>>, vector<16x128xbf16>
    tpu.vector_store %arg6[%c128_800, %c512_801], %360 {strides = array<i32>} : memref<144x1024xbf16, #tpu.memory_space<vmem>>, vector<16x128xbf16>,
    %c0_802 = arith.constant 0 : index
    %c0_803 = arith.constant 0 : index
    %c13_804 = arith.constant 13 : index
    %c0_805 = arith.constant 0 : index
    %c0_806 = arith.constant 0 : index
    %362 = vector.load %arg2[%c0_802, %c0_803, %c13_804, %c0_805, %c0_806] : memref<1x1x18x16x256xbf16, #tpu.memory_space<vmem>>, vector<1x1x1x16x128xbf16>
    %363 = vector.shape_cast %362 : vector<1x1x1x16x128xbf16> to vector<16x128xbf16>
    %c0_807 = arith.constant 0 : index
    %c640_808 = arith.constant 640 : index
    %364 = vector.load %arg6[%c0_807, %c640_808] : memref<144x1024xbf16, #tpu.memory_space<vmem>>, vector<16x128xbf16>
    tpu.vector_store %arg6[%c0_807, %c640_808], %363 {strides = array<i32>} : memref<144x1024xbf16, #tpu.memory_space<vmem>>, vector<16x128xbf16>,
    %c0_809 = arith.constant 0 : index
    %c0_810 = arith.constant 0 : index
    %c13_811 = arith.constant 13 : index
    %c0_812 = arith.constant 0 : index
    %c1_813 = arith.constant 1 : index
    %365 = vector.load %arg2[%c0_809, %c0_810, %c13_811, %c0_812, %c1_813] : memref<1x1x18x16x256xbf16, #tpu.memory_space<vmem>>, vector<1x1x1x16x128xbf16>
    %366 = vector.shape_cast %365 : vector<1x1x1x16x128xbf16> to vector<16x128xbf16>
    %c16_814 = arith.constant 16 : index
    %c640_815 = arith.constant 640 : index
    %367 = vector.load %arg6[%c16_814, %c640_815] : memref<144x1024xbf16, #tpu.memory_space<vmem>>, vector<16x128xbf16>
    tpu.vector_store %arg6[%c16_814, %c640_815], %366 {strides = array<i32>} : memref<144x1024xbf16, #tpu.memory_space<vmem>>, vector<16x128xbf16>,
    %c0_816 = arith.constant 0 : index
    %c0_817 = arith.constant 0 : index
    %c13_818 = arith.constant 13 : index
    %c0_819 = arith.constant 0 : index
    %c2_820 = arith.constant 2 : index
    %368 = vector.load %arg2[%c0_816, %c0_817, %c13_818, %c0_819, %c2_820] : memref<1x1x18x16x256xbf16, #tpu.memory_space<vmem>>, vector<1x1x1x16x128xbf16>
    %369 = vector.shape_cast %368 : vector<1x1x1x16x128xbf16> to vector<16x128xbf16>
    %c32_821 = arith.constant 32 : index
    %c640_822 = arith.constant 640 : index
    %370 = vector.load %arg6[%c32_821, %c640_822] : memref<144x1024xbf16, #tpu.memory_space<vmem>>, vector<16x128xbf16>
    tpu.vector_store %arg6[%c32_821, %c640_822], %369 {strides = array<i32>} : memref<144x1024xbf16, #tpu.memory_space<vmem>>, vector<16x128xbf16>,
    %c0_823 = arith.constant 0 : index
    %c0_824 = arith.constant 0 : index
    %c14_825 = arith.constant 14 : index
    %c0_826 = arith.constant 0 : index
    %c0_827 = arith.constant 0 : index
    %371 = vector.load %arg2[%c0_823, %c0_824, %c14_825, %c0_826, %c0_827] : memref<1x1x18x16x256xbf16, #tpu.memory_space<vmem>>, vector<1x1x1x16x128xbf16>
    %372 = vector.shape_cast %371 : vector<1x1x1x16x128xbf16> to vector<16x128xbf16>
    %c48_828 = arith.constant 48 : index
    %c640_829 = arith.constant 640 : index
    %373 = vector.load %arg6[%c48_828, %c640_829] : memref<144x1024xbf16, #tpu.memory_space<vmem>>, vector<16x128xbf16>
    tpu.vector_store %arg6[%c48_828, %c640_829], %372 {strides = array<i32>} : memref<144x1024xbf16, #tpu.memory_space<vmem>>, vector<16x128xbf16>,
    %c0_830 = arith.constant 0 : index
    %c0_831 = arith.constant 0 : index
    %c14_832 = arith.constant 14 : index
    %c0_833 = arith.constant 0 : index
    %c1_834 = arith.constant 1 : index
    %374 = vector.load %arg2[%c0_830, %c0_831, %c14_832, %c0_833, %c1_834] : memref<1x1x18x16x256xbf16, #tpu.memory_space<vmem>>, vector<1x1x1x16x128xbf16>
    %375 = vector.shape_cast %374 : vector<1x1x1x16x128xbf16> to vector<16x128xbf16>
    %c64_835 = arith.constant 64 : index
    %c640_836 = arith.constant 640 : index
    %376 = vector.load %arg6[%c64_835, %c640_836] : memref<144x1024xbf16, #tpu.memory_space<vmem>>, vector<16x128xbf16>
    tpu.vector_store %arg6[%c64_835, %c640_836], %375 {strides = array<i32>} : memref<144x1024xbf16, #tpu.memory_space<vmem>>, vector<16x128xbf16>,
    %c0_837 = arith.constant 0 : index
    %c0_838 = arith.constant 0 : index
    %c14_839 = arith.constant 14 : index
    %c0_840 = arith.constant 0 : index
    %c2_841 = arith.constant 2 : index
    %377 = vector.load %arg2[%c0_837, %c0_838, %c14_839, %c0_840, %c2_841] : memref<1x1x18x16x256xbf16, #tpu.memory_space<vmem>>, vector<1x1x1x16x128xbf16>
    %378 = vector.shape_cast %377 : vector<1x1x1x16x128xbf16> to vector<16x128xbf16>
    %c80_842 = arith.constant 80 : index
    %c640_843 = arith.constant 640 : index
    %379 = vector.load %arg6[%c80_842, %c640_843] : memref<144x1024xbf16, #tpu.memory_space<vmem>>, vector<16x128xbf16>
    tpu.vector_store %arg6[%c80_842, %c640_843], %378 {strides = array<i32>} : memref<144x1024xbf16, #tpu.memory_space<vmem>>, vector<16x128xbf16>,
    %c0_844 = arith.constant 0 : index
    %c0_845 = arith.constant 0 : index
    %c15 = arith.constant 15 : index
    %c0_846 = arith.constant 0 : index
    %c0_847 = arith.constant 0 : index
    %380 = vector.load %arg2[%c0_844, %c0_845, %c15, %c0_846, %c0_847] : memref<1x1x18x16x256xbf16, #tpu.memory_space<vmem>>, vector<1x1x1x16x128xbf16>
    %381 = vector.shape_cast %380 : vector<1x1x1x16x128xbf16> to vector<16x128xbf16>
    %c96_848 = arith.constant 96 : index
    %c640_849 = arith.constant 640 : index
    %382 = vector.load %arg6[%c96_848, %c640_849] : memref<144x1024xbf16, #tpu.memory_space<vmem>>, vector<16x128xbf16>
    tpu.vector_store %arg6[%c96_848, %c640_849], %381 {strides = array<i32>} : memref<144x1024xbf16, #tpu.memory_space<vmem>>, vector<16x128xbf16>,
    %c0_850 = arith.constant 0 : index
    %c0_851 = arith.constant 0 : index
    %c15_852 = arith.constant 15 : index
    %c0_853 = arith.constant 0 : index
    %c1_854 = arith.constant 1 : index
    %383 = vector.load %arg2[%c0_850, %c0_851, %c15_852, %c0_853, %c1_854] : memref<1x1x18x16x256xbf16, #tpu.memory_space<vmem>>, vector<1x1x1x16x128xbf16>
    %384 = vector.shape_cast %383 : vector<1x1x1x16x128xbf16> to vector<16x128xbf16>
    %c112_855 = arith.constant 112 : index
    %c640_856 = arith.constant 640 : index
    %385 = vector.load %arg6[%c112_855, %c640_856] : memref<144x1024xbf16, #tpu.memory_space<vmem>>, vector<16x128xbf16>
    tpu.vector_store %arg6[%c112_855, %c640_856], %384 {strides = array<i32>} : memref<144x1024xbf16, #tpu.memory_space<vmem>>, vector<16x128xbf16>,
    %c0_857 = arith.constant 0 : index
    %c0_858 = arith.constant 0 : index
    %c15_859 = arith.constant 15 : index
    %c0_860 = arith.constant 0 : index
    %c2_861 = arith.constant 2 : index
    %386 = vector.load %arg2[%c0_857, %c0_858, %c15_859, %c0_860, %c2_861] : memref<1x1x18x16x256xbf16, #tpu.memory_space<vmem>>, vector<1x1x1x16x128xbf16>
    %387 = vector.shape_cast %386 : vector<1x1x1x16x128xbf16> to vector<16x128xbf16>
    %c128_862 = arith.constant 128 : index
    %c640_863 = arith.constant 640 : index
    %388 = vector.load %arg6[%c128_862, %c640_863] : memref<144x1024xbf16, #tpu.memory_space<vmem>>, vector<16x128xbf16>
    tpu.vector_store %arg6[%c128_862, %c640_863], %387 {strides = array<i32>} : memref<144x1024xbf16, #tpu.memory_space<vmem>>, vector<16x128xbf16>,
    %c0_864 = arith.constant 0 : index
    %c0_865 = arith.constant 0 : index
    %c14_866 = arith.constant 14 : index
    %c0_867 = arith.constant 0 : index
    %c0_868 = arith.constant 0 : index
    %389 = vector.load %arg2[%c0_864, %c0_865, %c14_866, %c0_867, %c0_868] : memref<1x1x18x16x256xbf16, #tpu.memory_space<vmem>>, vector<1x1x1x16x128xbf16>
    %390 = vector.shape_cast %389 : vector<1x1x1x16x128xbf16> to vector<16x128xbf16>
    %c0_869 = arith.constant 0 : index
    %c768_870 = arith.constant 768 : index
    %391 = vector.load %arg6[%c0_869, %c768_870] : memref<144x1024xbf16, #tpu.memory_space<vmem>>, vector<16x128xbf16>
    tpu.vector_store %arg6[%c0_869, %c768_870], %390 {strides = array<i32>} : memref<144x1024xbf16, #tpu.memory_space<vmem>>, vector<16x128xbf16>,
    %c0_871 = arith.constant 0 : index
    %c0_872 = arith.constant 0 : index
    %c14_873 = arith.constant 14 : index
    %c0_874 = arith.constant 0 : index
    %c1_875 = arith.constant 1 : index
    %392 = vector.load %arg2[%c0_871, %c0_872, %c14_873, %c0_874, %c1_875] : memref<1x1x18x16x256xbf16, #tpu.memory_space<vmem>>, vector<1x1x1x16x128xbf16>
    %393 = vector.shape_cast %392 : vector<1x1x1x16x128xbf16> to vector<16x128xbf16>
    %c16_876 = arith.constant 16 : index
    %c768_877 = arith.constant 768 : index
    %394 = vector.load %arg6[%c16_876, %c768_877] : memref<144x1024xbf16, #tpu.memory_space<vmem>>, vector<16x128xbf16>
    tpu.vector_store %arg6[%c16_876, %c768_877], %393 {strides = array<i32>} : memref<144x1024xbf16, #tpu.memory_space<vmem>>, vector<16x128xbf16>,
    %c0_878 = arith.constant 0 : index
    %c0_879 = arith.constant 0 : index
    %c14_880 = arith.constant 14 : index
    %c0_881 = arith.constant 0 : index
    %c2_882 = arith.constant 2 : index
    %395 = vector.load %arg2[%c0_878, %c0_879, %c14_880, %c0_881, %c2_882] : memref<1x1x18x16x256xbf16, #tpu.memory_space<vmem>>, vector<1x1x1x16x128xbf16>
    %396 = vector.shape_cast %395 : vector<1x1x1x16x128xbf16> to vector<16x128xbf16>
    %c32_883 = arith.constant 32 : index
    %c768_884 = arith.constant 768 : index
    %397 = vector.load %arg6[%c32_883, %c768_884] : memref<144x1024xbf16, #tpu.memory_space<vmem>>, vector<16x128xbf16>
    tpu.vector_store %arg6[%c32_883, %c768_884], %396 {strides = array<i32>} : memref<144x1024xbf16, #tpu.memory_space<vmem>>, vector<16x128xbf16>,
    %c0_885 = arith.constant 0 : index
    %c0_886 = arith.constant 0 : index
    %c15_887 = arith.constant 15 : index
    %c0_888 = arith.constant 0 : index
    %c0_889 = arith.constant 0 : index
    %398 = vector.load %arg2[%c0_885, %c0_886, %c15_887, %c0_888, %c0_889] : memref<1x1x18x16x256xbf16, #tpu.memory_space<vmem>>, vector<1x1x1x16x128xbf16>
    %399 = vector.shape_cast %398 : vector<1x1x1x16x128xbf16> to vector<16x128xbf16>
    %c48_890 = arith.constant 48 : index
    %c768_891 = arith.constant 768 : index
    %400 = vector.load %arg6[%c48_890, %c768_891] : memref<144x1024xbf16, #tpu.memory_space<vmem>>, vector<16x128xbf16>
    tpu.vector_store %arg6[%c48_890, %c768_891], %399 {strides = array<i32>} : memref<144x1024xbf16, #tpu.memory_space<vmem>>, vector<16x128xbf16>,
    %c0_892 = arith.constant 0 : index
    %c0_893 = arith.constant 0 : index
    %c15_894 = arith.constant 15 : index
    %c0_895 = arith.constant 0 : index
    %c1_896 = arith.constant 1 : index
    %401 = vector.load %arg2[%c0_892, %c0_893, %c15_894, %c0_895, %c1_896] : memref<1x1x18x16x256xbf16, #tpu.memory_space<vmem>>, vector<1x1x1x16x128xbf16>
    %402 = vector.shape_cast %401 : vector<1x1x1x16x128xbf16> to vector<16x128xbf16>
    %c64_897 = arith.constant 64 : index
    %c768_898 = arith.constant 768 : index
    %403 = vector.load %arg6[%c64_897, %c768_898] : memref<144x1024xbf16, #tpu.memory_space<vmem>>, vector<16x128xbf16>
    tpu.vector_store %arg6[%c64_897, %c768_898], %402 {strides = array<i32>} : memref<144x1024xbf16, #tpu.memory_space<vmem>>, vector<16x128xbf16>,
    %c0_899 = arith.constant 0 : index
    %c0_900 = arith.constant 0 : index
    %c15_901 = arith.constant 15 : index
    %c0_902 = arith.constant 0 : index
    %c2_903 = arith.constant 2 : index
    %404 = vector.load %arg2[%c0_899, %c0_900, %c15_901, %c0_902, %c2_903] : memref<1x1x18x16x256xbf16, #tpu.memory_space<vmem>>, vector<1x1x1x16x128xbf16>
    %405 = vector.shape_cast %404 : vector<1x1x1x16x128xbf16> to vector<16x128xbf16>
    %c80_904 = arith.constant 80 : index
    %c768_905 = arith.constant 768 : index
    %406 = vector.load %arg6[%c80_904, %c768_905] : memref<144x1024xbf16, #tpu.memory_space<vmem>>, vector<16x128xbf16>
    tpu.vector_store %arg6[%c80_904, %c768_905], %405 {strides = array<i32>} : memref<144x1024xbf16, #tpu.memory_space<vmem>>, vector<16x128xbf16>,
    %c0_906 = arith.constant 0 : index
    %c0_907 = arith.constant 0 : index
    %c16_908 = arith.constant 16 : index
    %c0_909 = arith.constant 0 : index
    %c0_910 = arith.constant 0 : index
    %407 = vector.load %arg2[%c0_906, %c0_907, %c16_908, %c0_909, %c0_910] : memref<1x1x18x16x256xbf16, #tpu.memory_space<vmem>>, vector<1x1x1x16x128xbf16>
    %408 = vector.shape_cast %407 : vector<1x1x1x16x128xbf16> to vector<16x128xbf16>
    %c96_911 = arith.constant 96 : index
    %c768_912 = arith.constant 768 : index
    %409 = vector.load %arg6[%c96_911, %c768_912] : memref<144x1024xbf16, #tpu.memory_space<vmem>>, vector<16x128xbf16>
    tpu.vector_store %arg6[%c96_911, %c768_912], %408 {strides = array<i32>} : memref<144x1024xbf16, #tpu.memory_space<vmem>>, vector<16x128xbf16>,
    %c0_913 = arith.constant 0 : index
    %c0_914 = arith.constant 0 : index
    %c16_915 = arith.constant 16 : index
    %c0_916 = arith.constant 0 : index
    %c1_917 = arith.constant 1 : index
    %410 = vector.load %arg2[%c0_913, %c0_914, %c16_915, %c0_916, %c1_917] : memref<1x1x18x16x256xbf16, #tpu.memory_space<vmem>>, vector<1x1x1x16x128xbf16>
    %411 = vector.shape_cast %410 : vector<1x1x1x16x128xbf16> to vector<16x128xbf16>
    %c112_918 = arith.constant 112 : index
    %c768_919 = arith.constant 768 : index
    %412 = vector.load %arg6[%c112_918, %c768_919] : memref<144x1024xbf16, #tpu.memory_space<vmem>>, vector<16x128xbf16>
    tpu.vector_store %arg6[%c112_918, %c768_919], %411 {strides = array<i32>} : memref<144x1024xbf16, #tpu.memory_space<vmem>>, vector<16x128xbf16>,
    %c0_920 = arith.constant 0 : index
    %c0_921 = arith.constant 0 : index
    %c16_922 = arith.constant 16 : index
    %c0_923 = arith.constant 0 : index
    %c2_924 = arith.constant 2 : index
    %413 = vector.load %arg2[%c0_920, %c0_921, %c16_922, %c0_923, %c2_924] : memref<1x1x18x16x256xbf16, #tpu.memory_space<vmem>>, vector<1x1x1x16x128xbf16>
    %414 = vector.shape_cast %413 : vector<1x1x1x16x128xbf16> to vector<16x128xbf16>
    %c128_925 = arith.constant 128 : index
    %c768_926 = arith.constant 768 : index
    %415 = vector.load %arg6[%c128_925, %c768_926] : memref<144x1024xbf16, #tpu.memory_space<vmem>>, vector<16x128xbf16>
    tpu.vector_store %arg6[%c128_925, %c768_926], %414 {strides = array<i32>} : memref<144x1024xbf16, #tpu.memory_space<vmem>>, vector<16x128xbf16>,
    %c0_927 = arith.constant 0 : index
    %c0_928 = arith.constant 0 : index
    %c15_929 = arith.constant 15 : index
    %c0_930 = arith.constant 0 : index
    %c0_931 = arith.constant 0 : index
    %416 = vector.load %arg2[%c0_927, %c0_928, %c15_929, %c0_930, %c0_931] : memref<1x1x18x16x256xbf16, #tpu.memory_space<vmem>>, vector<1x1x1x16x128xbf16>
    %417 = vector.shape_cast %416 : vector<1x1x1x16x128xbf16> to vector<16x128xbf16>
    %c0_932 = arith.constant 0 : index
    %c896_933 = arith.constant 896 : index
    %418 = vector.load %arg6[%c0_932, %c896_933] : memref<144x1024xbf16, #tpu.memory_space<vmem>>, vector<16x128xbf16>
    tpu.vector_store %arg6[%c0_932, %c896_933], %417 {strides = array<i32>} : memref<144x1024xbf16, #tpu.memory_space<vmem>>, vector<16x128xbf16>,
    %c0_934 = arith.constant 0 : index
    %c0_935 = arith.constant 0 : index
    %c15_936 = arith.constant 15 : index
    %c0_937 = arith.constant 0 : index
    %c1_938 = arith.constant 1 : index
    %419 = vector.load %arg2[%c0_934, %c0_935, %c15_936, %c0_937, %c1_938] : memref<1x1x18x16x256xbf16, #tpu.memory_space<vmem>>, vector<1x1x1x16x128xbf16>
    %420 = vector.shape_cast %419 : vector<1x1x1x16x128xbf16> to vector<16x128xbf16>
    %c16_939 = arith.constant 16 : index
    %c896_940 = arith.constant 896 : index
    %421 = vector.load %arg6[%c16_939, %c896_940] : memref<144x1024xbf16, #tpu.memory_space<vmem>>, vector<16x128xbf16>
    tpu.vector_store %arg6[%c16_939, %c896_940], %420 {strides = array<i32>} : memref<144x1024xbf16, #tpu.memory_space<vmem>>, vector<16x128xbf16>,
    %c0_941 = arith.constant 0 : index
    %c0_942 = arith.constant 0 : index
    %c15_943 = arith.constant 15 : index
    %c0_944 = arith.constant 0 : index
    %c2_945 = arith.constant 2 : index
    %422 = vector.load %arg2[%c0_941, %c0_942, %c15_943, %c0_944, %c2_945] : memref<1x1x18x16x256xbf16, #tpu.memory_space<vmem>>, vector<1x1x1x16x128xbf16>
    %423 = vector.shape_cast %422 : vector<1x1x1x16x128xbf16> to vector<16x128xbf16>
    %c32_946 = arith.constant 32 : index
    %c896_947 = arith.constant 896 : index
    %424 = vector.load %arg6[%c32_946, %c896_947] : memref<144x1024xbf16, #tpu.memory_space<vmem>>, vector<16x128xbf16>
    tpu.vector_store %arg6[%c32_946, %c896_947], %423 {strides = array<i32>} : memref<144x1024xbf16, #tpu.memory_space<vmem>>, vector<16x128xbf16>,
    %c0_948 = arith.constant 0 : index
    %c0_949 = arith.constant 0 : index
    %c16_950 = arith.constant 16 : index
    %c0_951 = arith.constant 0 : index
    %c0_952 = arith.constant 0 : index
    %425 = vector.load %arg2[%c0_948, %c0_949, %c16_950, %c0_951, %c0_952] : memref<1x1x18x16x256xbf16, #tpu.memory_space<vmem>>, vector<1x1x1x16x128xbf16>
    %426 = vector.shape_cast %425 : vector<1x1x1x16x128xbf16> to vector<16x128xbf16>
    %c48_953 = arith.constant 48 : index
    %c896_954 = arith.constant 896 : index
    %427 = vector.load %arg6[%c48_953, %c896_954] : memref<144x1024xbf16, #tpu.memory_space<vmem>>, vector<16x128xbf16>
    tpu.vector_store %arg6[%c48_953, %c896_954], %426 {strides = array<i32>} : memref<144x1024xbf16, #tpu.memory_space<vmem>>, vector<16x128xbf16>,
    %c0_955 = arith.constant 0 : index
    %c0_956 = arith.constant 0 : index
    %c16_957 = arith.constant 16 : index
    %c0_958 = arith.constant 0 : index
    %c1_959 = arith.constant 1 : index
    %428 = vector.load %arg2[%c0_955, %c0_956, %c16_957, %c0_958, %c1_959] : memref<1x1x18x16x256xbf16, #tpu.memory_space<vmem>>, vector<1x1x1x16x128xbf16>
    %429 = vector.shape_cast %428 : vector<1x1x1x16x128xbf16> to vector<16x128xbf16>
    %c64_960 = arith.constant 64 : index
    %c896_961 = arith.constant 896 : index
    %430 = vector.load %arg6[%c64_960, %c896_961] : memref<144x1024xbf16, #tpu.memory_space<vmem>>, vector<16x128xbf16>
    tpu.vector_store %arg6[%c64_960, %c896_961], %429 {strides = array<i32>} : memref<144x1024xbf16, #tpu.memory_space<vmem>>, vector<16x128xbf16>,
    %c0_962 = arith.constant 0 : index
    %c0_963 = arith.constant 0 : index
    %c16_964 = arith.constant 16 : index
    %c0_965 = arith.constant 0 : index
    %c2_966 = arith.constant 2 : index
    %431 = vector.load %arg2[%c0_962, %c0_963, %c16_964, %c0_965, %c2_966] : memref<1x1x18x16x256xbf16, #tpu.memory_space<vmem>>, vector<1x1x1x16x128xbf16>
    %432 = vector.shape_cast %431 : vector<1x1x1x16x128xbf16> to vector<16x128xbf16>
    %c80_967 = arith.constant 80 : index
    %c896_968 = arith.constant 896 : index
    %433 = vector.load %arg6[%c80_967, %c896_968] : memref<144x1024xbf16, #tpu.memory_space<vmem>>, vector<16x128xbf16>
    tpu.vector_store %arg6[%c80_967, %c896_968], %432 {strides = array<i32>} : memref<144x1024xbf16, #tpu.memory_space<vmem>>, vector<16x128xbf16>,
    %c0_969 = arith.constant 0 : index
    %c0_970 = arith.constant 0 : index
    %c17 = arith.constant 17 : index
    %c0_971 = arith.constant 0 : index
    %c0_972 = arith.constant 0 : index
    %434 = vector.load %arg2[%c0_969, %c0_970, %c17, %c0_971, %c0_972] : memref<1x1x18x16x256xbf16, #tpu.memory_space<vmem>>, vector<1x1x1x16x128xbf16>
    %435 = vector.shape_cast %434 : vector<1x1x1x16x128xbf16> to vector<16x128xbf16>
    %c96_973 = arith.constant 96 : index
    %c896_974 = arith.constant 896 : index
    %436 = vector.load %arg6[%c96_973, %c896_974] : memref<144x1024xbf16, #tpu.memory_space<vmem>>, vector<16x128xbf16>
    tpu.vector_store %arg6[%c96_973, %c896_974], %435 {strides = array<i32>} : memref<144x1024xbf16, #tpu.memory_space<vmem>>, vector<16x128xbf16>,
    %c0_975 = arith.constant 0 : index
    %c0_976 = arith.constant 0 : index
    %c17_977 = arith.constant 17 : index
    %c0_978 = arith.constant 0 : index
    %c1_979 = arith.constant 1 : index
    %437 = vector.load %arg2[%c0_975, %c0_976, %c17_977, %c0_978, %c1_979] : memref<1x1x18x16x256xbf16, #tpu.memory_space<vmem>>, vector<1x1x1x16x128xbf16>
    %438 = vector.shape_cast %437 : vector<1x1x1x16x128xbf16> to vector<16x128xbf16>
    %c112_980 = arith.constant 112 : index
    %c896_981 = arith.constant 896 : index
    %439 = vector.load %arg6[%c112_980, %c896_981] : memref<144x1024xbf16, #tpu.memory_space<vmem>>, vector<16x128xbf16>
    tpu.vector_store %arg6[%c112_980, %c896_981], %438 {strides = array<i32>} : memref<144x1024xbf16, #tpu.memory_space<vmem>>, vector<16x128xbf16>,
    %c0_982 = arith.constant 0 : index
    %c0_983 = arith.constant 0 : index
    %c17_984 = arith.constant 17 : index
    %c0_985 = arith.constant 0 : index
    %c2_986 = arith.constant 2 : index
    %440 = vector.load %arg2[%c0_982, %c0_983, %c17_984, %c0_985, %c2_986] : memref<1x1x18x16x256xbf16, #tpu.memory_space<vmem>>, vector<1x1x1x16x128xbf16>
    %441 = vector.shape_cast %440 : vector<1x1x1x16x128xbf16> to vector<16x128xbf16>
    %c128_987 = arith.constant 128 : index
    %c896_988 = arith.constant 896 : index
    %442 = vector.load %arg6[%c128_987, %c896_988] : memref<144x1024xbf16, #tpu.memory_space<vmem>>, vector<16x128xbf16>
    tpu.vector_store %arg6[%c128_987, %c896_988], %441 {strides = array<i32>} : memref<144x1024xbf16, #tpu.memory_space<vmem>>, vector<16x128xbf16>,
    %c0_989 = arith.constant 0 : index
    %c0_990 = arith.constant 0 : index
    %443 = vector.load %arg6[%c0_989, %c0_990] : memref<144x1024xbf16, #tpu.memory_space<vmem>>, vector<144x1024xbf16>
    %cst_991 = arith.constant dense<0.000000e+00> : vector<8x1024xf32>
    %444 = tpu.matmul %1, %443, %cst_991 {dimension_numbers = #tpu.dot_dimension_numbers<[1], [0], [0], [1], [0, 0, 1, 1], [], []>} : vector<8x144xbf16>, vector<144x1024xbf16>, vector<8x1024xf32> -> vector<8x1024xf32>
    %445 = vector.broadcast %3 : vector<8x1xf32> to vector<8x1024xf32>
    %446 = arith.addf %444, %445 : vector<8x1024xf32>
    %c0_992 = arith.constant 0 : index
    %c0_993 = arith.constant 0 : index
    %c0_994 = arith.constant 0 : index
    %c1024 = arith.constant 1024 : index
    %447 = vector.load %arg5[%c0_992, %c0_993, %c0_994, %c1024] : memref<1x1x8x2048xf32, #tpu.memory_space<vmem>>, vector<1x1x8x1024xf32>
    %448 = vector.shape_cast %447 : vector<1x1x8x1024xf32> to vector<8x1024xf32>
    %449 = vector.shape_cast %446 : vector<8x1024xf32> to vector<1x1x8x1024xf32>
    tpu.vector_store %arg5[%c0_992, %c0_993, %c0_994, %c1024], %449 {strides = array<i32>} : memref<1x1x8x2048xf32, #tpu.memory_space<vmem>>, vector<1x1x8x1024xf32>,
    return
  }
  func.func @transform_0(%arg0: i32, %arg1: i32) -> (i32, i32, i32, i32, i32) {
    %c0_i32 = arith.constant 0 : i32
    %c0_i32_0 = arith.constant 0 : i32
    %c0_i32_1 = arith.constant 0 : i32
    %c0_i32_2 = arith.constant 0 : i32
    return %arg1, %arg0, %c0_i32, %c0_i32_0, %c0_i32_1 : i32, i32, i32, i32, i32
  }
  func.func @transform_1(%arg0: i32, %arg1: i32) -> (i32, i32, i32) {
    %c0_i32 = arith.constant 0 : i32
    %c0_i32_0 = arith.constant 0 : i32
    %c0_i32_1 = arith.constant 0 : i32
    return %arg0, %c0_i32, %c0_i32_0 : i32, i32, i32
  }
  func.func @transform_2(%arg0: i32, %arg1: i32) -> (i32, i32, i32) {
    %c0_i32 = arith.constant 0 : i32
    %c0_i32_0 = arith.constant 0 : i32
    %c0_i32_1 = arith.constant 0 : i32
    return %arg0, %c0_i32, %c0_i32_0 : i32, i32, i32
  }
  func.func @transform_3(%arg0: i32, %arg1: i32) -> (i32, i32, i32, i32) {
    %c0_i32 = arith.constant 0 : i32
    %c0_i32_0 = arith.constant 0 : i32
    %c0_i32_1 = arith.constant 0 : i32
    return %arg0, %arg1, %c0_i32, %c0_i32_0 : i32, i32, i32, i32
  }
}

</mosaic_0001>

<bundles_post_ra>
// kernel: sparse_fused_conv_bn_forward.1
= control target key start
LH: loop header
LB: loop body
LE: loop exit
PB: predicated region body
PF: predicated region fallthrough
CT: control target
= control target key end

     0   :  { %s3867_s12 = smov 0   ;;  %s3869_s13 = smov 0   ;;  %s4932_s0 = inlined_call_operand.vmem [shape: bf16[2,1,18,16,256], index: 0, kind: input, shape index: {}]   ;;  %s4933_s1 = inlined_call_operand.vmem [shape: bf16[1,8,144], index: 1, kind: input, shape index: {}]   ;;  %s4934_s2 = inlined_call_operand.vmem [shape: f32[1,8,1], index: 2, kind: input, shape index: {}]   ;;  %s4935_s3 = inlined_call_operand.vmem [shape: f32[1,2,8,2048], index: 3, kind: output, shape index: {}]  }
   0x1   :  { %s3871_s14 = smov 0  }
   0x2 LB: > { %s22_s15 = sadd.s32 1, %s3838_s13  ;;  %p3346_p0 = scmp.ge.s32.totalorder %s3842_s14, 1  ;;  %s3842_s14 = sphi %s3871_s14, %s13_s14   ;;  %s3838_s13 = sphi %s3869_s13, %s4937_s13   ;;  %s3834_s12 = sphi %s3867_s12, %s4936_s12  }
   0x3   : > { %p23_p1 = scmp.ge.s32.totalorder %s22_s15, 2  ;;  %p176_p2 = scmp.lt.s32.totalorder %s3842_s14, 3 }
   0x5   : > { %s4939_s15 = smov (%p23_p1, %s22_s15), 0  ;;  %p177_p3 = pnand %p3346_p0, %p176_p2 }
   0x6   : > { %p217_p4 = scmp.lt.s32.totalorder (!%p177_p3), %s3834_s12, 1  ;;  %s3844_s20 = smov (!%p177_p3), 127  }
   0x7   : > { %180 = sbr.rel (%p177_p3) target bundleno = 729 (0x2d9), region = 32  ;;  %s3845_s21 = smov (!%p177_p3), 126  }
   0xc   : > { %s4941_s12 = smov (!%p217_p4, %s3834_s12), 1  ;;  %vm1565_vm0 = vcmask 130048   ;;  %vm261_vm1 = vcmask 1039360   ;;  %vm278_vm2 = vcmask 1031168  }
   0xd   : > { %s3789_s16 = smul.u32 288, %s4941_s12  ;;  %s3788_s26 = sshll.u32 %s4941_s12, 7 }
   0xe   : > { %s4900_s29 = scalar_lea.vmem %s4935_s3, %s3788_s26 }
   0xf   : > { %s3891_s19 = scalar_lea.vmem %s4932_s0, %s3789_s16 }
  0x10   : > { %v3894_v0 = vld [vmem:[%s3891_s19 + $0x30] sm:$0xff]  ;;  %v3897_v1 = vld [vmem:[%s3891_s19 + $0x20] sm:$0xff]  ;;  %v3904_v2 = vld [vmem:[%s3891_s19 + $0x38] sm:$0xff] }
  0x11   : > { %440 = vrot.lane.b32.xlu1 %v3894_v0, %s3844_s20  ;;  %331 = vrot.lane.b32.xlu0 %v3897_v1, %s3844_s20  ;;  %v3907_v3 = vld [vmem:[%s3891_s19 + $0x28] sm:$0xff]  ;;  %v3917_v5 = vld [vmem:[%s3891_s19 + $0x40] sm:$0xff] }
  0x12   : > { %v3914_v4 = vld [vmem:[%s3891_s19 + $0x48] sm:$0xff]  ;;  %v3356_v6 = vld [vmem:[%s3891_s19 + $0x20] sm:$0xf]  ;;  %v3374_v8 = vld [vmem:[%s3891_s19 + $0x30] sm:$0xf] }
  0x13   : > { %v3357_v7 = vld [vmem:[%s3891_s19 + $0x28] sm:$0xf]  ;;  %325 = vst [vmem:[#allocation2 + $0x180] sm:$0xf] %v3356_v6  ;;  %v3375_v9 = vld [vmem:[%s3891_s19 + $0x38] sm:$0xf] }
  0x14   : > { %326 = vst [vmem:[#allocation2 + $0x1a0] sm:$0xf] %v3357_v7  ;;  %434 = vst [vmem:[#allocation2 + $0x184] sm:$0xf] %v3374_v8  ;;  %v3928_v10 = vld [vmem:[%s3891_s19 + $0x58] sm:$0xff]  ;;  %v3931_v11 = vld [vmem:[%s3891_s19 + $0x50] sm:$0xff] }
  0x15   : > { %442 = vrot.lane.b32.xlu1 %v3904_v2, %s3844_s20  ;;  %333 = vrot.lane.b32.xlu0 %v3907_v3, %s3844_s20  ;;  %435 = vst [vmem:[#allocation2 + $0x1a4] sm:$0xf] %v3375_v9  ;;  %v3938_v12 = vld [vmem:[%s3891_s19 + $0x18] sm:$0xff]  ;;  %v3941_v13 = vld [vmem:[%s3891_s19 + $0x10] sm:$0xff] }
  0x16   : > { %v3392_v14 = vld [vmem:[%s3891_s19 + $0x40] sm:$0xf]  ;;  %v3393_v15 = vld [vmem:[%s3891_s19 + $0x48] sm:$0xf]  ;;  %v3410_v16 = vld [vmem:[%s3891_s19 + $0x50] sm:$0xf] }
  0x17   : > { %543 = vst [vmem:[#allocation2 + $0x188] sm:$0xf] %v3392_v14  ;;  %544 = vst [vmem:[#allocation2 + $0x1a8] sm:$0xf] %v3393_v15  ;;  %v3411_v19 = vld [vmem:[%s3891_s19 + $0x58] sm:$0xf] }
  0x18   : > { %652 = vst [vmem:[#allocation2 + $0x18c] sm:$0xf] %v3410_v16  ;;  %653 = vst [vmem:[#allocation2 + $0x1ac] sm:$0xf] %v3411_v19  ;;  %v3578_v22 = vld [vmem:[%s3891_s19 + $0xa0] sm:$0xf] }
  0x19   : > { %551 = vrot.lane.b32.xlu1 %v3914_v4, %s3844_s20  ;;  %549 = vrot.lane.b32.xlu0 %v3917_v5, %s3844_s20  ;;  %v3579_v23 = vld [vmem:[%s3891_s19 + $0xa8] sm:$0xf]  ;;  %v3596_v24 = vld [vmem:[%s3891_s19 + $0xb0] sm:$0xf] }
  0x1a   : > { %v3597_v25 = vld [vmem:[%s3891_s19 + $0xb8] sm:$0xf]  ;;  %v3614_v30 = vld [vmem:[%s3891_s19 + $0xc0] sm:$0xf]  ;;  %v3615_v31 = vld [vmem:[%s3891_s19 + $0xc8] sm:$0xf] }
  0x1b   : > { %v3946_v17 = vld [vmem:[#allocation2 + $0x180] sm:$0xff]  ;;  %v3632_v32 = vld [vmem:[%s3891_s19 + $0xd0] sm:$0xf]  ;;  %v3633_v33 = vld [vmem:[%s3891_s19 + $0xd8] sm:$0xf] }
  0x1c   : > { %v3948_v18 = vld [vmem:[#allocation2 + $0x1a0] sm:$0xff]  ;;  %1816 = vst [vmem:[#allocation2 + $0x180] sm:$0xf] %v3578_v22  ;;  %1925 = vst [vmem:[#allocation2 + $0x184] sm:$0xf] %v3596_v24  ;;  %v269_v38 = vld [vmem:[%s3891_s19 + $0x8] sm:$0xff] }
  0x1d   : > { %660 = vrot.lane.b32.xlu1 %v3928_v10, %s3844_s20  ;;  %658 = vrot.lane.b32.xlu0 %v3931_v11, %s3844_s20  ;;  %v3539_v20 = vcombine.high %v3946_v17, %v3948_v18  ;;  %v3538_v21 = vcombine.low %v3946_v17, %v3948_v18  ;;  %1817 = vst [vmem:[#allocation2 + $0x1a0] sm:$0xf] %v3579_v23  ;;  %1926 = vst [vmem:[#allocation2 + $0x1a4] sm:$0xf] %v3597_v25  ;;  %v3350_v34 = vld [vmem:[%s3891_s19 + $0x10] sm:$0xf] }
  0x1e   : > { %v3351_v35 = vld [vmem:[%s3891_s19 + $0x18] sm:$0xf]  ;;  %v3368_v36 = vld [vmem:[%s3891_s19 + $0x20] sm:$0xf]  ;;  %288 = vst [vmem:[#allocation2 + $0xc0] sm:$0xf] %v3350_v34 }
  0x1f   : > { %v3967_v26 = vld [vmem:[#allocation2 + $0x188] sm:$0xff]  ;;  %289 = vst [vmem:[#allocation2 + $0xe0] sm:$0xf] %v3351_v35  ;;  %397 = vst [vmem:[#allocation2 + $0xc4] sm:$0xf] %v3368_v36  ;;  %v268_v39 = vld [vmem:[%s3891_s19] sm:$0xff] }
  0x20   : > { %v3969_v27 = vld [vmem:[#allocation2 + $0x1a8] sm:$0xff]  ;;  %2034 = vst [vmem:[#allocation2 + $0x188] sm:$0xf] %v3614_v30  ;;  %2143 = vst [vmem:[#allocation2 + $0x18c] sm:$0xf] %v3632_v32  ;;  %v4124_v34 = vld [vmem:[%s3891_s19 + $0x78] sm:$0xff] }
  0x21   : > { %312 = vrot.lane.b32.xlu1 %v3938_v12, %s3845_s21  ;;  %310 = vrot.lane.b32.xlu0 %v3941_v13, %s3845_s21  ;;  %v3541_v28 = vcombine.high %v3967_v26, %v3969_v27  ;;  %v3540_v29 = vcombine.low %v3967_v26, %v3969_v27  ;;  %2035 = vst [vmem:[#allocation2 + $0x1a8] sm:$0xf] %v3615_v31  ;;  %2144 = vst [vmem:[#allocation2 + $0x1ac] sm:$0xf] %v3633_v33  ;;  %v3369_v37 = vld [vmem:[%s3891_s19 + $0x28] sm:$0xf] }
  0x22   : > { %398 = vst [vmem:[#allocation2 + $0xe4] sm:$0xf] %v3369_v37  ;;  %v3386_v41 = vld [vmem:[%s3891_s19 + $0x30] sm:$0xf]  ;;  %v3387_v42 = vld [vmem:[%s3891_s19 + $0x38] sm:$0xf] }
  0x23   : > { %506 = vst [vmem:[#allocation2 + $0xc8] sm:$0xf] %v3386_v41  ;;  %507 = vst [vmem:[#allocation2 + $0xe8] sm:$0xf] %v3387_v42  ;;  %v3404_v44 = vld [vmem:[%s3891_s19 + $0x40] sm:$0xf] }
  0x24   : > { %v3405_v45 = vld [vmem:[%s3891_s19 + $0x48] sm:$0xf]  ;;  %615 = vst [vmem:[#allocation2 + $0xcc] sm:$0xf] %v3404_v44  ;;  %v3572_v48 = vld [vmem:[%s3891_s19 + $0x90] sm:$0xf] }
  0x25   : > { %421 = vrot.lane.b32.xlu1 %v3907_v3, %s3845_s21  ;;  %419 = vrot.lane.b32.xlu0 %v3897_v1, %s3845_s21  ;;  %616 = vst [vmem:[#allocation2 + $0xec] sm:$0xf] %v3405_v45  ;;  %v3573_v49 = vld [vmem:[%s3891_s19 + $0x98] sm:$0xf]  ;;  %v3590_v50 = vld [vmem:[%s3891_s19 + $0xa0] sm:$0xf] }
  0x26   : > { %v4009_v40 = vld [vmem:[#allocation2 + $0xc0] sm:$0xff]  ;;  %v3591_v51 = vld [vmem:[%s3891_s19 + $0xa8] sm:$0xf]  ;;  %v3608_v56 = vld [vmem:[%s3891_s19 + $0xb0] sm:$0xf] }
  0x27   : > { %1779 = vst [vmem:[#allocation2 + $0xc0] sm:$0xf] %v3572_v48  ;;  %1888 = vst [vmem:[#allocation2 + $0xc4] sm:$0xf] %v3590_v50  ;;  %v3609_v57 = vld [vmem:[%s3891_s19 + $0xb8] sm:$0xf] }
  0x28   : > { %v3626_v58 = vld [vmem:[%s3891_s19 + $0xc0] sm:$0xf]  ;;  %v3627_v59 = vld [vmem:[%s3891_s19 + $0xc8] sm:$0xf]  ;;  %v3362_v62 = vld [vmem:[%s3891_s19 + $0x10] sm:$0xf] }
  0x29   : > { %530 = vrot.lane.b32.xlu1 %v3904_v2, %s3845_s21  ;;  %528 = vrot.lane.b32.xlu0 %v3894_v0, %s3845_s21  ;;  %v4013_v43 = vld [vmem:[#allocation2 + $0xe0] sm:$0xff]  ;;  %v248_v61 = vld [vmem:[%s3891_s19 + $0x8] sm:$0xf]  ;;  %v3363_v63 = vld [vmem:[%s3891_s19 + $0x18] sm:$0xf] }
  0x2a   : > { %v3515_v46 = vcombine.high %v4009_v40, %v4013_v43  ;;  %v3514_v47 = vcombine.low %v4009_v40, %v4013_v43  ;;  %1780 = vst [vmem:[#allocation2 + $0xe0] sm:$0xf] %v3573_v49  ;;  %1889 = vst [vmem:[#allocation2 + $0xe4] sm:$0xf] %v3591_v51  ;;  %v247_v60 = vld [vmem:[%s3891_s19] sm:$0xf] }
  0x2b   : > { %v4031_v52 = vld [vmem:[#allocation2 + $0xc8] sm:$0xff]  ;;  %249 = vst [vmem:[#allocation2] sm:$0xf] %v247_v60  ;;  %250 = vst [vmem:[#allocation2 + $0x20] sm:$0xf] %v248_v61  ;;  %v4117_v33 = vld [vmem:[%s3891_s19 + $0x60] sm:$0xff] }
  0x2c   : > { %v4033_v53 = vld [vmem:[#allocation2 + $0xe8] sm:$0xff]  ;;  %1997 = vst [vmem:[#allocation2 + $0xc8] sm:$0xf] %v3608_v56  ;;  %2106 = vst [vmem:[#allocation2 + $0xcc] sm:$0xf] %v3626_v58  ;;  %v4127_v35 = vld [vmem:[%s3891_s19 + $0x70] sm:$0xff] }
  0x2d   : > { %639 = vrot.lane.b32.xlu1 %v3914_v4, %s3845_s21  ;;  %637 = vrot.lane.b32.xlu0 %v3917_v5, %s3845_s21  ;;  %v3517_v54 = vcombine.high %v4031_v52, %v4033_v53  ;;  %v3516_v55 = vcombine.low %v4031_v52, %v4033_v53  ;;  %1998 = vst [vmem:[#allocation2 + $0xe8] sm:$0xf] %v3609_v57  ;;  %2107 = vst [vmem:[#allocation2 + $0xec] sm:$0xf] %v3627_v59  ;;  %v3380_v7 = vld [vmem:[%s3891_s19 + $0x20] sm:$0xf] }
  0x2e   : > { %361 = vst [vmem:[#allocation2 + $0x4] sm:$0xf] %v3362_v62  ;;  %362 = vst [vmem:[#allocation2 + $0x24] sm:$0xf] %v3363_v63  ;;  %v3381_v8 = vld [vmem:[%s3891_s19 + $0x28] sm:$0xf] }
  0x2f   : > { %470 = vst [vmem:[#allocation2 + $0x8] sm:$0xf] %v3380_v7  ;;  %471 = vst [vmem:[#allocation2 + $0x28] sm:$0xf] %v3381_v8  ;;  %v3566_v16 = vld [vmem:[%s3891_s19 + $0x80] sm:$0xf] }
  0x30   : > { %v3567_v19 = vld [vmem:[%s3891_s19 + $0x88] sm:$0xf]  ;;  %v3584_v22 = vld [vmem:[%s3891_s19 + $0x90] sm:$0xf]  ;;  %v3621_v31 = vld [vmem:[%s3891_s19 + $0xb8] sm:$0xf] }
  0x31   : > { %296 = vrot.lane.b32.xlu1 %v3938_v12, %s3844_s20  ;;  %294 = vrot.lane.b32.xlu0 %v3941_v13, %s3844_s20  ;;  %v3603_v25 = vld [vmem:[%s3891_s19 + $0xa8] sm:$0xf]  ;;  %v3620_v30 = vld [vmem:[%s3891_s19 + $0xb0] sm:$0xf] }
  0x32   : > { %v4114_v32 = vld [vmem:[%s3891_s19 + $0x68] sm:$0xff]  ;;  %v4132_v36 = vld [vmem:[%s4933_s1] sm:$0xff]  ;;  %v3446_v44 = vld [vmem:[%s3891_s19 + $0x70] sm:$0xf] }
  0x33   : > { %v4136_v37 = vcombine.high %v4132_v36, %v4132_v36  ;;  %v3428_v41 = vld [vmem:[%s3891_s19 + $0x60] sm:$0xf]  ;;  %v3429_v42 = vld [vmem:[%s3891_s19 + $0x68] sm:$0xf]  ;;  %v3447_v45 = vld [vmem:[%s3891_s19 + $0x78] sm:$0xf] }
  0x34   : > { %761 = vst [vmem:[#allocation2 + $0x190] sm:$0xf] %v3428_v41  ;;  %762 = vst [vmem:[#allocation2 + $0x1b0] sm:$0xf] %v3429_v42  ;;  %v4161_v48 = vld [vmem:[%s3891_s19 + $0x98] sm:$0xff]  ;;  %v4164_v49 = vld [vmem:[%s3891_s19 + $0x90] sm:$0xff] }
  0x35   : > { %405 = vrot.lane.b32.xlu1 %v3907_v3, %s3844_s20  ;;  %403 = vrot.lane.b32.xlu0 %v3897_v1, %s3844_s20  ;;  %v4069_v6 = vld [vmem:[#allocation2] sm:$0xff]  ;;  %870 = vst [vmem:[#allocation2 + $0x194] sm:$0xf] %v3446_v44  ;;  %871 = vst [vmem:[#allocation2 + $0x1b4] sm:$0xf] %v3447_v45 }
  0x36   : > { %v4073_v9 = vld [vmem:[#allocation2 + $0x20] sm:$0xff]  ;;  %1743 = vst [vmem:[#allocation2] sm:$0xf] %v3566_v16  ;;  %1852 = vst [vmem:[#allocation2 + $0x4] sm:$0xf] %v3584_v22  ;;  %3562 = vmatprep.mubr.msk.bf16.mxu0 %vm1565_vm0, %v4136_v37  ;;  %3563 = vmatprep.mubr.msk.bf16.mxu1 %vm1565_vm0, %v4136_v37 }
  0x37   : > { %v3491_v14 = vcombine.high %v4069_v6, %v4073_v9  ;;  %v3490_v15 = vcombine.low %v4069_v6, %v4073_v9  ;;  %1744 = vst [vmem:[#allocation2 + $0x20] sm:$0xf] %v3567_v19  ;;  %v3464_v51 = vld [vmem:[%s3891_s19 + $0x80] sm:$0xf]  ;;  %v3465_v56 = vld [vmem:[%s3891_s19 + $0x88] sm:$0xf] }
  0x38   : > { %979 = vst [vmem:[#allocation2 + $0x198] sm:$0xf] %v3464_v51  ;;  %980 = vst [vmem:[#allocation2 + $0x1b8] sm:$0xf] %v3465_v56  ;;  %v3482_v58 = vld [vmem:[%s3891_s19 + $0x90] sm:$0xf] }
  0x39   : > { %514 = vrot.lane.b32.xlu1 %v3904_v2, %s3844_s20  ;;  %512 = vrot.lane.b32.xlu0 %v3894_v0, %s3844_s20  ;;  %v3483_v59 = vld [vmem:[%s3891_s19 + $0x98] sm:$0xf]  ;;  %1088 = vst [vmem:[#allocation2 + $0x19c] sm:$0xf] %v3482_v58  ;;  %v3650_v7 = vld [vmem:[%s3891_s19 + $0xe0] sm:$0xf] }
  0x3a   : > { %1089 = vst [vmem:[#allocation2 + $0x1bc] sm:$0xf] %v3483_v59  ;;  %v3651_v8 = vld [vmem:[%s3891_s19 + $0xe8] sm:$0xf]  ;;  %v3669_v19 = vld [vmem:[%s3891_s19 + $0xf8] sm:$0xf] }
  0x3b   : > { %v3662_v26 = vld [vmem:[%s3891_s19 + $0xe0] sm:$0xf]  ;;  %v3663_v27 = vld [vmem:[%s3891_s19 + $0xe8] sm:$0xf]  ;;  %v3656_v52 = vld [vmem:[%s3891_s19 + $0xd0] sm:$0xf] }
  0x3c   : > { %v4170_v50 = vld [vmem:[#allocation2 + $0x190] sm:$0xff]  ;;  %v3657_v53 = vld [vmem:[%s3891_s19 + $0xd8] sm:$0xf] }
  0x3d   : > { %623 = vrot.lane.b32.xlu1 %v3914_v4, %s3844_s20  ;;  %621 = vrot.lane.b32.xlu0 %v3917_v5, %s3844_s20  ;;  %v4174_v57 = vld [vmem:[#allocation2 + $0x1b0] sm:$0xff]  ;;  %2252 = vst [vmem:[#allocation2 + $0x190] sm:$0xf] %v3650_v7  ;;  %v3686_v7 = vld [vmem:[%s3891_s19 + $0x100] sm:$0xf] }
  0x3e   : > { %v3543_v60 = vcombine.high %v4170_v50, %v4174_v57  ;;  %v3542_v61 = vcombine.low %v4170_v50, %v4174_v57  ;;  %2253 = vst [vmem:[#allocation2 + $0x1b0] sm:$0xf] %v3651_v8  ;;  %2362 = vst [vmem:[#allocation2 + $0x1b4] sm:$0xf] %v3669_v19  ;;  %v3687_v8 = vld [vmem:[%s3891_s19 + $0x108] sm:$0xf] }
  0x3f   : > { %v3571_v50 = vld [vmem:[%s3891_s19 + $0x88] sm:$0xff] }
  0x40   : > { %v4196_v41 = vld [vmem:[#allocation2 + $0x198] sm:$0xff] }
  0x41   : > { %274 = vrot.lane.b32.xlu1 %v269_v38, %s3845_s21  ;;  %272 = vrot.lane.b32.xlu0 %v268_v39, %s3845_s21  ;;  %v4198_v42 = vld [vmem:[#allocation2 + $0x1b8] sm:$0xff]  ;;  %2470 = vst [vmem:[#allocation2 + $0x198] sm:$0xf] %v3686_v7 }
  0x42   : > { %v3545_v44 = vcombine.high %v4196_v41, %v4198_v42  ;;  %v3544_v45 = vcombine.low %v4196_v41, %v4198_v42  ;;  %2471 = vst [vmem:[#allocation2 + $0x1b8] sm:$0xf] %v3687_v8 }
  0x45   : > { %385 = vrot.lane.b32.xlu1 %v3938_v12, %s3845_s21  ;;  %383 = vrot.lane.b32.xlu0 %v3941_v13, %s3845_s21 }
  0x49   : > { %494 = vrot.lane.b32.xlu1 %v3907_v3, %s3845_s21  ;;  %492 = vrot.lane.b32.xlu0 %v3897_v1, %s3845_s21 }
  0x4d   : > { %603 = vrot.lane.b32.xlu1 %v3904_v2, %s3845_s21  ;;  %601 = vrot.lane.b32.xlu0 %v3894_v0, %s3845_s21 }
  0x51   : > { %257 = vrot.lane.b32.xlu1 %v269_v38, %s3844_s20  ;;  %255 = vrot.lane.b32.xlu0 %v268_v39, %s3844_s20  ;;  %v4143_v38 = vld [vmem:[%s3891_s19 + $0x88] sm:$0xff]  ;;  %v4146_v39 = vld [vmem:[%s3891_s19 + $0x80] sm:$0xff] }
  0x55   : > { %369 = vrot.lane.b32.xlu1 %v3938_v12, %s3844_s20  ;;  %367 = vrot.lane.b32.xlu0 %v3941_v13, %s3844_s20  ;;  %v3398_v12 = vld [vmem:[%s3891_s19 + $0x30] sm:$0xf]  ;;  %v3399_v13 = vld [vmem:[%s3891_s19 + $0x38] sm:$0xf] }
  0x56   : > { %579 = vst [vmem:[#allocation2 + $0xc] sm:$0xf] %v3398_v12  ;;  %580 = vst [vmem:[#allocation2 + $0x2c] sm:$0xf] %v3399_v13  ;;  %v3668_v12 = vld [vmem:[%s3891_s19 + $0xf0] sm:$0xf] }
  0x57   : > { %2361 = vst [vmem:[#allocation2 + $0x194] sm:$0xf] %v3668_v12  ;;  %v3704_v12 = vld [vmem:[%s3891_s19 + $0x110] sm:$0xf] }
  0x58   : > { %2579 = vst [vmem:[#allocation2 + $0x19c] sm:$0xf] %v3704_v12 }
  0x59   : > { %478 = vrot.lane.b32.xlu1 %v3907_v3, %s3844_s20  ;;  %476 = vrot.lane.b32.xlu0 %v3897_v1, %s3844_s20 }
  0x5d   : > { %587 = vrot.lane.b32.xlu1 %v3904_v2, %s3844_s20  ;;  %585 = vrot.lane.b32.xlu0 %v3894_v0, %s3844_s20  ;;  %v4095_v23 = vld [vmem:[#allocation2 + $0x28] sm:$0xff] }
  0x5e   : > { %1962 = vst [vmem:[#allocation2 + $0x28] sm:$0xf] %v3603_v25  ;;  %2071 = vst [vmem:[#allocation2 + $0x2c] sm:$0xf] %v3621_v31 }
  0x61   : > { %349 = vrot.lane.b32.xlu1 %v3907_v3, %s3845_s21  ;;  %347 = vrot.lane.b32.xlu0 %v3897_v1, %s3845_s21  ;;  %v3585_v3 = vld [vmem:[%s3891_s19 + $0x98] sm:$0xf]  ;;  %v4093_v1 = vld [vmem:[#allocation2 + $0x8] sm:$0xff] }
  0x62   : > { %1853 = vst [vmem:[#allocation2 + $0x24] sm:$0xf] %v3585_v3  ;;  %v3493_v24 = vcombine.high %v4093_v1, %v4095_v23  ;;  %2070 = vst [vmem:[#allocation2 + $0xc] sm:$0xf] %v3620_v30 }
  0x65   : > { %458 = vrot.lane.b32.xlu1 %v3904_v2, %s3845_s21  ;;  %456 = vrot.lane.b32.xlu0 %v3894_v0, %s3845_s21  ;;  %v3492_v0 = vcombine.low %v4093_v1, %v4095_v23  ;;  %v3602_v2 = vld [vmem:[%s3891_s19 + $0xa0] sm:$0xf] }
  0x66   : > { %1961 = vst [vmem:[#allocation2 + $0x8] sm:$0xf] %v3602_v2 }
  0x69   : > { %567 = vrot.lane.b32.xlu1 %v3914_v4, %s3845_s21  ;;  %565 = vrot.lane.b32.xlu0 %v3917_v5, %s3845_s21 }
  0x6d   : > { %676 = vrot.lane.b32.xlu1 %v3928_v10, %s3845_s21  ;;  %674 = vrot.lane.b32.xlu0 %v3931_v11, %s3845_s21 }
  0x71   : > { %769 = vrot.lane.b32.xlu1 %v4114_v32, %s3844_s20  ;;  %767 = vrot.lane.b32.xlu0 %v4117_v33, %s3844_s20 }
  0x75   : > { %878 = vrot.lane.b32.xlu1 %v4124_v34, %s3844_s20  ;;  %876 = vrot.lane.b32.xlu0 %v4127_v35, %s3844_s20 }
  0x79   : > { %987 = vrot.lane.b32.xlu1 %v4143_v38, %s3844_s20  ;;  %985 = vrot.lane.b32.xlu0 %v4146_v39, %s3844_s20 }
  0x7d   : > { %1096 = vrot.lane.b32.xlu1 %v4161_v48, %s3844_s20  ;;  %1094 = vrot.lane.b32.xlu0 %v4164_v49, %s3844_s20 }
  0x81   : > { %748 = vrot.lane.b32.xlu1 %v3928_v10, %s3845_s21  ;;  %746 = vrot.lane.b32.xlu0 %v3931_v11, %s3845_s21 }
  0x83   : > { %v441_v62 = vpop.permute.xlu1 %440  ;;  %v332_v63 = vpop.permute.xlu0 %331 }
  0x84   : > { %v444_v13 = vrot.slane %v441_v62, 4  ;;  %v335_v16 = vrot.slane %v332_v63, 4 }
  0x85   : > { %857 = vrot.lane.b32.xlu1 %v4114_v32, %s3845_s21  ;;  %855 = vrot.lane.b32.xlu0 %v4117_v33, %s3845_s21 }
  0x86   : > { %v446_v22 = vsel %vm261_vm1, %v441_v62, %v444_v13  ;;  %v337_v3 = vsel %vm261_vm1, %v332_v63, %v335_v16  ;;  %v3705_v13 = vld [vmem:[%s3891_s19 + $0x118] sm:$0xf] }
  0x87   : > { %450 = vst [vmem:[#allocation2 + $0x1c4] sm:$0xf] %v446_v22  ;;  %341 = vst [vmem:[#allocation2 + $0x1c0] sm:$0xf] %v337_v3  ;;  %v443_v2 = vpop.permute.xlu1 %442  ;;  %v334_v25 = vpop.permute.xlu0 %333 }
  0x88   : > { %v445_v30 = vrot.slane %v443_v2, 4  ;;  %v336_v31 = vrot.slane %v334_v25, 4  ;;  %2580 = vst [vmem:[#allocation2 + $0x1bc] sm:$0xf] %v3705_v13 }
  0x89   : > { %966 = vrot.lane.b32.xlu1 %v4124_v34, %s3845_s21  ;;  %964 = vrot.lane.b32.xlu0 %v4127_v35, %s3845_s21 }
  0x8a   : > { %v447_v51 = vsel %vm261_vm1, %v443_v2, %v445_v30  ;;  %v338_v56 = vsel %vm261_vm1, %v334_v25, %v336_v31 }
  0x8b   : > { %451 = vst [vmem:[#allocation2 + $0x1e4] sm:$0xf] %v447_v51  ;;  %342 = vst [vmem:[#allocation2 + $0x1e0] sm:$0xf] %v338_v56  ;;  %v552_v58 = vpop.permute.xlu1 %551  ;;  %v550_v59 = vpop.permute.xlu0 %549 }
  0x8c   : > { %v554_v62 = vrot.slane %v552_v58, 4  ;;  %v553_v63 = vrot.slane %v550_v59, 4 }
  0x8d   : > { %1075 = vrot.lane.b32.xlu1 %v4143_v38, %s3845_s21  ;;  %1073 = vrot.lane.b32.xlu0 %v4146_v39, %s3845_s21 }
  0x8e   : > { %v556_v16 = vsel %vm261_vm1, %v552_v58, %v554_v62  ;;  %v555_v19 = vsel %vm261_vm1, %v550_v59, %v553_v63  ;;  %v1178_v51 = vld [vmem:[#allocation2 + $0x1c0] sm:$0xff] }
  0x8f   : > { %560 = vst [vmem:[#allocation2 + $0x1e8] sm:$0xf] %v556_v16  ;;  %559 = vst [vmem:[#allocation2 + $0x1c8] sm:$0xf] %v555_v19  ;;  %v661_v22 = vpop.permute.xlu1 %660  ;;  %v659_v3 = vpop.permute.xlu0 %658 }
  0x90   : > { %v663_v2 = vrot.slane %v661_v22, 4  ;;  %v662_v25 = vrot.slane %v659_v3, 4 }
  0x91   : > { %732 = vrot.lane.b32.xlu1 %v3928_v10, %s3844_s20  ;;  %730 = vrot.lane.b32.xlu0 %v3931_v11, %s3844_s20 }
  0x92   : > { %v665_v30 = vsel %vm261_vm1, %v661_v22, %v663_v2  ;;  %v664_v31 = vsel %vm261_vm1, %v659_v3, %v662_v25  ;;  %v1182_v56 = vld [vmem:[#allocation2 + $0x1e0] sm:$0xff]  ;;  %v3422_v22 = vld [vmem:[%s3891_s19 + $0x50] sm:$0xf]  ;;  %v3423_v3 = vld [vmem:[%s3891_s19 + $0x58] sm:$0xf] }
  0x93   : > { %669 = vst [vmem:[#allocation2 + $0x1ec] sm:$0xf] %v665_v30  ;;  %668 = vst [vmem:[#allocation2 + $0x1cc] sm:$0xf] %v664_v31  ;;  %v313_v58 = vpop.permute.xlu1 %312  ;;  %v311_v59 = vpop.permute.xlu0 %310  ;;  %v3547_v62 = vcombine.high %v1178_v51, %v1182_v56  ;;  %v3546_v63 = vcombine.low %v1178_v51, %v1182_v56  ;;  %v3440_v2 = vld [vmem:[%s3891_s19 + $0x60] sm:$0xf] }
  0x94   : > { %v315_v7 = vrot.slane %v313_v58, 4  ;;  %v314_v8 = vrot.slane %v311_v59, 4  ;;  %724 = vst [vmem:[#allocation2 + $0xd0] sm:$0xf] %v3422_v22  ;;  %725 = vst [vmem:[#allocation2 + $0xf0] sm:$0xf] %v3423_v3 }
  0x95   : > { %1569 = vmatprep.subr.bf16.mxu0 %v3547_v62  ;;  %841 = vrot.lane.b32.xlu1 %v4114_v32, %s3844_s20  ;;  %v3441_v31 = vld [vmem:[%s3891_s19 + $0x68] sm:$0xf]  ;;  %833 = vst [vmem:[#allocation2 + $0xd4] sm:$0xf] %v3440_v2  ;;  %v3459_v22 = vld [vmem:[%s3891_s19 + $0x78] sm:$0xf] }
  0x96   : > { %v317_v12 = vsel %vm278_vm2, %v313_v58, %v315_v7  ;;  %v316_v13 = vsel %vm278_vm2, %v311_v59, %v314_v8  ;;  %839 = vrot.lane.b32.xlu0 %v4117_v33, %s3844_s20  ;;  %1570 = vmatpush1.bf16.msra.mxu0 %v3546_v63  ;;  %834 = vst [vmem:[#allocation2 + $0xf4] sm:$0xf] %v3441_v31  ;;  %943 = vst [vmem:[#allocation2 + $0xf8] sm:$0xf] %v3459_v22 }
  0x97   : > { %321 = vst [vmem:[#allocation2 + $0x160] sm:$0xf] %v317_v12  ;;  %320 = vst [vmem:[#allocation2 + $0x140] sm:$0xf] %v316_v13  ;;  %v422_v16 = vpop.permute.xlu1 %421  ;;  %v420_v19 = vpop.permute.xlu0 %419  ;;  %1571 = vmatprep.subr.bf16.mxu0 %v3539_v20 }
  0x98   : > { %v424_v25 = vrot.slane %v422_v16, 4  ;;  %v423_v30 = vrot.slane %v420_v19, 4 }
  0x99   : > { %950 = vrot.lane.b32.xlu1 %v4124_v34, %s3844_s20 }
  0x9a   : > { %v426_v51 = vsel %vm278_vm2, %v422_v16, %v424_v25  ;;  %v425_v56 = vsel %vm278_vm2, %v420_v19, %v423_v30  ;;  %948 = vrot.lane.b32.xlu0 %v4127_v35, %s3844_s20  ;;  %v1179_v20 = vld [vmem:[#allocation2 + $0x1c8] sm:$0xff]  ;;  %1572 = vmatpush1.bf16.msra.mxu0 %v3538_v21  ;;  %v3458_v19 = vld [vmem:[%s3891_s19 + $0x70] sm:$0xf]  ;;  %v3476_v30 = vld [vmem:[%s3891_s19 + $0x80] sm:$0xf] }
  0x9b   : > { %v1183_v58 = vld [vmem:[#allocation2 + $0x1e8] sm:$0xff]  ;;  %430 = vst [vmem:[#allocation2 + $0x164] sm:$0xf] %v426_v51  ;;  %429 = vst [vmem:[#allocation2 + $0x144] sm:$0xf] %v425_v56  ;;  %v531_v59 = vpop.permute.xlu1 %530  ;;  %v529_v62 = vpop.permute.xlu0 %528 }
  0x9c   : > { %v3549_v63 = vcombine.high %v1179_v20, %v1183_v58  ;;  %v3548_v7 = vcombine.low %v1179_v20, %v1183_v58  ;;  %v533_v8 = vrot.slane %v531_v59, 4  ;;  %v532_v12 = vrot.slane %v529_v62, 4  ;;  %v4257_v21 = vld [vmem:[#allocation2 + $0xd0] sm:$0xff]  ;;  %942 = vst [vmem:[#allocation2 + $0xd8] sm:$0xf] %v3458_v19 }
  0x9d   : > { %1059 = vrot.lane.b32.xlu1 %v4143_v38, %s3844_s20  ;;  %v4261_v25 = vld [vmem:[#allocation2 + $0xf0] sm:$0xff]  ;;  %v3477_v51 = vld [vmem:[%s3891_s19 + $0x88] sm:$0xf]  ;;  %1051 = vst [vmem:[#allocation2 + $0xdc] sm:$0xf] %v3476_v30 }
  0x9e   : > { %1610 = vmatprep.subr.bf16.mxu1 %v3549_v63  ;;  %v535_v13 = vsel %vm278_vm2, %v531_v59, %v533_v8  ;;  %v534_v16 = vsel %vm278_vm2, %v529_v62, %v532_v12  ;;  %1057 = vrot.lane.b32.xlu0 %v4146_v39, %s3844_s20  ;;  %v3519_v31 = vcombine.high %v4257_v21, %v4261_v25 }
  0x9f   : > { %1611 = vmatpush1.bf16.msra.mxu1 %v3548_v7  ;;  %539 = vst [vmem:[#allocation2 + $0x168] sm:$0xf] %v535_v13  ;;  %538 = vst [vmem:[#allocation2 + $0x148] sm:$0xf] %v534_v16  ;;  %v640_v17 = vpop.permute.xlu1 %639  ;;  %v638_v18 = vpop.permute.xlu0 %637  ;;  %v3644_v16 = vld [vmem:[%s3891_s19 + $0xd0] sm:$0xf] }
  0xa0   : > { %1612 = vmatprep.subr.bf16.mxu1 %v3541_v28  ;;  %v642_v3 = vrot.slane %v640_v17, 4  ;;  %v641_v2 = vrot.slane %v638_v18, 4  ;;  %v3518_v28 = vcombine.low %v4257_v21, %v4261_v25  ;;  %1052 = vst [vmem:[#allocation2 + $0xfc] sm:$0xf] %v3477_v51  ;;  %2215 = vst [vmem:[#allocation2 + $0xd0] sm:$0xf] %v3644_v16 }
  0xa1   : > { %712 = vrot.lane.b32.xlu1 %v3914_v4, %s3845_s21  ;;  %2324 = vst [vmem:[#allocation2 + $0xd4] sm:$0xf] %v3662_v26  ;;  %2325 = vst [vmem:[#allocation2 + $0xf4] sm:$0xf] %v3663_v27  ;;  %v3680_v26 = vld [vmem:[%s3891_s19 + $0xf0] sm:$0xf] }
  0xa2   : > { %v644_v56 = vsel %vm278_vm2, %v640_v17, %v642_v3  ;;  %v643_v20 = vsel %vm278_vm2, %v638_v18, %v641_v2  ;;  %710 = vrot.lane.b32.xlu0 %v3917_v5, %s3845_s21  ;;  %v1162_v58 = vld [vmem:[#allocation2 + $0x140] sm:$0xff]  ;;  %v3645_v17 = vld [vmem:[%s3891_s19 + $0xd8] sm:$0xf] }
  0xa3   : > { %v1166_v59 = vld [vmem:[#allocation2 + $0x160] sm:$0xff]  ;;  %1613 = vmatpush1.bf16.msra.mxu1 %v3540_v29  ;;  %648 = vst [vmem:[#allocation2 + $0x16c] sm:$0xf] %v644_v56  ;;  %647 = vst [vmem:[#allocation2 + $0x14c] sm:$0xf] %v643_v20  ;;  %v297_v62 = vpop.permute.xlu1 %296  ;;  %v295_v63 = vpop.permute.xlu0 %294 }
  0xa4   : > { %v3531_v7 = vcombine.high %v1162_v58, %v1166_v59  ;;  %v3530_v8 = vcombine.low %v1162_v58, %v1166_v59  ;;  %v299_v12 = vrot.slane %v297_v62, 4  ;;  %v298_v13 = vrot.slane %v295_v63, 4  ;;  %2216 = vst [vmem:[#allocation2 + $0xf0] sm:$0xf] %v3645_v17  ;;  %v4288_v30 = vld [vmem:[#allocation2 + $0xd8] sm:$0xff] }
  0xa5   : > { %821 = vrot.lane.b32.xlu1 %v3928_v10, %s3845_s21  ;;  %v3681_v27 = vld [vmem:[%s3891_s19 + $0xf8] sm:$0xf]  ;;  %2433 = vst [vmem:[#allocation2 + $0xd8] sm:$0xf] %v3680_v26 }
  0xa6   : > { %1573 = vmatprep.subr.bf16.mxu0 %v3531_v7  ;;  %v301_v29 = vsel %vm261_vm1, %v297_v62, %v299_v12  ;;  %v300_v18 = vsel %vm261_vm1, %v295_v63, %v298_v13  ;;  %819 = vrot.lane.b32.xlu0 %v3931_v11, %s3845_s21 }
  0xa7   : > { %1574 = vmatpush1.bf16.msra.mxu0 %v3530_v8  ;;  %305 = vst [vmem:[#allocation2 + $0x120] sm:$0xf] %v301_v29  ;;  %304 = vst [vmem:[#allocation2 + $0x100] sm:$0xf] %v300_v18  ;;  %v406_v19 = vpop.permute.xlu1 %405  ;;  %v404_v22 = vpop.permute.xlu0 %403  ;;  %v4292_v51 = vld [vmem:[#allocation2 + $0xf8] sm:$0xff] }
  0xa8   : > { %v408_v3 = vrot.slane %v406_v19, 4  ;;  %v407_v2 = vrot.slane %v404_v22, 4  ;;  %v3521_v62 = vcombine.high %v4288_v30, %v4292_v51  ;;  %v3520_v63 = vcombine.low %v4288_v30, %v4292_v51  ;;  %2434 = vst [vmem:[#allocation2 + $0xf8] sm:$0xf] %v3681_v27  ;;  %v3698_v29 = vld [vmem:[%s3891_s19 + $0x100] sm:$0xf] }
  0xa9   : > { %930 = vrot.lane.b32.xlu1 %v4114_v32, %s3845_s21  ;;  %v3699_v18 = vld [vmem:[%s3891_s19 + $0x108] sm:$0xf]  ;;  %2542 = vst [vmem:[#allocation2 + $0xdc] sm:$0xf] %v3698_v29 }
  0xaa   : > { %v410_v56 = vsel %vm261_vm1, %v406_v19, %v408_v3  ;;  %v409_v20 = vsel %vm261_vm1, %v404_v22, %v407_v2  ;;  %928 = vrot.lane.b32.xlu0 %v4117_v33, %s3845_s21  ;;  %v1163_v58 = vld [vmem:[#allocation2 + $0x148] sm:$0xff]  ;;  %2543 = vst [vmem:[#allocation2 + $0xfc] sm:$0xf] %v3699_v18 }
  0xab   : > { %v1167_v59 = vld [vmem:[#allocation2 + $0x168] sm:$0xff]  ;;  %414 = vst [vmem:[#allocation2 + $0x124] sm:$0xf] %v410_v56  ;;  %413 = vst [vmem:[#allocation2 + $0x104] sm:$0xf] %v409_v20  ;;  %v515_v7 = vpop.permute.xlu1 %514  ;;  %v513_v8 = vpop.permute.xlu0 %512 }
  0xac   : > { %v3533_v12 = vcombine.high %v1163_v58, %v1167_v59  ;;  %v3532_v13 = vcombine.low %v1163_v58, %v1167_v59  ;;  %v517_v16 = vrot.slane %v515_v7, 4  ;;  %v516_v17 = vrot.slane %v513_v8, 4 }
  0xad   : > { %1039 = vrot.lane.b32.xlu1 %v4124_v34, %s3845_s21 }
  0xae   : > { %1614 = vmatprep.subr.bf16.mxu1 %v3533_v12  ;;  %v519_v19 = vsel %vm261_vm1, %v515_v7, %v517_v16  ;;  %v518_v22 = vsel %vm261_vm1, %v513_v8, %v516_v17  ;;  %1037 = vrot.lane.b32.xlu0 %v4127_v35, %s3845_s21 }
  0xaf   : > { %1615 = vmatpush1.bf16.msra.mxu1 %v3532_v13  ;;  %523 = vst [vmem:[#allocation2 + $0x128] sm:$0xf] %v519_v19  ;;  %522 = vst [vmem:[#allocation2 + $0x108] sm:$0xf] %v518_v22  ;;  %v624_v3 = vpop.permute.xlu1 %623  ;;  %v622_v2 = vpop.permute.xlu0 %621  ;;  %v3416_v19 = vld [vmem:[%s3891_s19 + $0x40] sm:$0xf] }
  0xb0   : > { %v626_v56 = vrot.slane %v624_v3, 4  ;;  %v625_v20 = vrot.slane %v622_v2, 4  ;;  %v3417_v22 = vld [vmem:[%s3891_s19 + $0x48] sm:$0xf]  ;;  %688 = vst [vmem:[#allocation2 + $0x10] sm:$0xf] %v3416_v19 }
  0xb1   : > { %696 = vrot.lane.b32.xlu1 %v3914_v4, %s3844_s20  ;;  %689 = vst [vmem:[#allocation2 + $0x30] sm:$0xf] %v3417_v22  ;;  %v3470_v19 = vld [vmem:[%s3891_s19 + $0x70] sm:$0xf] }
  0xb2   : > { %v628_v58 = vsel %vm261_vm1, %v624_v3, %v626_v56  ;;  %v627_v59 = vsel %vm261_vm1, %v622_v2, %v625_v20  ;;  %694 = vrot.lane.b32.xlu0 %v3917_v5, %s3844_s20  ;;  %v1154_v7 = vld [vmem:[#allocation2 + $0x100] sm:$0xff]  ;;  %v3435_v56 = vld [vmem:[%s3891_s19 + $0x58] sm:$0xf]  ;;  %1015 = vst [vmem:[#allocation2 + $0x1c] sm:$0xf] %v3470_v19 }
  0xb3   : > { %v1158_v8 = vld [vmem:[#allocation2 + $0x120] sm:$0xff]  ;;  %632 = vst [vmem:[#allocation2 + $0x12c] sm:$0xf] %v628_v58  ;;  %631 = vst [vmem:[#allocation2 + $0x10c] sm:$0xf] %v627_v59  ;;  %v275_v12 = vpop.permute.xlu1 %274  ;;  %v273_v13 = vpop.permute.xlu0 %272 }
  0xb4   : > { %v3523_v16 = vcombine.high %v1154_v7, %v1158_v8  ;;  %v3522_v17 = vcombine.low %v1154_v7, %v1158_v8  ;;  %v277_v26 = vrot.slane %v275_v12, 4  ;;  %v276_v4 = vrot.slane %v273_v13, 4  ;;  %798 = vst [vmem:[#allocation2 + $0x34] sm:$0xf] %v3435_v56 }
  0xb5   : > { %805 = vrot.lane.b32.xlu1 %v3928_v10, %s3844_s20  ;;  %v3434_v10 = vld [vmem:[%s3891_s19 + $0x50] sm:$0xf] }
  0xb6   : > { %1575 = vmatprep.subr.bf16.mxu0 %v3523_v16  ;;  %v280_v27 = vsel %vm278_vm2, %v275_v12, %v277_v26  ;;  %v279_v5 = vsel %vm278_vm2, %v273_v13, %v276_v4  ;;  %803 = vrot.lane.b32.xlu0 %v3931_v11, %s3844_s20  ;;  %797 = vst [vmem:[#allocation2 + $0x14] sm:$0xf] %v3434_v10  ;;  %v3452_v4 = vld [vmem:[%s3891_s19 + $0x60] sm:$0xf]  ;;  %v3471_v10 = vld [vmem:[%s3891_s19 + $0x78] sm:$0xf] }
  0xb7   : > { %1576 = vmatpush1.bf16.msra.mxu0 %v3522_v17  ;;  %284 = vst [vmem:[#allocation2 + $0xa0] sm:$0xf] %v280_v27  ;;  %283 = vst [vmem:[#allocation2 + $0x80] sm:$0xf] %v279_v5  ;;  %v386_v29 = vpop.permute.xlu1 %385  ;;  %v384_v18 = vpop.permute.xlu0 %383  ;;  %v3453_v27 = vld [vmem:[%s3891_s19 + $0x68] sm:$0xf] }
  0xb8   : > { %1577 = vmatprep.subr.bf16.mxu0 %v3515_v46  ;;  %v388_v3 = vrot.slane %v386_v29, 4  ;;  %v387_v2 = vrot.slane %v384_v18, 4  ;;  %906 = vst [vmem:[#allocation2 + $0x18] sm:$0xf] %v3452_v4  ;;  %907 = vst [vmem:[#allocation2 + $0x38] sm:$0xf] %v3453_v27 }
  0xb9   : > { %914 = vrot.lane.b32.xlu1 %v4114_v32, %s3844_s20  ;;  %1016 = vst [vmem:[#allocation2 + $0x3c] sm:$0xf] %v3471_v10 }
  0xba   : > { %v390_v11 = vsel %vm278_vm2, %v386_v29, %v388_v3  ;;  %v389_v20 = vsel %vm278_vm2, %v384_v18, %v387_v2  ;;  %912 = vrot.lane.b32.xlu0 %v4117_v33, %s3844_s20  ;;  %v1155_v46 = vld [vmem:[#allocation2 + $0x108] sm:$0xff] }
  0xbb   : > { %v1159_v58 = vld [vmem:[#allocation2 + $0x128] sm:$0xff]  ;;  %1578 = vmatpush1.bf16.msra.mxu0 %v3514_v47  ;;  %394 = vst [vmem:[#allocation2 + $0xa4] sm:$0xf] %v390_v11  ;;  %393 = vst [vmem:[#allocation2 + $0x84] sm:$0xf] %v389_v20  ;;  %v495_v59 = vpop.permute.xlu1 %494  ;;  %v493_v7 = vpop.permute.xlu0 %492  ;;  %v4353_v18 = vld [vmem:[#allocation2 + $0x30] sm:$0xff] }
  0xbc   : > { %v3525_v8 = vcombine.high %v1155_v46, %v1159_v58  ;;  %v3524_v12 = vcombine.low %v1155_v46, %v1159_v58  ;;  %v497_v13 = vrot.slane %v495_v59, 4  ;;  %v496_v16 = vrot.slane %v493_v7, 4  ;;  %2289 = vst [vmem:[#allocation2 + $0x34] sm:$0xf] %v3657_v53 }
  0xbd   : > { %1023 = vrot.lane.b32.xlu1 %v4124_v34, %s3844_s20  ;;  %v4349_v47 = vld [vmem:[#allocation2 + $0x10] sm:$0xff] }
  0xbe   : > { %1616 = vmatprep.subr.bf16.mxu1 %v3525_v8  ;;  %v499_v17 = vsel %vm278_vm2, %v495_v59, %v497_v13  ;;  %v498_v26 = vsel %vm278_vm2, %v493_v7, %v496_v16  ;;  %1021 = vrot.lane.b32.xlu0 %v4127_v35, %s3844_s20  ;;  %v3495_v22 = vcombine.high %v4349_v47, %v4353_v18  ;;  %v3638_v8 = vld [vmem:[%s3891_s19 + $0xc0] sm:$0xf] }
  0xbf   : > { %1617 = vmatpush1.bf16.msra.mxu1 %v3524_v12  ;;  %503 = vst [vmem:[#allocation2 + $0xa8] sm:$0xf] %v499_v17  ;;  %502 = vst [vmem:[#allocation2 + $0x88] sm:$0xf] %v498_v26  ;;  %v604_v40 = vpop.permute.xlu1 %603  ;;  %v602_v43 = vpop.permute.xlu0 %601  ;;  %v3639_v12 = vld [vmem:[%s3891_s19 + $0xc8] sm:$0xf] }
  0xc0   : > { %1618 = vmatprep.subr.bf16.mxu1 %v3517_v54  ;;  %v606_v5 = vrot.slane %v604_v40, 4  ;;  %v605_v29 = vrot.slane %v602_v43, 4  ;;  %v3494_v54 = vcombine.low %v4349_v47, %v4353_v18  ;;  %2179 = vst [vmem:[#allocation2 + $0x10] sm:$0xf] %v3638_v8  ;;  %2180 = vst [vmem:[#allocation2 + $0x30] sm:$0xf] %v3639_v12 }
  0xc1   : > { %785 = vrot.lane.b32.xlu1 %v4114_v32, %s3845_s21  ;;  %2288 = vst [vmem:[#allocation2 + $0x14] sm:$0xf] %v3656_v52  ;;  %v4380_v26 = vld [vmem:[#allocation2 + $0x18] sm:$0xff]  ;;  %v4408_v12 = vld [vmem:[%s3891_s19 + $0xa0] sm:$0xff] }
  0xc2   : > { %v608_v3 = vsel %vm278_vm2, %v604_v40, %v606_v5  ;;  %v607_v2 = vsel %vm278_vm2, %v602_v43, %v605_v29  ;;  %783 = vrot.lane.b32.xlu0 %v4117_v33, %s3845_s21  ;;  %v1138_v56 = vld [vmem:[#allocation2 + $0x80] sm:$0xff]  ;;  %v4384_v40 = vld [vmem:[#allocation2 + $0x38] sm:$0xff] }
  0xc3   : > { %v1142_v11 = vld [vmem:[#allocation2 + $0xa0] sm:$0xff]  ;;  %1619 = vmatpush1.bf16.msra.mxu1 %v3516_v55  ;;  %612 = vst [vmem:[#allocation2 + $0xac] sm:$0xf] %v608_v3  ;;  %611 = vst [vmem:[#allocation2 + $0x8c] sm:$0xf] %v607_v2  ;;  %v258_v32 = vpop.permute.xlu1 %257  ;;  %v256_v20 = vpop.permute.xlu0 %255  ;;  %v3497_v5 = vcombine.high %v4380_v26, %v4384_v40 }
  0xc4   : > { %v3507_v46 = vcombine.high %v1138_v56, %v1142_v11  ;;  %v3506_v58 = vcombine.low %v1138_v56, %v1142_v11  ;;  %v260_v59 = vrot.slane %v258_v32, 4  ;;  %v259_v7 = vrot.slane %v256_v20, 4  ;;  %v3675_v11 = vld [vmem:[%s3891_s19 + $0xe8] sm:$0xf] }
  0xc5   : > { %894 = vrot.lane.b32.xlu1 %v4124_v34, %s3845_s21  ;;  %2398 = vst [vmem:[#allocation2 + $0x38] sm:$0xf] %v3675_v11  ;;  %v4432_v11 = vld [vmem:[%s3891_s19 + $0xc0] sm:$0xff] }
  0xc6   : > { %1579 = vmatprep.subr.bf16.mxu0 %v3507_v46  ;;  %v263_v55 = vsel %vm261_vm1, %v258_v32, %v260_v59  ;;  %v262_v33 = vsel %vm261_vm1, %v256_v20, %v259_v7  ;;  %892 = vrot.lane.b32.xlu0 %v4127_v35, %s3845_s21  ;;  %v3692_v32 = vld [vmem:[%s3891_s19 + $0xf0] sm:$0xf]  ;;  %v3693_v20 = vld [vmem:[%s3891_s19 + $0xf8] sm:$0xf]  ;;  %v4405_v59 = vld [vmem:[%s3891_s19 + $0xa8] sm:$0xff] }
  0xc7   : > { %1580 = vmatpush1.bf16.msra.mxu0 %v3506_v58  ;;  %267 = vst [vmem:[#allocation2 + $0x60] sm:$0xf] %v263_v55  ;;  %266 = vst [vmem:[#allocation2 + $0x40] sm:$0xf] %v262_v33  ;;  %v370_v13 = vpop.permute.xlu1 %369  ;;  %v368_v16 = vpop.permute.xlu0 %367 }
  0xc8   : > { %v372_v17 = vrot.slane %v370_v13, 4  ;;  %v371_v34 = vrot.slane %v368_v16, 4  ;;  %2506 = vst [vmem:[#allocation2 + $0x1c] sm:$0xf] %v3692_v32  ;;  %2507 = vst [vmem:[#allocation2 + $0x3c] sm:$0xf] %v3693_v20 }
  0xc9   : > { %1003 = vrot.lane.b32.xlu1 %v4143_v38, %s3845_s21  ;;  %v3496_v38 = vcombine.low %v4380_v26, %v4384_v40 }
  0xca   : > { %v374_v43 = vsel %vm261_vm1, %v370_v13, %v372_v17  ;;  %v373_v35 = vsel %vm261_vm1, %v368_v16, %v371_v34  ;;  %1001 = vrot.lane.b32.xlu0 %v4146_v39, %s3845_s21  ;;  %v1139_v4 = vld [vmem:[#allocation2 + $0x88] sm:$0xff]  ;;  %v3674_v39 = vld [vmem:[%s3891_s19 + $0xe0] sm:$0xf]  ;;  %v4417_v13 = vld [vmem:[%s3891_s19 + $0xb8] sm:$0xff] }
  0xcb   : > { %v1143_v27 = vld [vmem:[#allocation2 + $0xa8] sm:$0xff]  ;;  %378 = vst [vmem:[#allocation2 + $0x64] sm:$0xf] %v374_v43  ;;  %377 = vst [vmem:[#allocation2 + $0x44] sm:$0xf] %v373_v35  ;;  %v479_v29 = vpop.permute.xlu1 %478  ;;  %v477_v19 = vpop.permute.xlu0 %476  ;;  %v4420_v35 = vld [vmem:[%s3891_s19 + $0xb0] sm:$0xff] }
  0xcc   : > { %v3509_v10 = vcombine.high %v1139_v4, %v1143_v27  ;;  %v3508_v3 = vcombine.low %v1139_v4, %v1143_v27  ;;  %v481_v2 = vrot.slane %v479_v29, 4  ;;  %v480_v56 = vrot.slane %v477_v19, 4  ;;  %2397 = vst [vmem:[#allocation2 + $0x18] sm:$0xf] %v3674_v39 }
  0xcd   : > { %1112 = vrot.lane.b32.xlu1 %v4161_v48, %s3845_s21 }
  0xce   : > { %1620 = vmatprep.subr.bf16.mxu1 %v3509_v10  ;;  %v483_v46 = vsel %vm261_vm1, %v479_v29, %v481_v2  ;;  %v482_v58 = vsel %vm261_vm1, %v477_v19, %v480_v56  ;;  %1110 = vrot.lane.b32.xlu0 %v4164_v49, %s3845_s21  ;;  %v4429_v2 = vld [vmem:[%s3891_s19 + $0xc8] sm:$0xff] }
  0xcf   : > { %1621 = vmatpush1.bf16.msra.mxu1 %v3508_v3  ;;  %487 = vst [vmem:[#allocation2 + $0x68] sm:$0xf] %v483_v46  ;;  %486 = vst [vmem:[#allocation2 + $0x48] sm:$0xf] %v482_v58  ;;  %v588_v7 = vpop.permute.xlu1 %587  ;;  %v586_v8 = vpop.permute.xlu0 %585 }
  0xd0   : > { %v590_v52 = vrot.slane %v588_v7, 4  ;;  %v589_v53 = vrot.slane %v586_v8, 4 }
  0xd1   : > { %1824 = vrot.lane.b32.xlu1 %v4405_v59, %s3844_s20 }
  0xd2   : > { %v592_v55 = vsel %vm261_vm1, %v588_v7, %v590_v52  ;;  %v591_v33 = vsel %vm261_vm1, %v586_v8, %v589_v53  ;;  %1822 = vrot.lane.b32.xlu0 %v4408_v12, %s3844_s20  ;;  %v1130_v16 = vld [vmem:[#allocation2 + $0x40] sm:$0xff]  ;;  %v4444_v7 = vld [vmem:[%s3891_s19 + $0xd8] sm:$0xff] }
  0xd3   : > { %v1134_v17 = vld [vmem:[#allocation2 + $0x60] sm:$0xff]  ;;  %596 = vst [vmem:[#allocation2 + $0x6c] sm:$0xf] %v592_v55  ;;  %595 = vst [vmem:[#allocation2 + $0x4c] sm:$0xf] %v591_v33  ;;  %v350_v34 = vpop.permute.xlu1 %349  ;;  %v348_v43 = vpop.permute.xlu0 %347  ;;  %v4450_v55 = vld [vmem:[%s3891_s19 + $0xd0] sm:$0xff] }
  0xd4   : > { %v3499_v4 = vcombine.high %v1130_v16, %v1134_v17  ;;  %v3498_v27 = vcombine.low %v1130_v16, %v1134_v17  ;;  %v352_v29 = vrot.slane %v350_v34, 4  ;;  %v351_v19 = vrot.slane %v348_v43, 4 }
  0xd5   : > { %1933 = vrot.lane.b32.xlu1 %v4417_v13, %s3844_s20 }
  0xd6   : > { %1581 = vmatprep.subr.bf16.mxu0 %v3499_v4  ;;  %v354_v10 = vsel %vm278_vm2, %v350_v34, %v352_v29  ;;  %v353_v3 = vsel %vm278_vm2, %v348_v43, %v351_v19  ;;  %1931 = vrot.lane.b32.xlu0 %v4420_v35, %s3844_s20 }
  0xd7   : > { %1582 = vmatpush1.bf16.msra.mxu0 %v3498_v27  ;;  %358 = vst [vmem:[#allocation2 + $0x220] sm:$0xf] %v354_v10  ;;  %357 = vst [vmem:[#allocation2 + $0x200] sm:$0xf] %v353_v3  ;;  %v459_v56 = vpop.permute.xlu1 %458  ;;  %v457_v39 = vpop.permute.xlu0 %456 }
  0xd8   : > { %1583 = vmatprep.subr.bf16.mxu0 %v3491_v14  ;;  %v461_v32 = vrot.slane %v459_v56, 4  ;;  %v460_v20 = vrot.slane %v457_v39, 4 }
  0xd9   : > { %2042 = vrot.lane.b32.xlu1 %v4429_v2, %s3844_s20 }
  0xda   : > { %v463_v46 = vsel %vm278_vm2, %v459_v56, %v461_v32  ;;  %v462_v58 = vsel %vm278_vm2, %v457_v39, %v460_v20  ;;  %2040 = vrot.lane.b32.xlu0 %v4432_v11, %s3844_s20  ;;  %v1131_v8 = vld [vmem:[#allocation2 + $0x48] sm:$0xff] }
  0xdb   : > { %v1135_v52 = vld [vmem:[#allocation2 + $0x68] sm:$0xff]  ;;  %1584 = vmatpush1.bf16.msra.mxu0 %v3490_v15  ;;  %467 = vst [vmem:[#allocation2 + $0x224] sm:$0xf] %v463_v46  ;;  %466 = vst [vmem:[#allocation2 + $0x204] sm:$0xf] %v462_v58  ;;  %v568_v14 = vpop.permute.xlu1 %567  ;;  %v566_v53 = vpop.permute.xlu0 %565 }
  0xdc   : > { %v3501_v33 = vcombine.high %v1131_v8, %v1135_v52  ;;  %v3500_v16 = vcombine.low %v1131_v8, %v1135_v52  ;;  %v570_v17 = vrot.slane %v568_v14, 4  ;;  %v569_v34 = vrot.slane %v566_v53, 4 }
  0xdd   : > { %2151 = vrot.lane.b32.xlu1 %v4444_v7, %s3844_s20 }
  0xde   : > { %1622 = vmatprep.subr.bf16.mxu1 %v3501_v33  ;;  %v572_v43 = vsel %vm278_vm2, %v568_v14, %v570_v17  ;;  %v571_v4 = vsel %vm278_vm2, %v566_v53, %v569_v34  ;;  %2149 = vrot.lane.b32.xlu0 %v4450_v55, %s3844_s20 }
  0xdf   : > { %1623 = vmatpush1.bf16.msra.mxu1 %v3500_v16  ;;  %576 = vst [vmem:[#allocation2 + $0x228] sm:$0xf] %v572_v43  ;;  %575 = vst [vmem:[#allocation2 + $0x208] sm:$0xf] %v571_v4  ;;  %v677_v6 = vpop.permute.xlu1 %676  ;;  %v675_v9 = vpop.permute.xlu0 %674 }
  0xe0   : > { %1624 = vmatprep.subr.bf16.mxu1 %v3493_v24  ;;  %v679_v15 = vrot.slane %v677_v6, 4  ;;  %v678_v27 = vrot.slane %v675_v9, 4 }
  0xe1   : > { %1803 = vrot.lane.b32.xlu1 %v4161_v48, %s3845_s21 }
  0xe2   : > { %v681_v29 = vsel %vm278_vm2, %v677_v6, %v679_v15  ;;  %v680_v19 = vsel %vm278_vm2, %v675_v9, %v678_v27  ;;  %1801 = vrot.lane.b32.xlu0 %v4164_v49, %s3845_s21  ;;  %v1186_v10 = vld [vmem:[#allocation2 + $0x200] sm:$0xff]  ;;  %v4474_v49 = vcombine.low %v4132_v36, %v4132_v36  ;;  %v4496_v15 = vld [vmem:[%s3891_s19 + $0x98] sm:$0xff] }
  0xe3   : > { %v1190_v3 = vld [vmem:[#allocation2 + $0x220] sm:$0xff]  ;;  %1625 = vmatpush1.bf16.msra.mxu1 %v3492_v0  ;;  %685 = vst [vmem:[#allocation2 + $0x22c] sm:$0xf] %v681_v29  ;;  %684 = vst [vmem:[#allocation2 + $0x20c] sm:$0xf] %v680_v19  ;;  %v770_v24 = vpop.permute.xlu1 %769  ;;  %v768_v56 = vpop.permute.xlu0 %767  ;;  %v4499_v19 = vld [vmem:[%s3891_s19 + $0x90] sm:$0xff] }
  0xe4   : > { %v3555_v39 = vcombine.high %v1186_v10, %v1190_v3  ;;  %v3554_v32 = vcombine.low %v1186_v10, %v1190_v3  ;;  %v772_v48 = vrot.slane %v770_v24, 4  ;;  %v771_v20 = vrot.slane %v768_v56, 4 }
  0xe5   : > { %1912 = vrot.lane.b32.xlu1 %v4405_v59, %s3845_s21 }
  0xe6   : > { %1599 = vmatprep.subr.bf16.mxu0 %v3555_v39  ;;  %v774_v46 = vsel %vm261_vm1, %v770_v24, %v772_v48  ;;  %v773_v1 = vsel %vm261_vm1, %v768_v56, %v771_v20  ;;  %1910 = vrot.lane.b32.xlu0 %v4408_v12, %s3845_s21 }
  0xe7   : > { %1600 = vmatpush2.bf16.msra.mxu0 %v3554_v32  ;;  %778 = vst [vmem:[#allocation2 + $0x1f0] sm:$0xf] %v774_v46  ;;  %777 = vst [vmem:[#allocation2 + $0x1d0] sm:$0xf] %v773_v1  ;;  %v879_v23 = vpop.permute.xlu1 %878  ;;  %v877_v0 = vpop.permute.xlu0 %876 }
  0xe8   : > { %v881_v58 = vrot.slane %v879_v23, 4  ;;  %v880_v8 = vrot.slane %v877_v0, 4 }
  0xe9   : > { %2021 = vrot.lane.b32.xlu1 %v4417_v13, %s3845_s21 }
  0xea   : > { %1602 = vmatmul.mubr.bf16.vlgmr.msra.gmra.mxu0 %v4474_v49  ;;  %v883_v36 = vsel %vm261_vm1, %v879_v23, %v881_v58  ;;  %v882_v52 = vsel %vm261_vm1, %v877_v0, %v880_v8  ;;  %2019 = vrot.lane.b32.xlu0 %v4420_v35, %s3845_s21  ;;  %v1187_v14 = vld [vmem:[#allocation2 + $0x208] sm:$0xff] }
  0xeb   : > { %v1191_v53 = vld [vmem:[#allocation2 + $0x228] sm:$0xff]  ;;  %3564 = vmatprep.mubr.msk.bf16.mxu0 %vm1565_vm0, %v4136_v37  ;;  %887 = vst [vmem:[#allocation2 + $0x1f4] sm:$0xf] %v883_v36  ;;  %886 = vst [vmem:[#allocation2 + $0x1d4] sm:$0xf] %v882_v52  ;;  %v988_v33 = vpop.permute.xlu1 %987  ;;  %v986_v16 = vpop.permute.xlu0 %985 }
  0xec   : > { %v3557_v17 = vcombine.high %v1187_v14, %v1191_v53  ;;  %v3556_v34 = vcombine.low %v1187_v14, %v1191_v53  ;;  %v990_v43 = vrot.slane %v988_v33, 4  ;;  %v989_v4 = vrot.slane %v986_v16, 4 }
  0xed   : > { %2130 = vrot.lane.b32.xlu1 %v4429_v2, %s3845_s21 }
  0xee   : > { %1640 = vmatprep.subr.bf16.mxu1 %v3557_v17  ;;  %v992_v6 = vsel %vm261_vm1, %v988_v33, %v990_v43  ;;  %v991_v9 = vsel %vm261_vm1, %v986_v16, %v989_v4  ;;  %2128 = vrot.lane.b32.xlu0 %v4432_v11, %s3845_s21 }
  0xef   : > { %1641 = vmatpush2.bf16.msra.mxu1 %v3556_v34  ;;  %996 = vst [vmem:[#allocation2 + $0x1f8] sm:$0xf] %v992_v6  ;;  %995 = vst [vmem:[#allocation2 + $0x1d8] sm:$0xf] %v991_v9  ;;  %v1097_v27 = vpop.permute.xlu1 %1096  ;;  %v1095_v29 = vpop.permute.xlu0 %1094 }
  0xf0   : > { %v1099_v10 = vrot.slane %v1097_v27, 4  ;;  %v1098_v3 = vrot.slane %v1095_v29, 4 }
  0xf1   : > { %1787 = vrot.lane.b32.xlu1 %v4496_v15, %s3844_s20 }
  0xf2   : > { %1643 = vmatmul.mubr.bf16.vlgmr.msra.gmra.mxu1 %v4474_v49  ;;  %v1101_v24 = vsel %vm261_vm1, %v1097_v27, %v1099_v10  ;;  %v1100_v56 = vsel %vm261_vm1, %v1095_v29, %v1098_v3  ;;  %1785 = vrot.lane.b32.xlu0 %v4499_v19, %s3844_s20  ;;  %v1180_v39 = vld [vmem:[#allocation2 + $0x1d0] sm:$0xff]  ;;  %v3570_v3 = vld [vmem:[%s3891_s19 + $0x80] sm:$0xff] }
  0xf3   : > { %v1184_v32 = vld [vmem:[#allocation2 + $0x1f0] sm:$0xff]  ;;  %3565 = vmatprep.mubr.msk.bf16.mxu1 %vm1565_vm0, %v4136_v37  ;;  %1105 = vst [vmem:[#allocation2 + $0x1fc] sm:$0xf] %v1101_v24  ;;  %1104 = vst [vmem:[#allocation2 + $0x1dc] sm:$0xf] %v1100_v56  ;;  %v749_v48 = vpop.permute.xlu1 %748  ;;  %v747_v20 = vpop.permute.xlu0 %746 }
  0xf4   : > { %v3551_v46 = vcombine.high %v1180_v39, %v1184_v32  ;;  %v3550_v1 = vcombine.low %v1180_v39, %v1184_v32  ;;  %v751_v23 = vrot.slane %v749_v48, 4  ;;  %v750_v0 = vrot.slane %v747_v20, 4 }
  0xf5   : > { %1896 = vrot.lane.b32.xlu1 %v4405_v59, %s3844_s20 }
  0xf6   : > { %1651 = vmatprep.subr.bf16.mxu0 %v3551_v46  ;;  %v753_v58 = vsel %vm278_vm2, %v749_v48, %v751_v23  ;;  %v752_v8 = vsel %vm278_vm2, %v747_v20, %v750_v0  ;;  %1894 = vrot.lane.b32.xlu0 %v4408_v12, %s3844_s20 }
  0xf7   : > { %1652 = vmatpush1.bf16.msra.mxu0 %v3550_v1  ;;  %757 = vst [vmem:[#allocation2 + $0x170] sm:$0xf] %v753_v58  ;;  %756 = vst [vmem:[#allocation2 + $0x150] sm:$0xf] %v752_v8  ;;  %v858_v36 = vpop.permute.xlu1 %857  ;;  %v856_v52 = vpop.permute.xlu0 %855 }
  0xf8   : > { %1653 = vmatprep.subr.bf16.mxu0 %v3543_v60  ;;  %v860_v14 = vrot.slane %v858_v36, 4  ;;  %v859_v53 = vrot.slane %v856_v52, 4 }
  0xf9   : > { %2005 = vrot.lane.b32.xlu1 %v4417_v13, %s3844_s20 }
  0xfa   : > { %v862_v33 = vsel %vm278_vm2, %v858_v36, %v860_v14  ;;  %v861_v16 = vsel %vm278_vm2, %v856_v52, %v859_v53  ;;  %2003 = vrot.lane.b32.xlu0 %v4420_v35, %s3844_s20  ;;  %v1181_v17 = vld [vmem:[#allocation2 + $0x1d8] sm:$0xff] }
  0xfb   : > { %v1185_v34 = vld [vmem:[#allocation2 + $0x1f8] sm:$0xff]  ;;  %1654 = vmatpush1.bf16.msra.mxu0 %v3542_v61  ;;  %866 = vst [vmem:[#allocation2 + $0x174] sm:$0xf] %v862_v33  ;;  %865 = vst [vmem:[#allocation2 + $0x154] sm:$0xf] %v861_v16  ;;  %v967_v60 = vpop.permute.xlu1 %966  ;;  %v965_v43 = vpop.permute.xlu0 %964 }
  0xfc   : > { %v3553_v4 = vcombine.high %v1181_v17, %v1185_v34  ;;  %v3552_v6 = vcombine.low %v1181_v17, %v1185_v34  ;;  %v969_v9 = vrot.slane %v967_v60, 4  ;;  %v968_v27 = vrot.slane %v965_v43, 4 }
  0xfd   : > { %2114 = vrot.lane.b32.xlu1 %v4429_v2, %s3844_s20 }
  0xfe   : > { %1692 = vmatprep.subr.bf16.mxu1 %v3553_v4  ;;  %v971_v29 = vsel %vm278_vm2, %v967_v60, %v969_v9  ;;  %v970_v10 = vsel %vm278_vm2, %v965_v43, %v968_v27  ;;  %2112 = vrot.lane.b32.xlu0 %v4432_v11, %s3844_s20 }
  0xff   : > { %1693 = vmatpush1.bf16.msra.mxu1 %v3552_v6  ;;  %975 = vst [vmem:[#allocation2 + $0x178] sm:$0xf] %v971_v29  ;;  %974 = vst [vmem:[#allocation2 + $0x158] sm:$0xf] %v970_v10  ;;  %v1076_v57 = vpop.permute.xlu1 %1075  ;;  %v1074_v61 = vpop.permute.xlu0 %1073 }
 0x100   : > { %1694 = vmatprep.subr.bf16.mxu1 %v3545_v44  ;;  %v1078_v24 = vrot.slane %v1076_v57, 4  ;;  %v1077_v56 = vrot.slane %v1074_v61, 4 }
 0x101   : > { %1767 = vrot.lane.b32.xlu1 %v3571_v50, %s3845_s21 }
 0x102   : > { %v1080_v39 = vsel %vm278_vm2, %v1076_v57, %v1078_v24  ;;  %v1079_v32 = vsel %vm278_vm2, %v1074_v61, %v1077_v56  ;;  %1765 = vrot.lane.b32.xlu0 %v3570_v3, %s3845_s21  ;;  %v1164_v48 = vld [vmem:[#allocation2 + $0x150] sm:$0xff] }
 0x103   : > { %v1168_v20 = vld [vmem:[#allocation2 + $0x170] sm:$0xff]  ;;  %1695 = vmatpush1.bf16.msra.mxu1 %v3544_v45  ;;  %1084 = vst [vmem:[#allocation2 + $0x17c] sm:$0xf] %v1080_v39  ;;  %1083 = vst [vmem:[#allocation2 + $0x15c] sm:$0xf] %v1079_v32  ;;  %v733_v46 = vpop.permute.xlu1 %732  ;;  %v731_v44 = vpop.permute.xlu0 %730 }
 0x104   : > { %v3535_v1 = vcombine.high %v1164_v48, %v1168_v20  ;;  %v3534_v23 = vcombine.low %v1164_v48, %v1168_v20  ;;  %v735_v0 = vrot.slane %v733_v46, 4  ;;  %v734_v58 = vrot.slane %v731_v44, 4 }
 0x105   : > { %1876 = vrot.lane.b32.xlu1 %v4496_v15, %s3845_s21 }
 0x106   : > { %1655 = vmatprep.subr.bf16.mxu0 %v3535_v1  ;;  %v737_v8 = vsel %vm261_vm1, %v733_v46, %v735_v0  ;;  %v736_v36 = vsel %vm261_vm1, %v731_v44, %v734_v58  ;;  %1874 = vrot.lane.b32.xlu0 %v4499_v19, %s3845_s21 }
 0x107   : > { %1656 = vmatpush1.bf16.msra.mxu0 %v3534_v23  ;;  %741 = vst [vmem:[#allocation2 + $0x130] sm:$0xf] %v737_v8  ;;  %740 = vst [vmem:[#allocation2 + $0x110] sm:$0xf] %v736_v36  ;;  %v842_v41 = vpop.permute.xlu1 %841 }
 0x108   : > { %v844_v42 = vrot.slane %v842_v41, 4  ;;  %v840_v45 = vpop.permute.xlu0 %839 }
 0x109   : > { %v843_v52 = vrot.slane %v840_v45, 4  ;;  %1985 = vrot.lane.b32.xlu1 %v4405_v59, %s3845_s21 }
 0x10a   : > { %v846_v14 = vsel %vm261_vm1, %v842_v41, %v844_v42  ;;  %1983 = vrot.lane.b32.xlu0 %v4408_v12, %s3845_s21  ;;  %v1165_v53 = vld [vmem:[#allocation2 + $0x158] sm:$0xff] }
 0x10b   : > { %v1169_v33 = vld [vmem:[#allocation2 + $0x178] sm:$0xff]  ;;  %850 = vst [vmem:[#allocation2 + $0x134] sm:$0xf] %v846_v14  ;;  %v845_v16 = vsel %vm261_vm1, %v840_v45, %v843_v52  ;;  %v951_v17 = vpop.permute.xlu1 %950 }
 0x10c   : > { %v3537_v34 = vcombine.high %v1165_v53, %v1169_v33  ;;  %v3536_v60 = vcombine.low %v1165_v53, %v1169_v33  ;;  %849 = vst [vmem:[#allocation2 + $0x114] sm:$0xf] %v845_v16  ;;  %v953_v43 = vrot.slane %v951_v17, 4  ;;  %v949_v4 = vpop.permute.xlu0 %948 }
 0x10d   : > { %v952_v6 = vrot.slane %v949_v4, 4  ;;  %2094 = vrot.lane.b32.xlu1 %v4417_v13, %s3845_s21 }
 0x10e   : > { %1696 = vmatprep.subr.bf16.mxu1 %v3537_v34  ;;  %v955_v9 = vsel %vm261_vm1, %v951_v17, %v953_v43  ;;  %2092 = vrot.lane.b32.xlu0 %v4420_v35, %s3845_s21 }
 0x10f   : > { %1697 = vmatpush1.bf16.msra.mxu1 %v3536_v60  ;;  %959 = vst [vmem:[#allocation2 + $0x138] sm:$0xf] %v955_v9  ;;  %v954_v27 = vsel %vm261_vm1, %v949_v4, %v952_v6  ;;  %v1060_v29 = vpop.permute.xlu1 %1059 }
 0x110   : > { %958 = vst [vmem:[#allocation2 + $0x118] sm:$0xf] %v954_v27  ;;  %v1062_v10 = vrot.slane %v1060_v29, 4  ;;  %v1058_v57 = vpop.permute.xlu0 %1057 }
 0x111   : > { %v1061_v61 = vrot.slane %v1058_v57, 4  ;;  %1751 = vrot.lane.b32.xlu1 %v3571_v50, %s3844_s20 }
 0x112   : > { %v1064_v24 = vsel %vm261_vm1, %v1060_v29, %v1062_v10  ;;  %1749 = vrot.lane.b32.xlu0 %v3570_v3, %s3844_s20  ;;  %v1160_v56 = vld [vmem:[#allocation2 + $0x130] sm:$0xff] }
 0x113   : > { %1068 = vst [vmem:[#allocation2 + $0x13c] sm:$0xf] %v1064_v24  ;;  %v1063_v39 = vsel %vm261_vm1, %v1058_v57, %v1061_v61  ;;  %v713_v32 = vpop.permute.xlu1 %712  ;;  %v1156_v48 = vld [vmem:[#allocation2 + $0x110] sm:$0xff] }
 0x114   : > { %1067 = vst [vmem:[#allocation2 + $0x11c] sm:$0xf] %v1063_v39  ;;  %v715_v20 = vrot.slane %v713_v32, 4  ;;  %v711_v46 = vpop.permute.xlu0 %710  ;;  %v3527_v44 = vcombine.high %v1156_v48, %v1160_v56  ;;  %v3526_v1 = vcombine.low %v1156_v48, %v1160_v56 }
 0x115   : > { %v714_v23 = vrot.slane %v711_v46, 4  ;;  %1860 = vrot.lane.b32.xlu1 %v4496_v15, %s3844_s20 }
 0x116   : > { %v717_v50 = vsel %vm278_vm2, %v713_v32, %v715_v20  ;;  %1858 = vrot.lane.b32.xlu0 %v4499_v19, %s3844_s20  ;;  %1657 = vmatprep.subr.bf16.mxu0 %v3527_v44 }
 0x117   : > { %721 = vst [vmem:[#allocation2 + $0xb0] sm:$0xf] %v717_v50  ;;  %v716_v3 = vsel %vm278_vm2, %v711_v46, %v714_v23  ;;  %1658 = vmatpush1.bf16.msra.mxu0 %v3526_v1  ;;  %v822_v0 = vpop.permute.xlu1 %821  ;;  %v4626_v50 = vld [vmem:[%s3891_s19 + $0xe0] sm:$0xff] }
 0x118   : > { %720 = vst [vmem:[#allocation2 + $0x90] sm:$0xf] %v716_v3  ;;  %v824_v58 = vrot.slane %v822_v0, 4  ;;  %v820_v8 = vpop.permute.xlu0 %819  ;;  %1659 = vmatprep.subr.bf16.mxu0 %v3519_v31 }
 0x119   : > { %v823_v36 = vrot.slane %v820_v8, 4  ;;  %1969 = vrot.lane.b32.xlu1 %v4405_v59, %s3844_s20 }
 0x11a   : > { %v826_v15 = vsel %vm278_vm2, %v822_v0, %v824_v58  ;;  %1967 = vrot.lane.b32.xlu0 %v4408_v12, %s3844_s20  ;;  %v1161_v19 = vld [vmem:[#allocation2 + $0x138] sm:$0xff] }
 0x11b   : > { %830 = vst [vmem:[#allocation2 + $0xb4] sm:$0xf] %v826_v15  ;;  %v825_v41 = vsel %vm278_vm2, %v820_v8, %v823_v36  ;;  %v931_v42 = vpop.permute.xlu1 %930  ;;  %v1157_v45 = vld [vmem:[#allocation2 + $0x118] sm:$0xff]  ;;  %1660 = vmatpush1.bf16.msra.mxu0 %v3518_v28 }
 0x11c   : > { %829 = vst [vmem:[#allocation2 + $0x94] sm:$0xf] %v825_v41  ;;  %v933_v31 = vrot.slane %v931_v42, 4  ;;  %v929_v52 = vpop.permute.xlu0 %928  ;;  %v3529_v14 = vcombine.high %v1157_v45, %v1161_v19  ;;  %v3528_v53 = vcombine.low %v1157_v45, %v1161_v19  ;;  %v4634_v58 = vld [vmem:[%s3891_s19 + $0xf8] sm:$0xff]  ;;  %v4638_v19 = vld [vmem:[%s3891_s19 + $0xf0] sm:$0xff] }
 0x11d   : > { %v932_v33 = vrot.slane %v929_v52, 4  ;;  %2078 = vrot.lane.b32.xlu1 %v4417_v13, %s3844_s20 }
 0x11e   : > { %v935_v16 = vsel %vm278_vm2, %v931_v42, %v933_v31  ;;  %2076 = vrot.lane.b32.xlu0 %v4420_v35, %s3844_s20  ;;  %1698 = vmatprep.subr.bf16.mxu1 %v3529_v14 }
 0x11f   : > { %939 = vst [vmem:[#allocation2 + $0xb8] sm:$0xf] %v935_v16  ;;  %v934_v17 = vsel %vm278_vm2, %v929_v52, %v932_v33  ;;  %1699 = vmatpush1.bf16.msra.mxu1 %v3528_v53  ;;  %v1040_v21 = vpop.permute.xlu1 %1039  ;;  %v4646_v33 = vld [vmem:[%s3891_s19 + $0x108] sm:$0xff] }
 0x120   : > { %938 = vst [vmem:[#allocation2 + $0x98] sm:$0xf] %v934_v17  ;;  %v1042_v25 = vrot.slane %v1040_v21, 4  ;;  %v1038_v28 = vpop.permute.xlu0 %1037  ;;  %1700 = vmatprep.subr.bf16.mxu1 %v3521_v62 }
 0x121   : > { %v1041_v34 = vrot.slane %v1038_v28, 4  ;;  %1840 = vrot.lane.b32.xlu1 %v4405_v59, %s3845_s21 }
 0x122   : > { %v1044_v60 = vsel %vm278_vm2, %v1040_v21, %v1042_v25  ;;  %1838 = vrot.lane.b32.xlu0 %v4408_v12, %s3845_s21  ;;  %v1144_v43 = vld [vmem:[#allocation2 + $0xb0] sm:$0xff]  ;;  %v4650_v21 = vld [vmem:[%s3891_s19 + $0x100] sm:$0xff] }
 0x123   : > { %1048 = vst [vmem:[#allocation2 + $0xbc] sm:$0xf] %v1044_v60  ;;  %v1043_v4 = vsel %vm278_vm2, %v1038_v28, %v1041_v34  ;;  %v697_v6 = vpop.permute.xlu1 %696  ;;  %v1140_v9 = vld [vmem:[#allocation2 + $0x90] sm:$0xff]  ;;  %1701 = vmatpush1.bf16.msra.mxu1 %v3520_v63 }
 0x124   : > { %1047 = vst [vmem:[#allocation2 + $0x9c] sm:$0xf] %v1043_v4  ;;  %v699_v62 = vrot.slane %v697_v6, 4  ;;  %v695_v27 = vpop.permute.xlu0 %694  ;;  %v3511_v29 = vcombine.high %v1140_v9, %v1144_v43  ;;  %v3510_v59 = vcombine.low %v1140_v9, %v1144_v43  ;;  %v4661_v43 = vld [vmem:[%s3891_s19 + $0x118] sm:$0xff] }
 0x125   : > { %v698_v10 = vrot.slane %v695_v27, 4  ;;  %1949 = vrot.lane.b32.xlu1 %v4417_v13, %s3845_s21 }
 0x126   : > { %v701_v12 = vsel %vm261_vm1, %v697_v6, %v699_v62  ;;  %1947 = vrot.lane.b32.xlu0 %v4420_v35, %s3845_s21  ;;  %1661 = vmatprep.subr.bf16.mxu0 %v3511_v29  ;;  %v4665_v62 = vld [vmem:[%s3891_s19 + $0x110] sm:$0xff] }
 0x127   : > { %705 = vst [vmem:[#allocation2 + $0x70] sm:$0xf] %v701_v12  ;;  %v700_v57 = vsel %vm261_vm1, %v695_v27, %v698_v10  ;;  %1662 = vmatpush1.bf16.msra.mxu0 %v3510_v59  ;;  %v806_v30 = vpop.permute.xlu1 %805 }
 0x128   : > { %704 = vst [vmem:[#allocation2 + $0x50] sm:$0xf] %v700_v57  ;;  %v808_v51 = vrot.slane %v806_v30, 4  ;;  %v804_v63 = vpop.permute.xlu0 %803 }
 0x129   : > { %v807_v61 = vrot.slane %v804_v63, 4  ;;  %2058 = vrot.lane.b32.xlu1 %v4429_v2, %s3845_s21 }
 0x12a   : > { %v810_v13 = vsel %vm261_vm1, %v806_v30, %v808_v51  ;;  %2056 = vrot.lane.b32.xlu0 %v4432_v11, %s3845_s21  ;;  %v1145_v35 = vld [vmem:[#allocation2 + $0xb8] sm:$0xff]  ;;  %v4622_v11 = vld [vmem:[%s3891_s19 + $0xe8] sm:$0xff] }
 0x12b   : > { %814 = vst [vmem:[#allocation2 + $0x74] sm:$0xf] %v810_v13  ;;  %v809_v24 = vsel %vm261_vm1, %v804_v63, %v807_v61  ;;  %v915_v56 = vpop.permute.xlu1 %914  ;;  %v1141_v39 = vld [vmem:[#allocation2 + $0x98] sm:$0xff] }
 0x12c   : > { %813 = vst [vmem:[#allocation2 + $0x54] sm:$0xf] %v809_v24  ;;  %v917_v32 = vrot.slane %v915_v56, 4  ;;  %v913_v48 = vpop.permute.xlu0 %912  ;;  %v3513_v20 = vcombine.high %v1141_v39, %v1145_v35  ;;  %v3512_v46 = vcombine.low %v1141_v39, %v1145_v35  ;;  %v4676_v30 = vld [vmem:[%s3891_s19 + $0xd8] sm:$0xff] }
 0x12d   : > { %v916_v44 = vrot.slane %v913_v48, 4  ;;  %2167 = vrot.lane.b32.xlu1 %v4444_v7, %s3845_s21 }
 0x12e   : > { %v919_v2 = vsel %vm261_vm1, %v915_v56, %v917_v32  ;;  %2165 = vrot.lane.b32.xlu0 %v4450_v55, %s3845_s21  ;;  %1702 = vmatprep.subr.bf16.mxu1 %v3513_v20 }
 0x12f   : > { %923 = vst [vmem:[#allocation2 + $0x78] sm:$0xf] %v919_v2  ;;  %v918_v1 = vsel %vm261_vm1, %v913_v48, %v916_v44  ;;  %1703 = vmatpush1.bf16.msra.mxu1 %v3512_v46  ;;  %v1024_v23 = vpop.permute.xlu1 %1023 }
 0x130   : > { %922 = vst [vmem:[#allocation2 + $0x58] sm:$0xf] %v918_v1  ;;  %v1026_v3 = vrot.slane %v1024_v23, 4  ;;  %v1022_v7 = vpop.permute.xlu0 %1021 }
 0x131   : > { %v1025_v0 = vrot.slane %v1022_v7, 4  ;;  %2260 = vrot.lane.b32.xlu1 %v4622_v11, %s3844_s20 }
 0x132   : > { %v1028_v55 = vsel %vm261_vm1, %v1024_v23, %v1026_v3  ;;  %2258 = vrot.lane.b32.xlu0 %v4626_v50, %s3844_s20  ;;  %v1136_v8 = vld [vmem:[#allocation2 + $0x70] sm:$0xff] }
 0x133   : > { %1032 = vst [vmem:[#allocation2 + $0x7c] sm:$0xf] %v1028_v55  ;;  %v1027_v36 = vsel %vm261_vm1, %v1022_v7, %v1025_v0  ;;  %v786_v15 = vpop.permute.xlu1 %785  ;;  %v1132_v41 = vld [vmem:[#allocation2 + $0x50] sm:$0xff] }
 0x134   : > { %1031 = vst [vmem:[#allocation2 + $0x5c] sm:$0xf] %v1027_v36  ;;  %v788_v42 = vrot.slane %v786_v15, 4  ;;  %v784_v45 = vpop.permute.xlu0 %783  ;;  %v3503_v31 = vcombine.high %v1132_v41, %v1136_v8  ;;  %v3502_v52 = vcombine.low %v1132_v41, %v1136_v8 }
 0x135   : > { %v787_v14 = vrot.slane %v784_v45, 4  ;;  %2369 = vrot.lane.b32.xlu1 %v4634_v58, %s3844_s20 }
 0x136   : > { %v790_v53 = vsel %vm278_vm2, %v786_v15, %v788_v42  ;;  %2367 = vrot.lane.b32.xlu0 %v4638_v19, %s3844_s20  ;;  %1663 = vmatprep.subr.bf16.mxu0 %v3503_v31 }
 0x137   : > { %794 = vst [vmem:[#allocation2 + $0x230] sm:$0xf] %v790_v53  ;;  %v789_v16 = vsel %vm278_vm2, %v784_v45, %v787_v14  ;;  %1664 = vmatpush1.bf16.msra.mxu0 %v3502_v52  ;;  %v895_v17 = vpop.permute.xlu1 %894 }
 0x138   : > { %793 = vst [vmem:[#allocation2 + $0x210] sm:$0xf] %v789_v16  ;;  %v897_v25 = vrot.slane %v895_v17, 4  ;;  %v893_v28 = vpop.permute.xlu0 %892  ;;  %1665 = vmatprep.subr.bf16.mxu0 %v3495_v22 }
 0x139   : > { %v896_v34 = vrot.slane %v893_v28, 4  ;;  %2478 = vrot.lane.b32.xlu1 %v4646_v33, %s3844_s20 }
 0x13a   : > { %v899_v60 = vsel %vm278_vm2, %v895_v17, %v897_v25  ;;  %2476 = vrot.lane.b32.xlu0 %v4650_v21, %s3844_s20  ;;  %v1137_v4 = vld [vmem:[#allocation2 + $0x78] sm:$0xff]  ;;  %v2661_v17 = vld [vmem:[#allocation2 + $0x180] sm:$0xff] }
 0x13b   : > { %903 = vst [vmem:[#allocation2 + $0x234] sm:$0xf] %v899_v60  ;;  %v898_v6 = vsel %vm278_vm2, %v893_v28, %v896_v34  ;;  %v1004_v9 = vpop.permute.xlu1 %1003  ;;  %v1133_v22 = vld [vmem:[#allocation2 + $0x58] sm:$0xff]  ;;  %1666 = vmatpush1.bf16.msra.mxu0 %v3494_v54  ;;  %v4680_v54 = vld [vmem:[%s3891_s19 + $0xd0] sm:$0xff]  ;;  %v2665_v25 = vld [vmem:[#allocation2 + $0x1a0] sm:$0xff] }
 0x13c   : > { %902 = vst [vmem:[#allocation2 + $0x214] sm:$0xf] %v898_v6  ;;  %v1006_v27 = vrot.slane %v1004_v9, 4  ;;  %v1002_v29 = vpop.permute.xlu0 %1001  ;;  %v3505_v59 = vcombine.high %v1133_v22, %v1137_v4  ;;  %v3504_v10 = vcombine.low %v1133_v22, %v1137_v4 }
 0x13d   : > { %v1005_v12 = vrot.slane %v1002_v29, 4  ;;  %2587 = vrot.lane.b32.xlu1 %v4661_v43, %s3844_s20 }
 0x13e   : > { %v1008_v57 = vsel %vm278_vm2, %v1004_v9, %v1006_v27  ;;  %2585 = vrot.lane.b32.xlu0 %v4665_v62, %s3844_s20  ;;  %1704 = vmatprep.subr.bf16.mxu1 %v3505_v59  ;;  %v3759_v59 = vcombine.high %v2661_v17, %v2665_v25 }
 0x13f   : > { %1012 = vst [vmem:[#allocation2 + $0x238] sm:$0xf] %v1008_v57  ;;  %v1007_v47 = vsel %vm278_vm2, %v1002_v29, %v1005_v12  ;;  %1705 = vmatpush1.bf16.msra.mxu1 %v3504_v10  ;;  %v1113_v18 = vpop.permute.xlu1 %1112 }
 0x140   : > { %1011 = vst [vmem:[#allocation2 + $0x218] sm:$0xf] %v1007_v47  ;;  %v1115_v51 = vrot.slane %v1113_v18, 4  ;;  %v1111_v63 = vpop.permute.xlu0 %1110  ;;  %1706 = vmatprep.subr.bf16.mxu1 %v3497_v5 }
 0x141   : > { %v1114_v61 = vrot.slane %v1111_v63, 4  ;;  %2239 = vrot.lane.b32.xlu1 %v4676_v30, %s3845_s21 }
 0x142   : > { %v1117_v13 = vsel %vm278_vm2, %v1113_v18, %v1115_v51  ;;  %2237 = vrot.lane.b32.xlu0 %v4680_v54, %s3845_s21  ;;  %v1192_v35 = vld [vmem:[#allocation2 + $0x230] sm:$0xff]  ;;  %v3758_v18 = vcombine.low %v2661_v17, %v2665_v25 }
 0x143   : > { %1121 = vst [vmem:[#allocation2 + $0x23c] sm:$0xf] %v1117_v13  ;;  %v1116_v24 = vsel %vm278_vm2, %v1111_v63, %v1114_v61  ;;  %v1825_v56 = vpop.permute.xlu1 %1824  ;;  %v1188_v39 = vld [vmem:[#allocation2 + $0x210] sm:$0xff]  ;;  %1707 = vmatpush1.bf16.msra.mxu1 %v3496_v38  ;;  %v2662_v13 = vld [vmem:[#allocation2 + $0x188] sm:$0xff] }
 0x144   : > { %1120 = vst [vmem:[#allocation2 + $0x21c] sm:$0xf] %v1116_v24  ;;  %v1827_v5 = vrot.slane %v1825_v56, 4  ;;  %v1823_v32 = vpop.permute.xlu0 %1822  ;;  %v3559_v48 = vcombine.high %v1188_v39, %v1192_v35  ;;  %v3558_v20 = vcombine.low %v1188_v39, %v1192_v35  ;;  %v2666_v35 = vld [vmem:[#allocation2 + $0x1a8] sm:$0xff] }
 0x145   : > { %v1826_v46 = vrot.slane %v1823_v32, 4  ;;  %2348 = vrot.lane.b32.xlu1 %v4622_v11, %s3845_s21 }
 0x146   : > { %v1829_v44 = vsel %vm261_vm1, %v1825_v56, %v1827_v5  ;;  %2346 = vrot.lane.b32.xlu0 %v4626_v50, %s3845_s21  ;;  %1681 = vmatprep.subr.bf16.mxu0 %v3559_v48 }
 0x147   : > { %1833 = vst [vmem:[#allocation2 + $0x1e0] sm:$0xf] %v1829_v44  ;;  %v1828_v2 = vsel %vm261_vm1, %v1823_v32, %v1826_v46  ;;  %1682 = vmatpush2.bf16.msra.mxu0 %v3558_v20  ;;  %v1934_v26 = vpop.permute.xlu1 %1933 }
 0x148   : > { %1832 = vst [vmem:[#allocation2 + $0x1c0] sm:$0xf] %v1828_v2  ;;  %v1936_v40 = vrot.slane %v1934_v26, 4  ;;  %v1932_v38 = vpop.permute.xlu0 %1931  ;;  %v3761_v2 = vcombine.high %v2662_v13, %v2666_v35 }
 0x149   : > { %v1935_v1 = vrot.slane %v1932_v38, 4  ;;  %2457 = vrot.lane.b32.xlu1 %v4634_v58, %s3845_s21 }
 0x14a   : > { %v1938_v23 = vsel %vm261_vm1, %v1934_v26, %v1936_v40  ;;  %2455 = vrot.lane.b32.xlu0 %v4638_v19, %s3845_s21  ;;  %v1193_v3 = vld [vmem:[#allocation2 + $0x238] sm:$0xff]  ;;  %1684 = vmatmul.mubr.bf16.vlgmr.msra.gmra.mxu0 %v4474_v49 }
 0x14b   : > { %1942 = vst [vmem:[#allocation2 + $0x1e4] sm:$0xf] %v1938_v23  ;;  %v1937_v7 = vsel %vm261_vm1, %v1932_v38, %v1935_v1  ;;  %v2043_v0 = vpop.permute.xlu1 %2042  ;;  %v1189_v55 = vld [vmem:[#allocation2 + $0x218] sm:$0xff]  ;;  %3782 = vmatprep.mubr.msk.bf16.mxu0 %vm1565_vm0, %v4136_v37  ;;  %v4742_v38 = vld [vmem:[%s3891_s19 + $0xc8] sm:$0xff] }
 0x14c   : > { %1941 = vst [vmem:[#allocation2 + $0x1c4] sm:$0xf] %v1937_v7  ;;  %v2045_v8 = vrot.slane %v2043_v0, 4  ;;  %v2041_v36 = vpop.permute.xlu0 %2040  ;;  %v3561_v15 = vcombine.high %v1189_v55, %v1193_v3  ;;  %v3560_v41 = vcombine.low %v1189_v55, %v1193_v3  ;;  %v4746_v3 = vld [vmem:[%s3891_s19 + $0xc0] sm:$0xff]  ;;  %v3760_v7 = vcombine.low %v2662_v13, %v2666_v35 }
 0x14d   : > { %v2044_v42 = vrot.slane %v2041_v36, 4  ;;  %2566 = vrot.lane.b32.xlu1 %v4646_v33, %s3845_s21 }
 0x14e   : > { %v2047_v45 = vsel %vm261_vm1, %v2043_v0, %v2045_v8  ;;  %2564 = vrot.lane.b32.xlu0 %v4650_v21, %s3845_s21  ;;  %1722 = vmatprep.subr.bf16.mxu1 %v3561_v15 }
 0x14f   : > { %2051 = vst [vmem:[#allocation2 + $0x1e8] sm:$0xf] %v2047_v45  ;;  %v2046_v31 = vsel %vm261_vm1, %v2041_v36, %v2044_v42  ;;  %1723 = vmatpush2.bf16.msra.mxu1 %v3560_v41  ;;  %v2152_v52 = vpop.permute.xlu1 %2151 }
 0x150   : > { %2050 = vst [vmem:[#allocation2 + $0x1c8] sm:$0xf] %v2046_v31  ;;  %v2154_v14 = vrot.slane %v2152_v52, 4  ;;  %v2150_v53 = vpop.permute.xlu0 %2149 }
 0x151   : > { %v2153_v16 = vrot.slane %v2150_v53, 4  ;;  %2223 = vrot.lane.b32.xlu1 %v4676_v30, %s3844_s20 }
 0x152   : > { %v2156_v28 = vsel %vm261_vm1, %v2152_v52, %v2154_v14  ;;  %2221 = vrot.lane.b32.xlu0 %v4680_v54, %s3844_s20  ;;  %v2673_v34 = vld [vmem:[#allocation2 + $0x1e0] sm:$0xff]  ;;  %1725 = vmatmul.mubr.bf16.vlgmr.msra.gmra.mxu1 %v4474_v49 }
 0x153   : > { %2160 = vst [vmem:[#allocation2 + $0x1ec] sm:$0xf] %v2156_v28  ;;  %v2155_v60 = vsel %vm261_vm1, %v2150_v53, %v2153_v16  ;;  %v1804_v4 = vpop.permute.xlu1 %1803  ;;  %v2669_v6 = vld [vmem:[#allocation2 + $0x1c0] sm:$0xff]  ;;  %3783 = vmatprep.mubr.msk.bf16.mxu1 %vm1565_vm0, %v4136_v37 }
 0x154   : > { %2159 = vst [vmem:[#allocation2 + $0x1cc] sm:$0xf] %v2155_v60  ;;  %v1806_v9 = vrot.slane %v1804_v4, 4  ;;  %v1802_v22 = vpop.permute.xlu0 %1801  ;;  %v3766_v27 = vcombine.low %v2669_v6, %v2673_v34  ;;  %v3767_v29 = vcombine.high %v2669_v6, %v2673_v34 }
 0x155   : > { %v1805_v10 = vrot.slane %v1802_v22, 4  ;;  %2332 = vrot.lane.b32.xlu1 %v4622_v11, %s3844_s20 }
 0x156   : > { %v1808_v12 = vsel %vm278_vm2, %v1804_v4, %v1806_v9  ;;  %2330 = vrot.lane.b32.xlu0 %v4626_v50, %s3844_s20  ;;  %3045 = vmatprep.subr.bf16.mxu0 %v3767_v29 }
 0x157   : > { %1812 = vst [vmem:[#allocation2 + $0x160] sm:$0xf] %v1808_v12  ;;  %v1807_v57 = vsel %vm278_vm2, %v1802_v22, %v1805_v10  ;;  %3046 = vmatpush1.bf16.msra.mxu0 %v3766_v27  ;;  %v1913_v47 = vpop.permute.xlu1 %1912 }
 0x158   : > { %1811 = vst [vmem:[#allocation2 + $0x140] sm:$0xf] %v1807_v57  ;;  %v1915_v51 = vrot.slane %v1913_v47, 4  ;;  %v1911_v63 = vpop.permute.xlu0 %1910  ;;  %3047 = vmatprep.subr.bf16.mxu0 %v3759_v59  ;;  %v3846_v59 = vmov 0  }
 0x159   : > { %v1914_v61 = vrot.slane %v1911_v63, 4  ;;  %2441 = vrot.lane.b32.xlu1 %v4634_v58, %s3844_s20  ;;  %3817 = vset.pattern.permute.xlu0 %v3846_v59 }
 0x15a   : > { %v1917_v24 = vsel %vm278_vm2, %v1913_v47, %v1915_v51  ;;  %2439 = vrot.lane.b32.xlu0 %v4638_v19, %s3844_s20  ;;  %v2674_v56 = vld [vmem:[#allocation2 + $0x1e8] sm:$0xff] }
 0x15b   : > { %1921 = vst [vmem:[#allocation2 + $0x164] sm:$0xf] %v1917_v24  ;;  %v1916_v39 = vsel %vm278_vm2, %v1911_v63, %v1914_v61  ;;  %v2022_v5 = vpop.permute.xlu1 %2021  ;;  %v2670_v32 = vld [vmem:[#allocation2 + $0x1c8] sm:$0xff]  ;;  %3048 = vmatpush1.bf16.msra.mxu0 %v3758_v18 }
 0x15c   : > { %1920 = vst [vmem:[#allocation2 + $0x144] sm:$0xf] %v1916_v39  ;;  %v2024_v48 = vrot.slane %v2022_v5, 4  ;;  %v2020_v20 = vpop.permute.xlu0 %2019  ;;  %v3768_v46 = vcombine.low %v2670_v32, %v2674_v56  ;;  %v3769_v44 = vcombine.high %v2670_v32, %v2674_v56  ;;  %v2637_v56 = vld [vmem:[#allocation2 + $0xc0] sm:$0xff] }
 0x15d   : > { %v2023_v26 = vrot.slane %v2020_v20, 4  ;;  %2550 = vrot.lane.b32.xlu1 %v4646_v33, %s3844_s20  ;;  %v2641_v39 = vld [vmem:[#allocation2 + $0xe0] sm:$0xff] }
 0x15e   : > { %v2026_v40 = vsel %vm278_vm2, %v2022_v5, %v2024_v48  ;;  %2548 = vrot.lane.b32.xlu0 %v4650_v21, %s3844_s20  ;;  %3086 = vmatprep.subr.bf16.mxu1 %v3769_v44 }
 0x15f   : > { %2030 = vst [vmem:[#allocation2 + $0x168] sm:$0xf] %v2026_v40  ;;  %v2025_v1 = vsel %vm278_vm2, %v2020_v20, %v2023_v26  ;;  %3087 = vmatpush1.bf16.msra.mxu1 %v3768_v46  ;;  %v2131_v23 = vpop.permute.xlu1 %2130 }
 0x160   : > { %2029 = vst [vmem:[#allocation2 + $0x148] sm:$0xf] %v2025_v1  ;;  %v2133_v0 = vrot.slane %v2131_v23, 4  ;;  %v2129_v55 = vpop.permute.xlu0 %2128  ;;  %3088 = vmatprep.subr.bf16.mxu1 %v3761_v2  ;;  %v3735_v1 = vcombine.high %v2637_v56, %v2641_v39 }
 0x161   : > { %v2132_v8 = vrot.slane %v2129_v55, 4  ;;  %2203 = vrot.lane.b32.xlu1 %v4742_v38, %s3845_s21 }
 0x162   : > { %v2135_v36 = vsel %vm278_vm2, %v2131_v23, %v2133_v0  ;;  %2201 = vrot.lane.b32.xlu0 %v4746_v3, %s3845_s21  ;;  %v2657_v15 = vld [vmem:[#allocation2 + $0x160] sm:$0xff]  ;;  %v3734_v0 = vcombine.low %v2637_v56, %v2641_v39 }
 0x163   : > { %2139 = vst [vmem:[#allocation2 + $0x16c] sm:$0xf] %v2135_v36  ;;  %v2134_v41 = vsel %vm278_vm2, %v2129_v55, %v2132_v8  ;;  %v1788_v42 = vpop.permute.xlu1 %1787  ;;  %v2653_v45 = vld [vmem:[#allocation2 + $0x140] sm:$0xff]  ;;  %3089 = vmatpush1.bf16.msra.mxu1 %v3760_v7 }
 0x164   : > { %2138 = vst [vmem:[#allocation2 + $0x14c] sm:$0xf] %v2134_v41  ;;  %v1790_v31 = vrot.slane %v1788_v42, 4  ;;  %v1786_v52 = vpop.permute.xlu0 %1785  ;;  %v3750_v14 = vcombine.low %v2653_v45, %v2657_v15  ;;  %v3751_v53 = vcombine.high %v2653_v45, %v2657_v15  ;;  %v2642_v15 = vld [vmem:[#allocation2 + $0xe8] sm:$0xff] }
 0x165   : > { %v1789_v16 = vrot.slane %v1786_v52, 4  ;;  %2312 = vrot.lane.b32.xlu1 %v4676_v30, %s3845_s21 }
 0x166   : > { %v1792_v17 = vsel %vm261_vm1, %v1788_v42, %v1790_v31  ;;  %2310 = vrot.lane.b32.xlu0 %v4680_v54, %s3845_s21  ;;  %3049 = vmatprep.subr.bf16.mxu0 %v3751_v53 }
 0x167   : > { %1796 = vst [vmem:[#allocation2 + $0x120] sm:$0xf] %v1792_v17  ;;  %v1791_v25 = vsel %vm261_vm1, %v1786_v52, %v1789_v16  ;;  %3050 = vmatpush1.bf16.msra.mxu0 %v3750_v14  ;;  %v1897_v28 = vpop.permute.xlu1 %1896 }
 0x168   : > { %1795 = vst [vmem:[#allocation2 + $0x100] sm:$0xf] %v1791_v25  ;;  %v1899_v34 = vrot.slane %v1897_v28, 4  ;;  %v1895_v60 = vpop.permute.xlu0 %1894 }
 0x169   : > { %v1898_v4 = vrot.slane %v1895_v60, 4  ;;  %2421 = vrot.lane.b32.xlu1 %v4622_v11, %s3845_s21 }
 0x16a   : > { %v1901_v6 = vsel %vm261_vm1, %v1897_v28, %v1899_v34  ;;  %2419 = vrot.lane.b32.xlu0 %v4626_v50, %s3845_s21  ;;  %v2658_v9 = vld [vmem:[#allocation2 + $0x168] sm:$0xff] }
 0x16b   : > { %1905 = vst [vmem:[#allocation2 + $0x124] sm:$0xf] %v1901_v6  ;;  %v1900_v22 = vsel %vm261_vm1, %v1895_v60, %v1898_v4  ;;  %v2006_v27 = vpop.permute.xlu1 %2005  ;;  %v2654_v29 = vld [vmem:[#allocation2 + $0x148] sm:$0xff] }
 0x16c   : > { %1904 = vst [vmem:[#allocation2 + $0x104] sm:$0xf] %v1900_v22  ;;  %v2008_v10 = vrot.slane %v2006_v27, 4  ;;  %v2004_v12 = vpop.permute.xlu0 %2003  ;;  %v3752_v57 = vcombine.low %v2654_v29, %v2658_v9  ;;  %v3753_v47 = vcombine.high %v2654_v29, %v2658_v9 }
 0x16d   : > { %v2007_v18 = vrot.slane %v2004_v12, 4  ;;  %2530 = vrot.lane.b32.xlu1 %v4634_v58, %s3845_s21 }
 0x16e   : > { %v2010_v51 = vsel %vm261_vm1, %v2006_v27, %v2008_v10  ;;  %2528 = vrot.lane.b32.xlu0 %v4638_v19, %s3845_s21  ;;  %3090 = vmatprep.subr.bf16.mxu1 %v3753_v47 }
 0x16f   : > { %2014 = vst [vmem:[#allocation2 + $0x128] sm:$0xf] %v2010_v51  ;;  %v2009_v63 = vsel %vm261_vm1, %v2004_v12, %v2007_v18  ;;  %3091 = vmatpush1.bf16.msra.mxu1 %v3752_v57  ;;  %v2115_v61 = vpop.permute.xlu1 %2114 }
 0x170   : > { %2013 = vst [vmem:[#allocation2 + $0x108] sm:$0xf] %v2009_v63  ;;  %v2117_v13 = vrot.slane %v2115_v61, 4  ;;  %v2113_v35 = vpop.permute.xlu0 %2112 }
 0x171   : > { %v2116_v24 = vrot.slane %v2113_v35, 4  ;;  %2187 = vrot.lane.b32.xlu1 %v4742_v38, %s3844_s20 }
 0x172   : > { %v2119_v5 = vsel %vm261_vm1, %v2115_v61, %v2117_v13  ;;  %2185 = vrot.lane.b32.xlu0 %v4746_v3, %s3844_s20  ;;  %v2649_v32 = vld [vmem:[#allocation2 + $0x120] sm:$0xff] }
 0x173   : > { %2123 = vst [vmem:[#allocation2 + $0x12c] sm:$0xf] %v2119_v5  ;;  %v2118_v48 = vsel %vm261_vm1, %v2113_v35, %v2116_v24  ;;  %v1768_v20 = vpop.permute.xlu1 %1767  ;;  %v2645_v46 = vld [vmem:[#allocation2 + $0x100] sm:$0xff] }
 0x174   : > { %2122 = vst [vmem:[#allocation2 + $0x10c] sm:$0xf] %v2118_v48  ;;  %v1770_v44 = vrot.slane %v1768_v20, 4  ;;  %v1766_v2 = vpop.permute.xlu0 %1765  ;;  %v3742_v26 = vcombine.low %v2645_v46, %v2649_v32  ;;  %v3743_v40 = vcombine.high %v2645_v46, %v2649_v32 }
 0x175   : > { %v1769_v38 = vrot.slane %v1766_v2, 4  ;;  %2296 = vrot.lane.b32.xlu1 %v4676_v30, %s3844_s20  ;;  %v2638_v30 = vld [vmem:[#allocation2 + $0xc8] sm:$0xff] }
 0x176   : > { %v1772_v23 = vsel %vm278_vm2, %v1768_v20, %v1770_v44  ;;  %2294 = vrot.lane.b32.xlu0 %v4680_v54, %s3844_s20  ;;  %3051 = vmatprep.subr.bf16.mxu0 %v3743_v40  ;;  %v3737_v17 = vcombine.high %v2638_v30, %v2642_v15  ;;  %v3736_v4 = vcombine.low %v2638_v30, %v2642_v15 }
 0x177   : > { %1776 = vst [vmem:[#allocation2 + $0xa0] sm:$0xf] %v1772_v23  ;;  %v1771_v3 = vsel %vm278_vm2, %v1766_v2, %v1769_v38  ;;  %3052 = vmatpush1.bf16.msra.mxu0 %v3742_v26  ;;  %v1877_v7 = vpop.permute.xlu1 %1876  ;;  %v246_v26 = vld [vmem:[%s4934_s2] sm:$0xff] }
 0x178   : > { %1775 = vst [vmem:[#allocation2 + $0x80] sm:$0xf] %v1771_v3  ;;  %v1879_v55 = vrot.slane %v1877_v7, 4  ;;  %v1875_v8 = vpop.permute.xlu0 %1874  ;;  %3053 = vmatprep.subr.bf16.mxu0 %v3735_v1  ;;  %v2617_v23 = vld [vmem:[#allocation2 + $0x20] sm:$0xff] }
 0x179   : > { %v1878_v36 = vrot.slane %v1875_v8, 4  ;;  %2405 = vrot.lane.b32.xlu1 %v4622_v11, %s3844_s20 }
 0x17a   : > { %v1881_v41 = vsel %vm278_vm2, %v1877_v7, %v1879_v55  ;;  %2403 = vrot.lane.b32.xlu0 %v4626_v50, %s3844_s20  ;;  %v2650_v54 = vld [vmem:[#allocation2 + $0x128] sm:$0xff] }
 0x17b   : > { %1885 = vst [vmem:[#allocation2 + $0xa4] sm:$0xf] %v1881_v41  ;;  %v1880_v42 = vsel %vm278_vm2, %v1875_v8, %v1878_v36  ;;  %v1986_v45 = vpop.permute.xlu1 %1985  ;;  %v2646_v31 = vld [vmem:[#allocation2 + $0x108] sm:$0xff]  ;;  %3054 = vmatpush1.bf16.msra.mxu0 %v3734_v0 }
 0x17c   : > { %1884 = vst [vmem:[#allocation2 + $0x84] sm:$0xf] %v1880_v42  ;;  %v1988_v52 = vrot.slane %v1986_v45, 4  ;;  %v1984_v14 = vpop.permute.xlu0 %1983  ;;  %v3744_v53 = vcombine.low %v2646_v31, %v2650_v54  ;;  %v3745_v16 = vcombine.high %v2646_v31, %v2650_v54 }
 0x17d   : > { %v1987_v25 = vrot.slane %v1984_v14, 4  ;;  %2514 = vrot.lane.b32.xlu1 %v4634_v58, %s3844_s20 }
 0x17e   : > { %v1990_v28 = vsel %vm278_vm2, %v1986_v45, %v1988_v52  ;;  %2512 = vrot.lane.b32.xlu0 %v4638_v19, %s3844_s20  ;;  %3092 = vmatprep.subr.bf16.mxu1 %v3745_v16 }
 0x17f   : > { %1994 = vst [vmem:[#allocation2 + $0xa8] sm:$0xf] %v1990_v28  ;;  %v1989_v34 = vsel %vm278_vm2, %v1984_v14, %v1987_v25  ;;  %3093 = vmatpush1.bf16.msra.mxu1 %v3744_v53  ;;  %v2095_v60 = vpop.permute.xlu1 %2094  ;;  %v2618_v25 = vld [vmem:[#allocation2 + $0x28] sm:$0xff] }
 0x180   : > { %1993 = vst [vmem:[#allocation2 + $0x88] sm:$0xf] %v1989_v34  ;;  %v2097_v6 = vrot.slane %v2095_v60, 4  ;;  %v2093_v9 = vpop.permute.xlu0 %2092  ;;  %3094 = vmatprep.subr.bf16.mxu1 %v3737_v17  ;;  %v2614_v17 = vld [vmem:[#allocation2 + $0x8] sm:$0xff] }
 0x181   : > { %v2096_v22 = vrot.slane %v2093_v9, 4  ;;  %2276 = vrot.lane.b32.xlu1 %v4622_v11, %s3845_s21 }
 0x182   : > { %v2099_v27 = vsel %vm278_vm2, %v2095_v60, %v2097_v6  ;;  %2274 = vrot.lane.b32.xlu0 %v4626_v50, %s3845_s21  ;;  %v2633_v29 = vld [vmem:[#allocation2 + $0xa0] sm:$0xff] }
 0x183   : > { %2103 = vst [vmem:[#allocation2 + $0xac] sm:$0xf] %v2099_v27  ;;  %v2098_v59 = vsel %vm278_vm2, %v2093_v9, %v2096_v22  ;;  %v1752_v10 = vpop.permute.xlu1 %1751  ;;  %v2629_v12 = vld [vmem:[#allocation2 + $0x80] sm:$0xff]  ;;  %3095 = vmatpush1.bf16.msra.mxu1 %v3736_v4 }
 0x184   : > { %2102 = vst [vmem:[#allocation2 + $0x8c] sm:$0xf] %v2098_v59  ;;  %v1754_v57 = vrot.slane %v1752_v10, 4  ;;  %v1750_v47 = vpop.permute.xlu0 %1749  ;;  %v3726_v18 = vcombine.low %v2629_v12, %v2633_v29  ;;  %v3727_v51 = vcombine.high %v2629_v12, %v2633_v29  ;;  %v3713_v59 = vcombine.high %v2614_v17, %v2618_v25 }
 0x185   : > { %v1753_v63 = vrot.slane %v1750_v47, 4  ;;  %2385 = vrot.lane.b32.xlu1 %v4634_v58, %s3845_s21 }
 0x186   : > { %v1756_v11 = vsel %vm261_vm1, %v1752_v10, %v1754_v57  ;;  %2383 = vrot.lane.b32.xlu0 %v4638_v19, %s3845_s21  ;;  %3055 = vmatprep.subr.bf16.mxu0 %v3727_v51 }
 0x187   : > { %1760 = vst [vmem:[#allocation2 + $0x60] sm:$0xf] %v1756_v11  ;;  %v1755_v50 = vsel %vm261_vm1, %v1750_v47, %v1753_v63  ;;  %3056 = vmatpush1.bf16.msra.mxu0 %v3726_v18  ;;  %v1861_v61 = vpop.permute.xlu1 %1860  ;;  %v3712_v18 = vcombine.low %v2614_v17, %v2618_v25 }
 0x188   : > { %1759 = vst [vmem:[#allocation2 + $0x40] sm:$0xf] %v1755_v50  ;;  %v1863_v13 = vrot.slane %v1861_v61, 4  ;;  %v1859_v35 = vpop.permute.xlu0 %1858 }
 0x189   : > { %v1862_v24 = vrot.slane %v1859_v35, 4  ;;  %2494 = vrot.lane.b32.xlu1 %v4646_v33, %s3845_s21 }
 0x18a   : > { %v1865_v58 = vsel %vm261_vm1, %v1861_v61, %v1863_v13  ;;  %2492 = vrot.lane.b32.xlu0 %v4650_v21, %s3845_s21  ;;  %v2634_v56 = vld [vmem:[#allocation2 + $0xa8] sm:$0xff] }
 0x18b   : > { %1869 = vst [vmem:[#allocation2 + $0x64] sm:$0xf] %v1865_v58  ;;  %v1864_v19 = vsel %vm261_vm1, %v1859_v35, %v1862_v24  ;;  %v1970_v39 = vpop.permute.xlu1 %1969  ;;  %v2630_v5 = vld [vmem:[#allocation2 + $0x88] sm:$0xff] }
 0x18c   : > { %1868 = vst [vmem:[#allocation2 + $0x44] sm:$0xf] %v1864_v19  ;;  %v1972_v32 = vrot.slane %v1970_v39, 4  ;;  %v1968_v48 = vpop.permute.xlu0 %1967  ;;  %v3728_v20 = vcombine.low %v2630_v5, %v2634_v56  ;;  %v3729_v46 = vcombine.high %v2630_v5, %v2634_v56 }
 0x18d   : > { %v1971_v44 = vrot.slane %v1968_v48, 4  ;;  %2603 = vrot.lane.b32.xlu1 %v4661_v43, %s3845_s21  ;;  %v2613_v43 = vld [vmem:[#allocation2] sm:$0xff] }
 0x18e   : > { %v1974_v33 = vsel %vm261_vm1, %v1970_v39, %v1972_v32  ;;  %2601 = vrot.lane.b32.xlu0 %v4665_v62, %s3845_s21  ;;  %3096 = vmatprep.subr.bf16.mxu1 %v3729_v46  ;;  %v3711_v41 = vcombine.high %v2613_v43, %v2617_v23  ;;  %v3710_v52 = vcombine.low %v2613_v43, %v2617_v23 }
 0x18f   : > { %1978 = vst [vmem:[#allocation2 + $0x68] sm:$0xf] %v1974_v33  ;;  %v1973_v21 = vsel %vm261_vm1, %v1968_v48, %v1971_v44  ;;  %3097 = vmatpush1.bf16.msra.mxu1 %v3728_v20  ;;  %v2079_v2 = vpop.permute.xlu1 %2078 }
 0x190   : > { %1977 = vst [vmem:[#allocation2 + $0x48] sm:$0xf] %v1973_v21  ;;  %v2081_v40 = vrot.slane %v2079_v2, 4  ;;  %v2077_v1 = vpop.permute.xlu0 %2076 }
 0x191   : > { %v2080_v38 = vrot.slane %v2077_v1, 4 }
 0x192   : > { %v2083_v3 = vsel %vm261_vm1, %v2079_v2, %v2081_v40  ;;  %v2625_v7 = vld [vmem:[#allocation2 + $0x60] sm:$0xff]  ;;  %1196 = vperm.xlu0 %3817, %v246_v26  }
 0x193   : > { %2087 = vst [vmem:[#allocation2 + $0x6c] sm:$0xf] %v2083_v3  ;;  %v2082_v62 = vsel %vm261_vm1, %v2077_v1, %v2080_v38  ;;  %v1841_v0 = vpop.permute.xlu1 %1840  ;;  %v2621_v55 = vld [vmem:[#allocation2 + $0x40] sm:$0xff] }
 0x194   : > { %2086 = vst [vmem:[#allocation2 + $0x4c] sm:$0xf] %v2082_v62  ;;  %v1843_v8 = vrot.slane %v1841_v0, 4  ;;  %v1839_v36 = vpop.permute.xlu0 %1838  ;;  %v3718_v30 = vcombine.low %v2621_v55, %v2625_v7  ;;  %v3719_v15 = vcombine.high %v2621_v55, %v2625_v7 }
 0x195   : > { %v1842_v54 = vrot.slane %v1839_v36, 4 }
 0x196   : > { %v1845_v42 = vsel %vm278_vm2, %v1841_v0, %v1843_v8  ;;  %3057 = vmatprep.subr.bf16.mxu0 %v3719_v15 }
 0x197   : > { %1849 = vst [vmem:[#allocation2 + $0x220] sm:$0xf] %v1845_v42  ;;  %v1844_v45 = vsel %vm278_vm2, %v1839_v36, %v1842_v54  ;;  %3058 = vmatpush1.bf16.msra.mxu0 %v3718_v30  ;;  %v1950_v31 = vpop.permute.xlu1 %1949 }
 0x198   : > { %1848 = vst [vmem:[#allocation2 + $0x200] sm:$0xf] %v1844_v45  ;;  %v1952_v14 = vrot.slane %v1950_v31, 4  ;;  %v1948_v53 = vpop.permute.xlu0 %1947  ;;  %3059 = vmatprep.subr.bf16.mxu0 %v3711_v41  ;;  %v2663_v45 = vld [vmem:[#allocation2 + $0x190] sm:$0xff] }
 0x199   : > { %v1951_v16 = vrot.slane %v1948_v53, 4 }
 0x19a   : > { %v1954_v28 = vsel %vm278_vm2, %v1950_v31, %v1952_v14  ;;  %v2626_v34 = vld [vmem:[#allocation2 + $0x68] sm:$0xff]  ;;  %v2667_v31 = vld [vmem:[#allocation2 + $0x1b0] sm:$0xff] }
 0x19b   : > { %1958 = vst [vmem:[#allocation2 + $0x224] sm:$0xf] %v1954_v28  ;;  %v1953_v60 = vsel %vm278_vm2, %v1948_v53, %v1951_v16  ;;  %v2059_v4 = vpop.permute.xlu1 %2058  ;;  %v2622_v6 = vld [vmem:[#allocation2 + $0x48] sm:$0xff]  ;;  %3060 = vmatpush1.bf16.msra.mxu0 %v3710_v52 }
 0x19c   : > { %1957 = vst [vmem:[#allocation2 + $0x204] sm:$0xf] %v1953_v60  ;;  %v2061_v9 = vrot.slane %v2059_v4, 4  ;;  %v2057_v22 = vpop.permute.xlu0 %2056  ;;  %v3720_v27 = vcombine.low %v2622_v6, %v2626_v34  ;;  %v3721_v29 = vcombine.high %v2622_v6, %v2626_v34 }
 0x19d   : > { %v2060_v10 = vrot.slane %v2057_v22, 4 }
 0x19e   : > { %v2063_v12 = vsel %vm278_vm2, %v2059_v4, %v2061_v9  ;;  %3098 = vmatprep.subr.bf16.mxu1 %v3721_v29  ;;  %v3763_v9 = vcombine.high %v2663_v45, %v2667_v31 }
 0x19f   : > { %2067 = vst [vmem:[#allocation2 + $0x228] sm:$0xf] %v2063_v12  ;;  %v2062_v57 = vsel %vm278_vm2, %v2057_v22, %v2060_v10  ;;  %3099 = vmatpush1.bf16.msra.mxu1 %v3720_v27  ;;  %v2168_v47 = vpop.permute.xlu1 %2167  ;;  %v3762_v12 = vcombine.low %v2663_v45, %v2667_v31 }
 0x1a0   : > { %2066 = vst [vmem:[#allocation2 + $0x208] sm:$0xf] %v2062_v57  ;;  %v2170_v51 = vrot.slane %v2168_v47, 4  ;;  %v2166_v63 = vpop.permute.xlu0 %2165  ;;  %3100 = vmatprep.subr.bf16.mxu1 %v3713_v59 }
 0x1a1   : > { %v2169_v11 = vrot.slane %v2166_v63, 4 }
 0x1a2   : > { %v2172_v50 = vsel %vm278_vm2, %v2168_v47, %v2170_v51  ;;  %v2681_v61 = vld [vmem:[#allocation2 + $0x220] sm:$0xff]  ;;  %v2664_v51 = vld [vmem:[#allocation2 + $0x198] sm:$0xff] }
 0x1a3   : > { %2176 = vst [vmem:[#allocation2 + $0x22c] sm:$0xf] %v2172_v50  ;;  %v2171_v13 = vsel %vm278_vm2, %v2166_v63, %v2169_v11  ;;  %v2261_v35 = vpop.permute.xlu1 %2260  ;;  %v2677_v24 = vld [vmem:[#allocation2 + $0x200] sm:$0xff]  ;;  %3101 = vmatpush1.bf16.msra.mxu1 %v3712_v18  ;;  %v2668_v63 = vld [vmem:[#allocation2 + $0x1b8] sm:$0xff] }
 0x1a4   : > { %2175 = vst [vmem:[#allocation2 + $0x20c] sm:$0xf] %v2171_v13  ;;  %v2263_v58 = vrot.slane %v2261_v35, 4  ;;  %v2259_v56 = vpop.permute.xlu0 %2258  ;;  %v3774_v19 = vcombine.low %v2677_v24, %v2681_v61  ;;  %v3775_v39 = vcombine.high %v2677_v24, %v2681_v61 }
 0x1a5   : > { %v2262_v5 = vrot.slane %v2259_v56, 4 }
 0x1a6   : > { %v2265_v32 = vsel %vm261_vm1, %v2261_v35, %v2263_v58  ;;  %3075 = vmatprep.subr.bf16.mxu0 %v3775_v39  ;;  %v3765_v39 = vcombine.high %v2664_v51, %v2668_v63 }
 0x1a7   : > { %2269 = vst [vmem:[#allocation2 + $0x1f0] sm:$0xf] %v2265_v32  ;;  %v2264_v48 = vsel %vm261_vm1, %v2259_v56, %v2262_v5  ;;  %3076 = vmatpush2.bf16.msra.mxu0 %v3774_v19  ;;  %v2370_v20 = vpop.permute.xlu1 %2369 }
 0x1a8   : > { %2268 = vst [vmem:[#allocation2 + $0x1d0] sm:$0xf] %v2264_v48  ;;  %v2372_v46 = vrot.slane %v2370_v20, 4  ;;  %v2368_v44 = vpop.permute.xlu0 %2367 }
 0x1a9   : > { %v2371_v33 = vrot.slane %v2368_v44, 4 }
 0x1aa   : > { %v4835_v21 = vpop.f32.mrf.mxu0  ;;  %v2374_v2 = vsel %vm261_vm1, %v2370_v20, %v2372_v46  ;;  %v2682_v26 = vld [vmem:[#allocation2 + $0x228] sm:$0xff]  ;;  %3078 = vmatmul.mubr.bf16.vlgmr.msra.gmra.mxu0 %v4474_v49  ;;  %v3764_v46 = vcombine.low %v2664_v51, %v2668_v63 }
 0x1ab   : > { %2378 = vst [vmem:[#allocation2 + $0x1f4] sm:$0xf] %v2374_v2  ;;  %v2373_v40 = vsel %vm261_vm1, %v2368_v44, %v2371_v33  ;;  %v2479_v1 = vpop.permute.xlu1 %2478  ;;  %v2678_v38 = vld [vmem:[#allocation2 + $0x208] sm:$0xff]  ;;  %3784 = vmatprep.mubr.msk.bf16.mxu0 %vm1565_vm0, %v4136_v37 }
 0x1ac   : > { %v4842_v43 = vpop.f32.mrf.mxu0  ;;  %2377 = vst [vmem:[#allocation2 + $0x1d4] sm:$0xf] %v2373_v40  ;;  %v2481_v23 = vrot.slane %v2479_v1, 4  ;;  %v2477_v3 = vpop.permute.xlu0 %2476  ;;  %v3776_v7 = vcombine.low %v2678_v38, %v2682_v26  ;;  %v3777_v62 = vcombine.high %v2678_v38, %v2682_v26 }
 0x1ad   : > { %v2480_v0 = vrot.slane %v2477_v3, 4 }
 0x1ae   : > { %v1607_v55 = vpop.f32.mrf.mxu0  ;;  %v2483_v8 = vsel %vm261_vm1, %v2479_v1, %v2481_v23  ;;  %3116 = vmatprep.subr.bf16.mxu1 %v3777_v62 }
 0x1af   : > { %2487 = vst [vmem:[#allocation2 + $0x1f8] sm:$0xf] %v2483_v8  ;;  %v2482_v36 = vsel %vm261_vm1, %v2477_v3, %v2480_v0  ;;  %3117 = vmatpush2.bf16.msra.mxu1 %v3776_v7  ;;  %v2588_v30 = vpop.permute.xlu1 %2587 }
 0x1b0   : > { %v1608_v15 = vpop.f32.mrf.mxu0  ;;  %2486 = vst [vmem:[#allocation2 + $0x1d8] sm:$0xf] %v2482_v36  ;;  %v2590_v41 = vrot.slane %v2588_v30, 4  ;;  %v2586_v54 = vpop.permute.xlu0 %2585 }
 0x1b1   : > { %v2589_v42 = vrot.slane %v2586_v54, 4 }
 0x1b2   : > { %v4846_v52 = vpop.f32.mrf.mxu1  ;;  %v2592_v14 = vsel %vm261_vm1, %v2588_v30, %v2590_v41  ;;  %v2675_v53 = vld [vmem:[#allocation2 + $0x1f0] sm:$0xff]  ;;  %3119 = vmatmul.mubr.bf16.vlgmr.msra.gmra.mxu1 %v4474_v49 }
 0x1b3   : > { %2596 = vst [vmem:[#allocation2 + $0x1fc] sm:$0xf] %v2592_v14  ;;  %v2591_v16 = vsel %vm261_vm1, %v2586_v54, %v2589_v42  ;;  %v2240_v17 = vpop.permute.xlu1 %2239  ;;  %v2671_v25 = vld [vmem:[#allocation2 + $0x1d0] sm:$0xff]  ;;  %3785 = vmatprep.mubr.msk.bf16.mxu1 %vm1565_vm0, %v4136_v37 }
 0x1b4   : > { %v4853_v28 = vpop.f32.mrf.mxu1  ;;  %2595 = vst [vmem:[#allocation2 + $0x1dc] sm:$0xf] %v2591_v16  ;;  %v2242_v34 = vrot.slane %v2240_v17, 4  ;;  %v2238_v60 = vpop.permute.xlu0 %2237  ;;  %v3770_v4 = vcombine.low %v2671_v25, %v2675_v53  ;;  %v3771_v6 = vcombine.high %v2671_v25, %v2675_v53 }
 0x1b5   : > { %v2241_v22 = vrot.slane %v2238_v60, 4 }
 0x1b6   : > { %v1648_v27 = vpop.f32.mrf.mxu1  ;;  %v2244_v29 = vsel %vm278_vm2, %v2240_v17, %v2242_v34  ;;  %3127 = vmatprep.subr.bf16.mxu0 %v3771_v6 }
 0x1b7   : > { %2248 = vst [vmem:[#allocation2 + $0x170] sm:$0xf] %v2244_v29  ;;  %v2243_v59 = vsel %vm278_vm2, %v2238_v60, %v2241_v22  ;;  %3128 = vmatpush1.bf16.msra.mxu0 %v3770_v4  ;;  %v2349_v10 = vpop.permute.xlu1 %2348 }
 0x1b8   : > { %v1649_v37 = vpop.f32.mrf.mxu1  ;;  %2247 = vst [vmem:[#allocation2 + $0x150] sm:$0xf] %v2243_v59  ;;  %v2351_v57 = vrot.slane %v2349_v10, 4  ;;  %v2347_v47 = vpop.permute.xlu0 %2346  ;;  %3129 = vmatprep.subr.bf16.mxu0 %v3763_v9  ;;  %v2639_v59 = vld [vmem:[#allocation2 + $0xd0] sm:$0xff] }
 0x1b9   : > { %v2350_v18 = vrot.slane %v2347_v47, 4 }
 0x1ba   : > { %v2353_v11 = vsel %vm278_vm2, %v2349_v10, %v2351_v57  ;;  %v2676_v50 = vld [vmem:[#allocation2 + $0x1f8] sm:$0xff]  ;;  %v2643_v10 = vld [vmem:[#allocation2 + $0xf0] sm:$0xff] }
 0x1bb   : > { %2357 = vst [vmem:[#allocation2 + $0x174] sm:$0xf] %v2353_v11  ;;  %v2352_v61 = vsel %vm278_vm2, %v2347_v47, %v2350_v18  ;;  %v2458_v13 = vpop.permute.xlu1 %2457  ;;  %v2672_v35 = vld [vmem:[#allocation2 + $0x1d8] sm:$0xff]  ;;  %3130 = vmatpush1.bf16.msra.mxu0 %v3762_v12 }
 0x1bc   : > { %2356 = vst [vmem:[#allocation2 + $0x154] sm:$0xf] %v2352_v61  ;;  %v2460_v24 = vrot.slane %v2458_v13, 4  ;;  %v2456_v58 = vpop.permute.xlu0 %2455  ;;  %v3772_v56 = vcombine.low %v2672_v35, %v2676_v50  ;;  %v3773_v19 = vcombine.high %v2672_v35, %v2676_v50  ;;  %v3739_v61 = vcombine.high %v2639_v59, %v2643_v10 }
 0x1bd   : > { %v2459_v5 = vrot.slane %v2456_v58, 4 }
 0x1be   : > { %v2462_v32 = vsel %vm278_vm2, %v2458_v13, %v2460_v24  ;;  %3168 = vmatprep.subr.bf16.mxu1 %v3773_v19 }
 0x1bf   : > { %2466 = vst [vmem:[#allocation2 + $0x178] sm:$0xf] %v2462_v32  ;;  %v2461_v48 = vsel %vm278_vm2, %v2456_v58, %v2459_v5  ;;  %3169 = vmatpush1.bf16.msra.mxu1 %v3772_v56  ;;  %v2567_v20 = vpop.permute.xlu1 %2566  ;;  %v3738_v56 = vcombine.low %v2639_v59, %v2643_v10  ;;  %v2640_v32 = vld [vmem:[#allocation2 + $0xd8] sm:$0xff] }
 0x1c0   : > { %2465 = vst [vmem:[#allocation2 + $0x158] sm:$0xf] %v2461_v48  ;;  %v2569_v44 = vrot.slane %v2567_v20, 4  ;;  %v2565_v33 = vpop.permute.xlu0 %2564  ;;  %3170 = vmatprep.subr.bf16.mxu1 %v3765_v39  ;;  %v2644_v48 = vld [vmem:[#allocation2 + $0xf8] sm:$0xff] }
 0x1c1   : > { %v2568_v2 = vrot.slane %v2565_v33, 4 }
 0x1c2   : > { %v2571_v26 = vsel %vm278_vm2, %v2567_v20, %v2569_v44  ;;  %v2659_v40 = vld [vmem:[#allocation2 + $0x170] sm:$0xff] }
 0x1c3   : > { %2575 = vst [vmem:[#allocation2 + $0x17c] sm:$0xf] %v2571_v26  ;;  %v2570_v1 = vsel %vm278_vm2, %v2565_v33, %v2568_v2  ;;  %v2224_v38 = vpop.permute.xlu1 %2223  ;;  %v2655_v23 = vld [vmem:[#allocation2 + $0x150] sm:$0xff]  ;;  %3171 = vmatpush1.bf16.msra.mxu1 %v3764_v46 }
 0x1c4   : > { %2574 = vst [vmem:[#allocation2 + $0x15c] sm:$0xf] %v2570_v1  ;;  %v2226_v3 = vrot.slane %v2224_v38, 4  ;;  %v2222_v7 = vpop.permute.xlu0 %2221  ;;  %v3754_v62 = vcombine.low %v2655_v23, %v2659_v40  ;;  %v3755_v0 = vcombine.high %v2655_v23, %v2659_v40  ;;  %v3741_v23 = vcombine.high %v2640_v32, %v2644_v48 }
 0x1c5   : > { %v2225_v55 = vrot.slane %v2222_v7, 4 }
 0x1c6   : > { %v2228_v8 = vsel %vm261_vm1, %v2224_v38, %v2226_v3  ;;  %3131 = vmatprep.subr.bf16.mxu0 %v3755_v0 }
 0x1c7   : > { %2232 = vst [vmem:[#allocation2 + $0x130] sm:$0xf] %v2228_v8  ;;  %v2227_v36 = vsel %vm261_vm1, %v2222_v7, %v2225_v55  ;;  %3132 = vmatpush1.bf16.msra.mxu0 %v3754_v62  ;;  %v2333_v30 = vpop.permute.xlu1 %2332  ;;  %v3740_v55 = vcombine.low %v2640_v32, %v2644_v48 }
 0x1c8   : > { %2231 = vst [vmem:[#allocation2 + $0x110] sm:$0xf] %v2227_v36  ;;  %v2335_v15 = vrot.slane %v2333_v30, 4  ;;  %v2331_v41 = vpop.permute.xlu0 %2330 }
 0x1c9   : > { %v2334_v54 = vrot.slane %v2331_v41, 4 }
 0x1ca   : > { %v2337_v42 = vsel %vm261_vm1, %v2333_v30, %v2335_v15  ;;  %v2660_v45 = vld [vmem:[#allocation2 + $0x178] sm:$0xff] }
 0x1cb   : > { %2341 = vst [vmem:[#allocation2 + $0x134] sm:$0xf] %v2337_v42  ;;  %v2336_v31 = vsel %vm261_vm1, %v2331_v41, %v2334_v54  ;;  %v2442_v14 = vpop.permute.xlu1 %2441  ;;  %v2656_v53 = vld [vmem:[#allocation2 + $0x158] sm:$0xff] }
 0x1cc   : > { %2340 = vst [vmem:[#allocation2 + $0x114] sm:$0xf] %v2336_v31  ;;  %v2444_v16 = vrot.slane %v2442_v14, 4  ;;  %v2440_v17 = vpop.permute.xlu0 %2439  ;;  %v3756_v25 = vcombine.low %v2656_v53, %v2660_v45  ;;  %v3757_v34 = vcombine.high %v2656_v53, %v2660_v45 }
 0x1cd   : > { %v2443_v60 = vrot.slane %v2440_v17, 4 }
 0x1ce   : > { %v2446_v4 = vsel %vm261_vm1, %v2442_v14, %v2444_v16  ;;  %3172 = vmatprep.subr.bf16.mxu1 %v3757_v34 }
 0x1cf   : > { %2450 = vst [vmem:[#allocation2 + $0x138] sm:$0xf] %v2446_v4  ;;  %v2445_v6 = vsel %vm261_vm1, %v2440_v17, %v2443_v60  ;;  %3173 = vmatpush1.bf16.msra.mxu1 %v3756_v25  ;;  %v2551_v9 = vpop.permute.xlu1 %2550 }
 0x1d0   : > { %2449 = vst [vmem:[#allocation2 + $0x118] sm:$0xf] %v2445_v6  ;;  %v2553_v22 = vrot.slane %v2551_v9, 4  ;;  %v2549_v27 = vpop.permute.xlu0 %2548 }
 0x1d1   : > { %v2552_v29 = vrot.slane %v2549_v27, 4 }
 0x1d2   : > { %v2555_v12 = vsel %vm261_vm1, %v2551_v9, %v2553_v22  ;;  %v2651_v37 = vld [vmem:[#allocation2 + $0x130] sm:$0xff] }
 0x1d3   : > { %2559 = vst [vmem:[#allocation2 + $0x13c] sm:$0xf] %v2555_v12  ;;  %v2554_v57 = vsel %vm261_vm1, %v2549_v27, %v2552_v29  ;;  %v2204_v47 = vpop.permute.xlu1 %2203  ;;  %v2647_v18 = vld [vmem:[#allocation2 + $0x110] sm:$0xff] }
 0x1d4   : > { %2558 = vst [vmem:[#allocation2 + $0x11c] sm:$0xf] %v2554_v57  ;;  %v2206_v51 = vrot.slane %v2204_v47, 4  ;;  %v2202_v63 = vpop.permute.xlu0 %2201  ;;  %v3746_v11 = vcombine.low %v2647_v18, %v2651_v37  ;;  %v3747_v50 = vcombine.high %v2647_v18, %v2651_v37 }
 0x1d5   : > { %v2205_v13 = vrot.slane %v2202_v63, 4 }
 0x1d6   : > { %v2208_v35 = vsel %vm278_vm2, %v2204_v47, %v2206_v51  ;;  %3133 = vmatprep.subr.bf16.mxu0 %v3747_v50 }
 0x1d7   : > { %2212 = vst [vmem:[#allocation2 + $0xb0] sm:$0xf] %v2208_v35  ;;  %v2207_v24 = vsel %vm278_vm2, %v2202_v63, %v2205_v13  ;;  %3134 = vmatpush1.bf16.msra.mxu0 %v3746_v11  ;;  %v2313_v58 = vpop.permute.xlu1 %2312  ;;  %v2615_v35 = vld [vmem:[#allocation2 + $0x10] sm:$0xff] }
 0x1d8   : > { %2211 = vst [vmem:[#allocation2 + $0x90] sm:$0xf] %v2207_v24  ;;  %v2315_v19 = vrot.slane %v2313_v58, 4  ;;  %v2311_v39 = vpop.permute.xlu0 %2310  ;;  %3135 = vmatprep.subr.bf16.mxu0 %v3739_v61  ;;  %v2619_v24 = vld [vmem:[#allocation2 + $0x30] sm:$0xff] }
 0x1d9   : > { %v2314_v5 = vrot.slane %v2311_v39, 4 }
 0x1da   : > { %v2317_v20 = vsel %vm278_vm2, %v2313_v58, %v2315_v19  ;;  %v2652_v46 = vld [vmem:[#allocation2 + $0x138] sm:$0xff] }
 0x1db   : > { %2321 = vst [vmem:[#allocation2 + $0xb4] sm:$0xf] %v2317_v20  ;;  %v2316_v44 = vsel %vm278_vm2, %v2311_v39, %v2314_v5  ;;  %v2422_v33 = vpop.permute.xlu1 %2421  ;;  %v2648_v2 = vld [vmem:[#allocation2 + $0x118] sm:$0xff]  ;;  %3136 = vmatpush1.bf16.msra.mxu0 %v3738_v56 }
 0x1dc   : > { %2320 = vst [vmem:[#allocation2 + $0x94] sm:$0xf] %v2316_v44  ;;  %v2424_v26 = vrot.slane %v2422_v33, 4  ;;  %v2420_v40 = vpop.permute.xlu0 %2419  ;;  %v3748_v1 = vcombine.low %v2648_v2, %v2652_v46  ;;  %v3749_v38 = vcombine.high %v2648_v2, %v2652_v46  ;;  %v3715_v44 = vcombine.high %v2615_v35, %v2619_v24 }
 0x1dd   : > { %v2423_v3 = vrot.slane %v2420_v40, 4 }
 0x1de   : > { %v2426_v7 = vsel %vm278_vm2, %v2422_v33, %v2424_v26  ;;  %3174 = vmatprep.subr.bf16.mxu1 %v3749_v38 }
 0x1df   : > { %2430 = vst [vmem:[#allocation2 + $0xb8] sm:$0xf] %v2426_v7  ;;  %v2425_v62 = vsel %vm278_vm2, %v2420_v40, %v2423_v3  ;;  %3175 = vmatpush1.bf16.msra.mxu1 %v3748_v1  ;;  %v2531_v0 = vpop.permute.xlu1 %2530  ;;  %v3714_v1 = vcombine.low %v2615_v35, %v2619_v24  ;;  %v2616_v7 = vld [vmem:[#allocation2 + $0x18] sm:$0xff] }
 0x1e0   : > { %2429 = vst [vmem:[#allocation2 + $0x98] sm:$0xf] %v2425_v62  ;;  %v2533_v8 = vrot.slane %v2531_v0, 4  ;;  %v2529_v36 = vpop.permute.xlu0 %2528  ;;  %3176 = vmatprep.subr.bf16.mxu1 %v3741_v23  ;;  %v2620_v62 = vld [vmem:[#allocation2 + $0x38] sm:$0xff] }
 0x1e1   : > { %v2532_v30 = vrot.slane %v2529_v36, 4 }
 0x1e2   : > { %v2535_v15 = vsel %vm278_vm2, %v2531_v0, %v2533_v8  ;;  %v2635_v41 = vld [vmem:[#allocation2 + $0xb0] sm:$0xff] }
 0x1e3   : > { %2539 = vst [vmem:[#allocation2 + $0xbc] sm:$0xf] %v2535_v15  ;;  %v2534_v54 = vsel %vm278_vm2, %v2529_v36, %v2532_v30  ;;  %v2188_v42 = vpop.permute.xlu1 %2187  ;;  %v2631_v45 = vld [vmem:[#allocation2 + $0x90] sm:$0xff]  ;;  %3177 = vmatpush1.bf16.msra.mxu1 %v3740_v55 }
 0x1e4   : > { %2538 = vst [vmem:[#allocation2 + $0x9c] sm:$0xf] %v2534_v54  ;;  %v2190_v31 = vrot.slane %v2188_v42, 4  ;;  %v2186_v14 = vpop.permute.xlu0 %2185  ;;  %v3730_v53 = vcombine.low %v2631_v45, %v2635_v41  ;;  %v3731_v16 = vcombine.high %v2631_v45, %v2635_v41  ;;  %v3717_v45 = vcombine.high %v2616_v7, %v2620_v62 }
 0x1e5   : > { %v2189_v17 = vrot.slane %v2186_v14, 4 }
 0x1e6   : > { %v2192_v25 = vsel %vm261_vm1, %v2188_v42, %v2190_v31  ;;  %3137 = vmatprep.subr.bf16.mxu0 %v3731_v16 }
 0x1e7   : > { %2196 = vst [vmem:[#allocation2 + $0x70] sm:$0xf] %v2192_v25  ;;  %v2191_v34 = vsel %vm261_vm1, %v2186_v14, %v2189_v17  ;;  %3138 = vmatpush1.bf16.msra.mxu0 %v3730_v53  ;;  %v2297_v60 = vpop.permute.xlu1 %2296  ;;  %v3716_v17 = vcombine.low %v2616_v7, %v2620_v62 }
 0x1e8   : > { %2195 = vst [vmem:[#allocation2 + $0x50] sm:$0xf] %v2191_v34  ;;  %v2299_v4 = vrot.slane %v2297_v60, 4  ;;  %v2295_v6 = vpop.permute.xlu0 %2294 }
 0x1e9   : > { %v2298_v9 = vrot.slane %v2295_v6, 4 }
 0x1ea   : > { %v2301_v22 = vsel %vm261_vm1, %v2297_v60, %v2299_v4  ;;  %v2636_v27 = vld [vmem:[#allocation2 + $0xb8] sm:$0xff] }
 0x1eb   : > { %2305 = vst [vmem:[#allocation2 + $0x74] sm:$0xf] %v2301_v22  ;;  %v2300_v29 = vsel %vm261_vm1, %v2295_v6, %v2298_v9  ;;  %v2406_v59 = vpop.permute.xlu1 %2405  ;;  %v2632_v10 = vld [vmem:[#allocation2 + $0x98] sm:$0xff] }
 0x1ec   : > { %2304 = vst [vmem:[#allocation2 + $0x54] sm:$0xf] %v2300_v29  ;;  %v2408_v12 = vrot.slane %v2406_v59, 4  ;;  %v2404_v37 = vpop.permute.xlu0 %2403  ;;  %v3732_v57 = vcombine.low %v2632_v10, %v2636_v27  ;;  %v3733_v47 = vcombine.high %v2632_v10, %v2636_v27 }
 0x1ed   : > { %v2407_v18 = vrot.slane %v2404_v37, 4 }
 0x1ee   : > { %v2410_v51 = vsel %vm261_vm1, %v2406_v59, %v2408_v12  ;;  %3178 = vmatprep.subr.bf16.mxu1 %v3733_v47 }
 0x1ef   : > { %2414 = vst [vmem:[#allocation2 + $0x78] sm:$0xf] %v2410_v51  ;;  %v2409_v63 = vsel %vm261_vm1, %v2404_v37, %v2407_v18  ;;  %3179 = vmatpush1.bf16.msra.mxu1 %v3732_v57  ;;  %v2515_v11 = vpop.permute.xlu1 %2514 }
 0x1f0   : > { %2413 = vst [vmem:[#allocation2 + $0x58] sm:$0xf] %v2409_v63  ;;  %v2517_v50 = vrot.slane %v2515_v11, 4  ;;  %v2513_v61 = vpop.permute.xlu0 %2512 }
 0x1f1   : > { %v2516_v13 = vrot.slane %v2513_v61, 4 }
 0x1f2   : > { %v2519_v58 = vsel %vm261_vm1, %v2515_v11, %v2517_v50  ;;  %v2627_v56 = vld [vmem:[#allocation2 + $0x70] sm:$0xff] }
 0x1f3   : > { %2523 = vst [vmem:[#allocation2 + $0x7c] sm:$0xf] %v2519_v58  ;;  %v2518_v19 = vsel %vm261_vm1, %v2513_v61, %v2516_v13  ;;  %v2277_v39 = vpop.permute.xlu1 %2276  ;;  %v2623_v5 = vld [vmem:[#allocation2 + $0x50] sm:$0xff] }
 0x1f4   : > { %2522 = vst [vmem:[#allocation2 + $0x5c] sm:$0xf] %v2518_v19  ;;  %v2279_v32 = vrot.slane %v2277_v39, 4  ;;  %v2275_v48 = vpop.permute.xlu0 %2274  ;;  %v3722_v20 = vcombine.low %v2623_v5, %v2627_v56  ;;  %v3723_v46 = vcombine.high %v2623_v5, %v2627_v56 }
 0x1f5   : > { %v2278_v33 = vrot.slane %v2275_v48, 4 }
 0x1f6   : > { %v2281_v2 = vsel %vm278_vm2, %v2277_v39, %v2279_v32  ;;  %3139 = vmatprep.subr.bf16.mxu0 %v3723_v46 }
 0x1f7   : > { %2285 = vst [vmem:[#allocation2 + $0x230] sm:$0xf] %v2281_v2  ;;  %v2280_v26 = vsel %vm278_vm2, %v2275_v48, %v2278_v33  ;;  %3140 = vmatpush1.bf16.msra.mxu0 %v3722_v20  ;;  %v2386_v40 = vpop.permute.xlu1 %2385 }
 0x1f8   : > { %2284 = vst [vmem:[#allocation2 + $0x210] sm:$0xf] %v2280_v26  ;;  %v2388_v38 = vrot.slane %v2386_v40, 4  ;;  %v2384_v23 = vpop.permute.xlu0 %2383  ;;  %3141 = vmatprep.subr.bf16.mxu0 %v3715_v44 }
 0x1f9   : > { %v2387_v3 = vrot.slane %v2384_v23, 4 }
 0x1fa   : > { %v2390_v0 = vsel %vm278_vm2, %v2386_v40, %v2388_v38  ;;  %v2628_v55 = vld [vmem:[#allocation2 + $0x78] sm:$0xff] }
 0x1fb   : > { %2394 = vst [vmem:[#allocation2 + $0x234] sm:$0xf] %v2390_v0  ;;  %v2389_v8 = vsel %vm278_vm2, %v2384_v23, %v2387_v3  ;;  %v2495_v36 = vpop.permute.xlu1 %2494  ;;  %v2624_v30 = vld [vmem:[#allocation2 + $0x58] sm:$0xff]  ;;  %3142 = vmatpush1.bf16.msra.mxu0 %v3714_v1 }
 0x1fc   : > { %2393 = vst [vmem:[#allocation2 + $0x214] sm:$0xf] %v2389_v8  ;;  %v2497_v15 = vrot.slane %v2495_v36, 4  ;;  %v2493_v41 = vpop.permute.xlu0 %2492  ;;  %v3724_v54 = vcombine.low %v2624_v30, %v2628_v55  ;;  %v3725_v42 = vcombine.high %v2624_v30, %v2628_v55 }
 0x1fd   : > { %v2496_v31 = vrot.slane %v2493_v41, 4 }
 0x1fe   : > { %v2499_v14 = vsel %vm278_vm2, %v2495_v36, %v2497_v15  ;;  %3180 = vmatprep.subr.bf16.mxu1 %v3725_v42 }
 0x1ff   : > { %2503 = vst [vmem:[#allocation2 + $0x238] sm:$0xf] %v2499_v14  ;;  %v2498_v53 = vsel %vm278_vm2, %v2493_v41, %v2496_v31  ;;  %3181 = vmatpush1.bf16.msra.mxu1 %v3724_v54  ;;  %v2604_v16 = vpop.permute.xlu1 %2603 }
 0x200   : > { %2502 = vst [vmem:[#allocation2 + $0x218] sm:$0xf] %v2498_v53  ;;  %v2606_v25 = vrot.slane %v2604_v16, 4  ;;  %v2602_v34 = vpop.permute.xlu0 %2601  ;;  %3182 = vmatprep.subr.bf16.mxu1 %v3717_v45 }
 0x201   : > { %v2605_v60 = vrot.slane %v2602_v34, 4 }
 0x202   : > { %v2608_v4 = vsel %vm278_vm2, %v2604_v16, %v2606_v25  ;;  %v2683_v6 = vld [vmem:[#allocation2 + $0x230] sm:$0xff] }
 0x203   : > { %2612 = vst [vmem:[#allocation2 + $0x23c] sm:$0xf] %v2608_v4  ;;  %v2607_v9 = vsel %vm278_vm2, %v2602_v34, %v2605_v60  ;;  %v2679_v22 = vld [vmem:[#allocation2 + $0x210] sm:$0xff]  ;;  %3183 = vmatpush1.bf16.msra.mxu1 %v3716_v17 }
 0x204   : > { %2611 = vst [vmem:[#allocation2 + $0x21c] sm:$0xf] %v2607_v9  ;;  %v3778_v27 = vcombine.low %v2679_v22, %v2683_v6  ;;  %v3779_v29 = vcombine.high %v2679_v22, %v2683_v6 }
 0x206   : > { %3157 = vmatprep.subr.bf16.mxu0 %v3779_v29 }
 0x207   : > { %3158 = vmatpush2.bf16.msra.mxu0 %v3778_v27 }
 0x20a   : > { %3160 = vmatmul.mubr.bf16.vlgmr.msra.gmra.mxu0 %v4474_v49  ;;  %v2684_v59 = vld [vmem:[#allocation2 + $0x238] sm:$0xff]  ;;  %v1685_v10 = vpop.f32.mrf.mxu0 }
 0x20b   : > { %v2680_v12 = vld [vmem:[#allocation2 + $0x218] sm:$0xff] }
 0x20c   : > { %v3780_v37 = vcombine.low %v2680_v12, %v2684_v59  ;;  %v3781_v57 = vcombine.high %v2680_v12, %v2684_v59  ;;  %v1687_v47 = vpop.f32.mrf.mxu0 }
 0x20d   : > { %v1197_v18 = vpop.permute.xlu0 %1196 }
 0x20e   : > { %3198 = vmatprep.subr.bf16.mxu1 %v3781_v57  ;;  %v1604_v51 = vadd.f32 %v4835_v21, %v1197_v18  ;;  %v1606_v63 = vadd.f32 %v4842_v43, %v1197_v18  ;;  %v1645_v11 = vadd.f32 %v4846_v52, %v1197_v18  ;;  %v1647_v50 = vadd.f32 %v4853_v28, %v1197_v18  ;;  %v1689_v61 = vpop.f32.mrf.mxu0 }
 0x20f   : > { %3199 = vmatpush2.bf16.msra.mxu1 %v3780_v37  ;;  %v1686_v13 = vadd.f32 %v1685_v10, %v1197_v18  ;;  %v1688_v35 = vadd.f32 %v1687_v47, %v1197_v18 }
 0x210   : > { %1733 = vst [vmem:[%s4900_s29] sm:$0xff] %v1604_v51  ;;  %1734 = vst [vmem:[%s4900_s29 + $0x8] sm:$0xff] %v1606_v63  ;;  %v1690_v24 = vpop.f32.mrf.mxu0 }
 0x211   : > { %1735 = vst [vmem:[%s4900_s29 + $0x10] sm:$0xff] %v1645_v11  ;;  %1736 = vst [vmem:[%s4900_s29 + $0x18] sm:$0xff] %v1647_v50 }
 0x212   : > { %1737 = vst [vmem:[%s4900_s29 + $0x20] sm:$0xff] %v1686_v13  ;;  %1738 = vst [vmem:[%s4900_s29 + $0x28] sm:$0xff] %v1688_v35  ;;  %3201 = vmatmul.mubr.bf16.vlgmr.msra.gmra.mxu1 %v4474_v49  ;;  %v1726_v21 = vpop.f32.mrf.mxu1 }
 0x213   : > { %v1727_v43 = vadd.f32 %v1726_v21, %v1197_v18 }
 0x214   : > { %v1728_v52 = vpop.f32.mrf.mxu1 }
 0x215   : > { %1739 = vst [vmem:[%s4900_s29 + $0x30] sm:$0xff] %v1727_v43  ;;  %v1729_v28 = vadd.f32 %v1728_v52, %v1197_v18 }
 0x216   : > { %v1730_v58 = vpop.f32.mrf.mxu1 }
 0x217   : > { %1740 = vst [vmem:[%s4900_s29 + $0x38] sm:$0xff] %v1729_v28 }
 0x218   : > { %v1731_v56 = vpop.f32.mrf.mxu1 }
 0x26a   : > { %v3079_v19 = vpop.f32.mrf.mxu0 }
 0x26b   : > { %v3080_v39 = vadd.f32 %v3079_v19, %v1197_v18 }
 0x26c   : > { %v3081_v5 = vpop.f32.mrf.mxu0 }
 0x26d   : > { %3209 = vst [vmem:[%s4900_s29 + $0x40] sm:$0xff] %v3080_v39  ;;  %v3082_v32 = vadd.f32 %v3081_v5, %v1197_v18 }
 0x26e   : > { %v3083_v48 = vpop.f32.mrf.mxu0 }
 0x26f   : > { %3210 = vst [vmem:[%s4900_s29 + $0x48] sm:$0xff] %v3082_v32 }
 0x270   : > { %v3084_v49 = vpop.f32.mrf.mxu0 }
 0x272   : > { %v3120_v20 = vpop.f32.mrf.mxu1 }
 0x273   : > { %v3121_v46 = vadd.f32 %v3120_v20, %v1197_v18 }
 0x274   : > { %v3122_v44 = vpop.f32.mrf.mxu1 }
 0x275   : > { %3211 = vst [vmem:[%s4900_s29 + $0x50] sm:$0xff] %v3121_v46  ;;  %v3123_v33 = vadd.f32 %v3122_v44, %v1197_v18 }
 0x276   : > { %v3124_v2 = vpop.f32.mrf.mxu1 }
 0x277   : > { %3212 = vst [vmem:[%s4900_s29 + $0x58] sm:$0xff] %v3123_v33 }
 0x278   : > { %v3125_v26 = vpop.f32.mrf.mxu1 }
 0x2ca   : > { %v3161_v40 = vpop.f32.mrf.mxu0 }
 0x2cb   : > { %v3162_v1 = vadd.f32 %v3161_v40, %v1197_v18 }
 0x2cc   : > { %v3163_v38 = vpop.f32.mrf.mxu0 }
 0x2cd   : > { %3213 = vst [vmem:[%s4900_s29 + $0x60] sm:$0xff] %v3162_v1  ;;  %v3164_v23 = vadd.f32 %v3163_v38, %v1197_v18 }
 0x2ce   : > { %v3165_v3 = vpop.f32.mrf.mxu0 }
 0x2cf   : > { %3214 = vst [vmem:[%s4900_s29 + $0x68] sm:$0xff] %v3164_v23 }
 0x2d0   : > { %v3166_v7 = vpop.f32.mrf.mxu0 }
 0x2d2   : > { %v3202_v62 = vpop.f32.mrf.mxu1 }
 0x2d3   : > { %v3203_v0 = vadd.f32 %v3202_v62, %v1197_v18 }
 0x2d4   : > { %v3204_v55 = vpop.f32.mrf.mxu1 }
 0x2d5   : > { %3215 = vst [vmem:[%s4900_s29 + $0x70] sm:$0xff] %v3203_v0  ;;  %v3205_v8 = vadd.f32 %v3204_v55, %v1197_v18 }
 0x2d6   : > { %v3206_v36 = vpop.f32.mrf.mxu1 }
 0x2d7   : > { %3216 = vst [vmem:[%s4900_s29 + $0x78] sm:$0xff] %v3205_v8 }
 0x2d8   : > { %v3207_v30 = vpop.f32.mrf.mxu1 }
 0x2d9 PF: > { %s13_s14 = sadd.s32 1, %s3842_s14   ;;  %s4936_s12 = smov %s3838_s13 }
 0x2da   : > { %p10_p5 = scmp.ge.s32.totalorder %s13_s14, 4   ;;  %s4937_s13 = smov %s4939_s15 }
 0x2dc   :  { %12 = sbr.rel (!%p10_p5) target bundleno = 2 (0x2), region = 85 }

</bundles_post_ra>
